<compile_context>
chip_gen: v7x
topology: tpu7x:2x2x1
jax: 0.10.0
libtpu: 0.0.40
codegen_flags: <defaults>
</compile_context>

<pallas_src>
import jax
import jax.numpy as jnp
from jax import lax
from jax.experimental import pallas as pl
from jax.experimental.pallas import tpu as pltpu

NUM_INPUTS = 12   # row stride of the ConvTranspose2d == number of variadic inputs
SUB_H = 8         # rows per in-kernel sub-chunk (bounds vreg live ranges)


def _cdiv(a, b):
    return -(-a // b)


def _vmem_capacity_bytes():
    try:
        cap = getattr(pltpu.get_tpu_info(), "vmem_capacity_bytes", None)
        if cap:
            return int(cap)
    except Exception:
        pass
    return 64 << 20   # conservative (v7x-class) fallback


def _pick_tile_h(H, C, W, N, bytes_per_elem, vmem_budget_bytes):
    """H-tile that (a) fits the VMEM budget double-buffered, (b) is a multiple of 8 or the full
    H (the (8,128) sublane rule), and (c) keeps >= ~4 grid steps when N is small so v7x's two
    TensorCores both get work on this HBM-bound kernel."""
    # (12 inputs of width W + 1 output of width 12*W) x double buffer, per h-row, same dtype
    per_h = 2 * 2 * NUM_INPUTS * C * W * bytes_per_elem
    max_h = max(1, vmem_budget_bytes // per_h)
    if N < 4 and H > 8:                            # keep enough grid points for megacore
        cap = (_cdiv(H, _cdiv(4, N)) // 8) * 8
        max_h = min(max_h, max(8, cap))
    if H <= max_h:
        return H                                   # full dim is always a legal block extent
    top = (min(H, max_h) // 8) * 8
    for t in range(top, 0, -8):                    # largest multiple-of-8 divisor of H that fits
        if H % t == 0:
            return t
    return max(8, top)                             # awkward H: 8-aligned tile + cdiv grid (masked tail)


def construct_forward(xs, weight, bias):
    """xs: list of 12 NCHW arrays (N, C, H, W); weight: (C, C, 1, 1); bias: (C,).
    Returns the NCHW output (N, C, 12*H, W) of the PyTorch module, in the input dtype."""
    assert len(xs) == NUM_INPUTS
    N, C, H, W = xs[0].shape
    out_dtype = xs[0].dtype
    w2d = jnp.asarray(weight)[:, :, 0, 0].astype(jnp.float32)   # (C_in, C_out) -> SMEM scalars
    b1d = jnp.asarray(bias).reshape(C).astype(jnp.float32)      # (C,)          -> SMEM scalars

    vmem_cap = _vmem_capacity_bytes()
    vmem_budget = max(8 << 20, (vmem_cap * 2) // 5)   # ~51 MiB on 128 MiB parts, ~25 MiB on v7x
    elem_bytes = jnp.dtype(out_dtype).itemsize
    tile_h = _pick_tile_h(H, C, W, N, elem_bytes, vmem_budget)
    num_ht = _cdiv(H, tile_h)

    per_h = 2 * 2 * NUM_INPUTS * C * W * elem_bytes
    needed = per_h * tile_h + (2 << 20)
    vmem_limit = int(min(vmem_cap, max(vmem_budget + (8 << 20), needed)))
    vmem_limit = int(min(vmem_limit, vmem_cap * 3 // 4)) if vmem_cap * 3 // 4 >= needed else int(min(vmem_cap, needed))

    # NOTE: lane-dense output stores rely on W % 128 == 0 (true here: W=128); otherwise every
    # j*W slab store is a masked vst. TODO(synk): pad W to a multiple of 128 in the wrapper if
    # non-aligned W ever matters for performance.

    def kernel(w_ref, b_ref, *rest):
        x_refs = rest[:NUM_INPUTS]            # each (C, tile_h, W)
        o_ref = rest[NUM_INPUTS]              # (C, tile_h, 12*W)
        ht = pl.program_id(1)
        # hoist the scalar parameter reads (SMEM) out of all loops
        wv = [[w_ref[ci, co] for co in range(C)] for ci in range(C)]
        bv = [b_ref[co] for co in range(C)]

        def emit(hs, rows):
            """Produce `rows` (static) output rows starting at in-tile row offset `hs`."""
            h_abs = lax.broadcasted_iota(jnp.int32, (rows, 1), 0) + (ht * tile_h + hs)
            for j in range(NUM_INPUTS):
                # per-channel plane chunks: cheap VMEM loads, bounded vreg live ranges
                planes = [x_refs[j][ci, pl.ds(hs, rows), :].astype(jnp.float32)
                          for ci in range(C)]
                r = NUM_INPUTS * h_abs + j                       # output row index 12*h + j
                cnt = (jnp.minimum(NUM_INPUTS - 1, r)
                       - jnp.maximum(0, r - NUM_INPUTS * (H - 1)) + 1
                       ).astype(jnp.float32)                     # (rows, 1) bias multiplicity
                # TODO(synk): on v6e/v7x with bf16 inputs this mix could stay in bf16 on the VALU.
                for co in range(C):
                    y = cnt * bv[co]                             # (rows, 1)
                    for ci in range(C):
                        y = y + planes[ci] * wv[ci][co]          # broadcast -> (rows, W)
                    # j-th W-slab of the (h, 12*W) row group == output row 12*h + j
                    o_ref[co, pl.ds(hs, rows), j * W:(j + 1) * W] = y.astype(o_ref.dtype)

        n_full, rem = divmod(tile_h, SUB_H)
        if n_full:
            def body(s, carry):
                emit(pl.multiple_of(s * SUB_H, SUB_H), SUB_H)
                return carry
            lax.fori_loop(0, n_full, body, 0)
        if rem:                                  # only when tile_h == H and H % 8 != 0
            emit(n_full * SUB_H, rem)

    grid_spec = pltpu.PrefetchScalarGridSpec(
        num_scalar_prefetch=2,                   # weight + bias -> SMEM once, before the grid
        grid=(N, num_ht),
        in_specs=[pl.BlockSpec((None, C, tile_h, W),
                               lambda n, ht, w, b: (n, 0, ht, 0))
                  for _ in range(NUM_INPUTS)],
        out_specs=pl.BlockSpec((None, C, tile_h, NUM_INPUTS * W),
                               lambda n, ht, w, b: (n, 0, ht, 0)),
    )
    out = pl.pallas_call(
        kernel,
        out_shape=jax.ShapeDtypeStruct((N, C, H, NUM_INPUTS * W), out_dtype),
        grid_spec=grid_spec,
        compiler_params=pltpu.CompilerParams(
            dimension_semantics=("parallel", "parallel"),
            vmem_limit_bytes=vmem_limit),
    )(w2d, b1d, *xs)

    # (N, C, H, 12*W) -> (N, C, 12*H, W): contiguous row-major reshape => free, no HBM pass,
    # and already in the input dtype (no wrapper-side cast pass).
    return out.reshape(N, C, NUM_INPUTS * H, W)


def construct_ref(xs, weight, bias):
    """Pure-JAX reference mirroring the PyTorch module literally."""
    N, C, H, W = xs[0].shape
    w2d = weight[:, :, 0, 0]
    He = (H - 1) * NUM_INPUTS + 1
    enls = []
    for x in xs:
        y = jnp.einsum('nchw,cd->ndhw', x, w2d)             # 1x1 conv-transpose matmul
        enl = jnp.zeros((N, C, He, W), jnp.float32)
        enl = enl.at[:, :, ::NUM_INPUTS, :].set(y)          # stride-12 row up-sampling
        enl = enl + bias[None, :, None, None]               # bias on every output row
        enls.append(enl)
    total = jnp.zeros((N, C, He + NUM_INPUTS - 1, W), jnp.float32)
    for i in range(NUM_INPUTS):
        total = total.at[:, :, i:i + He, :].add(enls[i])    # ConstantPad2d((0,0,i,11-i)) + sum
    return total


if __name__ == "__main__":
    key = jax.random.PRNGKey(0)
    N, channels, H, W = 2, 4, 8, 128
    keys = jax.random.split(key, NUM_INPUTS + 2)

    xs = [jax.random.normal(keys[i], (N, channels, H, W), jnp.float32)
          for i in range(NUM_INPUTS)]
    # Synthetic ConvTranspose2d parameters (shapes from nn.ConvTranspose2d(C, C, 1, (12, 1)))
    weight = 0.1 * jax.random.normal(keys[-2], (channels, channels, 1, 1), jnp.float32)
    bias = 0.1 * jax.random.normal(keys[-1], (channels,), jnp.float32)

    out = construct_forward(xs, weight, bias)
    out = jax.block_until_ready(out)

    ref = construct_ref(xs, weight, bias)
    assert out.shape == (N, channels, NUM_INPUTS * H, W), out.shape
    assert jnp.allclose(out.astype(jnp.float32), ref, atol=1e-5, rtol=1e-5), \
        float(jnp.max(jnp.abs(out.astype(jnp.float32) - ref)))
    print("KERNEL_OK")
</pallas_src>

<mosaic_0001>
module attributes {stable_mosaic.version = 11 : i64} {
  func.func @kernel(%arg0: i32, %arg1: i32, %arg2: memref<4x4xf32, #tpu.memory_space<smem>>, %arg3: memref<4xf32, #tpu.memory_space<smem>>, %arg4: memref<1x4x8x128xf32, #tpu.memory_space<vmem>>, %arg5: memref<1x4x8x128xf32, #tpu.memory_space<vmem>>, %arg6: memref<1x4x8x128xf32, #tpu.memory_space<vmem>>, %arg7: memref<1x4x8x128xf32, #tpu.memory_space<vmem>>, %arg8: memref<1x4x8x128xf32, #tpu.memory_space<vmem>>, %arg9: memref<1x4x8x128xf32, #tpu.memory_space<vmem>>, %arg10: memref<1x4x8x128xf32, #tpu.memory_space<vmem>>, %arg11: memref<1x4x8x128xf32, #tpu.memory_space<vmem>>, %arg12: memref<1x4x8x128xf32, #tpu.memory_space<vmem>>, %arg13: memref<1x4x8x128xf32, #tpu.memory_space<vmem>>, %arg14: memref<1x4x8x128xf32, #tpu.memory_space<vmem>>, %arg15: memref<1x4x8x128xf32, #tpu.memory_space<vmem>>, %arg16: memref<1x4x8x1536xf32, #tpu.memory_space<vmem>>) attributes {dimension_semantics = [#tpu.dimension_semantics<parallel>, #tpu.dimension_semantics<parallel>], iteration_bounds = array<i64: 2, 1>, scalar_prefetch = 2 : i64, scratch_operands = 0 : i64, tpu.core_type = #tpu.core_type<tc>, window_params = [{transform_indices = @transform_0, window_bounds = array<i64: 1, 4, 8, 128>}, {transform_indices = @transform_1, window_bounds = array<i64: 1, 4, 8, 128>}, {transform_indices = @transform_2, window_bounds = array<i64: 1, 4, 8, 128>}, {transform_indices = @transform_3, window_bounds = array<i64: 1, 4, 8, 128>}, {transform_indices = @transform_4, window_bounds = array<i64: 1, 4, 8, 128>}, {transform_indices = @transform_5, window_bounds = array<i64: 1, 4, 8, 128>}, {transform_indices = @transform_6, window_bounds = array<i64: 1, 4, 8, 128>}, {transform_indices = @transform_7, window_bounds = array<i64: 1, 4, 8, 128>}, {transform_indices = @transform_8, window_bounds = array<i64: 1, 4, 8, 128>}, {transform_indices = @transform_9, window_bounds = array<i64: 1, 4, 8, 128>}, {transform_indices = @transform_10, window_bounds = array<i64: 1, 4, 8, 128>}, {transform_indices = @transform_11, window_bounds = array<i64: 1, 4, 8, 128>}, {transform_indices = @transform_12, window_bounds = array<i64: 1, 4, 8, 1536>}]} {
    %c0 = arith.constant 0 : index
    %c0_0 = arith.constant 0 : index
    %0 = memref.load %arg2[%c0, %c0_0] : memref<4x4xf32, #tpu.memory_space<smem>>
    %c0_1 = arith.constant 0 : index
    %c1 = arith.constant 1 : index
    %1 = memref.load %arg2[%c0_1, %c1] : memref<4x4xf32, #tpu.memory_space<smem>>
    %c0_2 = arith.constant 0 : index
    %c2 = arith.constant 2 : index
    %2 = memref.load %arg2[%c0_2, %c2] : memref<4x4xf32, #tpu.memory_space<smem>>
    %c0_3 = arith.constant 0 : index
    %c3 = arith.constant 3 : index
    %3 = memref.load %arg2[%c0_3, %c3] : memref<4x4xf32, #tpu.memory_space<smem>>
    %c1_4 = arith.constant 1 : index
    %c0_5 = arith.constant 0 : index
    %4 = memref.load %arg2[%c1_4, %c0_5] : memref<4x4xf32, #tpu.memory_space<smem>>
    %c1_6 = arith.constant 1 : index
    %c1_7 = arith.constant 1 : index
    %5 = memref.load %arg2[%c1_6, %c1_7] : memref<4x4xf32, #tpu.memory_space<smem>>
    %c1_8 = arith.constant 1 : index
    %c2_9 = arith.constant 2 : index
    %6 = memref.load %arg2[%c1_8, %c2_9] : memref<4x4xf32, #tpu.memory_space<smem>>
    %c1_10 = arith.constant 1 : index
    %c3_11 = arith.constant 3 : index
    %7 = memref.load %arg2[%c1_10, %c3_11] : memref<4x4xf32, #tpu.memory_space<smem>>
    %c2_12 = arith.constant 2 : index
    %c0_13 = arith.constant 0 : index
    %8 = memref.load %arg2[%c2_12, %c0_13] : memref<4x4xf32, #tpu.memory_space<smem>>
    %c2_14 = arith.constant 2 : index
    %c1_15 = arith.constant 1 : index
    %9 = memref.load %arg2[%c2_14, %c1_15] : memref<4x4xf32, #tpu.memory_space<smem>>
    %c2_16 = arith.constant 2 : index
    %c2_17 = arith.constant 2 : index
    %10 = memref.load %arg2[%c2_16, %c2_17] : memref<4x4xf32, #tpu.memory_space<smem>>
    %c2_18 = arith.constant 2 : index
    %c3_19 = arith.constant 3 : index
    %11 = memref.load %arg2[%c2_18, %c3_19] : memref<4x4xf32, #tpu.memory_space<smem>>
    %c3_20 = arith.constant 3 : index
    %c0_21 = arith.constant 0 : index
    %12 = memref.load %arg2[%c3_20, %c0_21] : memref<4x4xf32, #tpu.memory_space<smem>>
    %c3_22 = arith.constant 3 : index
    %c1_23 = arith.constant 1 : index
    %13 = memref.load %arg2[%c3_22, %c1_23] : memref<4x4xf32, #tpu.memory_space<smem>>
    %c3_24 = arith.constant 3 : index
    %c2_25 = arith.constant 2 : index
    %14 = memref.load %arg2[%c3_24, %c2_25] : memref<4x4xf32, #tpu.memory_space<smem>>
    %c3_26 = arith.constant 3 : index
    %c3_27 = arith.constant 3 : index
    %15 = memref.load %arg2[%c3_26, %c3_27] : memref<4x4xf32, #tpu.memory_space<smem>>
    %c0_28 = arith.constant 0 : index
    %16 = memref.load %arg3[%c0_28] : memref<4xf32, #tpu.memory_space<smem>>
    %c1_29 = arith.constant 1 : index
    %17 = memref.load %arg3[%c1_29] : memref<4xf32, #tpu.memory_space<smem>>
    %c2_30 = arith.constant 2 : index
    %18 = memref.load %arg3[%c2_30] : memref<4xf32, #tpu.memory_space<smem>>
    %c3_31 = arith.constant 3 : index
    %19 = memref.load %arg3[%c3_31] : memref<4xf32, #tpu.memory_space<smem>>
    %c0_i32 = arith.constant 0 : i32
    %c8_i32 = arith.constant 8 : i32
    %20 = arith.muli %c0_i32, %c8_i32 : i32
    %21 = tpu.assume_multiple %20, 8 : i32
    %22 = tpu.iota {dimensions = array<i32: 0>} : vector<8x1xi32>
    %c8_i32_32 = arith.constant 8 : i32
    %23 = arith.muli %arg1, %c8_i32_32 : i32
    %24 = arith.addi %23, %21 : i32
    %25 = vector.broadcast %24 : i32 to vector<8x1xi32>
    %26 = arith.addi %22, %25 : vector<8x1xi32>
    %c0_33 = arith.constant 0 : index
    %c0_34 = arith.constant 0 : index
    %27 = arith.index_cast %21 : i32 to index
    %c0_35 = arith.constant 0 : index
    %28 = vector.load %arg4[%c0_33, %c0_34, %27, %c0_35] : memref<1x4x8x128xf32, #tpu.memory_space<vmem>>, vector<1x1x8x128xf32>
    %29 = vector.shape_cast %28 : vector<1x1x8x128xf32> to vector<8x128xf32>
    %c0_36 = arith.constant 0 : index
    %c1_37 = arith.constant 1 : index
    %30 = arith.index_cast %21 : i32 to index
    %c0_38 = arith.constant 0 : index
    %31 = vector.load %arg4[%c0_36, %c1_37, %30, %c0_38] : memref<1x4x8x128xf32, #tpu.memory_space<vmem>>, vector<1x1x8x128xf32>
    %32 = vector.shape_cast %31 : vector<1x1x8x128xf32> to vector<8x128xf32>
    %c0_39 = arith.constant 0 : index
    %c2_40 = arith.constant 2 : index
    %33 = arith.index_cast %21 : i32 to index
    %c0_41 = arith.constant 0 : index
    %34 = vector.load %arg4[%c0_39, %c2_40, %33, %c0_41] : memref<1x4x8x128xf32, #tpu.memory_space<vmem>>, vector<1x1x8x128xf32>
    %35 = vector.shape_cast %34 : vector<1x1x8x128xf32> to vector<8x128xf32>
    %c0_42 = arith.constant 0 : index
    %c3_43 = arith.constant 3 : index
    %36 = arith.index_cast %21 : i32 to index
    %c0_44 = arith.constant 0 : index
    %37 = vector.load %arg4[%c0_42, %c3_43, %36, %c0_44] : memref<1x4x8x128xf32, #tpu.memory_space<vmem>>, vector<1x1x8x128xf32>
    %38 = vector.shape_cast %37 : vector<1x1x8x128xf32> to vector<8x128xf32>
    %c12_i32 = arith.constant 12 : i32
    %39 = vector.broadcast %c12_i32 : i32 to vector<8x1xi32>
    %40 = arith.muli %39, %26 : vector<8x1xi32>
    %c0_i32_45 = arith.constant 0 : i32
    %41 = vector.broadcast %c0_i32_45 : i32 to vector<8x1xi32>
    %42 = arith.addi %40, %41 : vector<8x1xi32>
    %c11_i32 = arith.constant 11 : i32
    %43 = vector.broadcast %c11_i32 : i32 to vector<8x1xi32>
    %44 = arith.minsi %43, %42 : vector<8x1xi32>
    %c84_i32 = arith.constant 84 : i32
    %45 = vector.broadcast %c84_i32 : i32 to vector<8x1xi32>
    %46 = arith.subi %42, %45 : vector<8x1xi32>
    %c0_i32_46 = arith.constant 0 : i32
    %47 = vector.broadcast %c0_i32_46 : i32 to vector<8x1xi32>
    %48 = arith.maxsi %47, %46 : vector<8x1xi32>
    %49 = arith.subi %44, %48 : vector<8x1xi32>
    %c1_i32 = arith.constant 1 : i32
    %50 = vector.broadcast %c1_i32 : i32 to vector<8x1xi32>
    %51 = arith.addi %49, %50 : vector<8x1xi32>
    %52 = arith.sitofp %51 : vector<8x1xi32> to vector<8x1xf32>
    %53 = vector.broadcast %16 : f32 to vector<8x1xf32>
    %54 = arith.mulf %52, %53 : vector<8x1xf32>
    %55 = vector.broadcast %0 : f32 to vector<8x128xf32>
    %56 = arith.mulf %29, %55 : vector<8x128xf32>
    %57 = vector.broadcast %54 : vector<8x1xf32> to vector<8x128xf32>
    %58 = arith.addf %57, %56 : vector<8x128xf32>
    %59 = vector.broadcast %4 : f32 to vector<8x128xf32>
    %60 = arith.mulf %32, %59 : vector<8x128xf32>
    %61 = arith.addf %58, %60 : vector<8x128xf32>
    %62 = vector.broadcast %8 : f32 to vector<8x128xf32>
    %63 = arith.mulf %35, %62 : vector<8x128xf32>
    %64 = arith.addf %61, %63 : vector<8x128xf32>
    %65 = vector.broadcast %12 : f32 to vector<8x128xf32>
    %66 = arith.mulf %38, %65 : vector<8x128xf32>
    %67 = arith.addf %64, %66 : vector<8x128xf32>
    %c0_47 = arith.constant 0 : index
    %c0_48 = arith.constant 0 : index
    %68 = arith.index_cast %21 : i32 to index
    %c0_49 = arith.constant 0 : index
    %69 = vector.load %arg16[%c0_47, %c0_48, %68, %c0_49] : memref<1x4x8x1536xf32, #tpu.memory_space<vmem>>, vector<1x1x8x128xf32>
    %70 = vector.shape_cast %69 : vector<1x1x8x128xf32> to vector<8x128xf32>
    %71 = vector.shape_cast %67 : vector<8x128xf32> to vector<1x1x8x128xf32>
    tpu.vector_store %arg16[%c0_47, %c0_48, %68, %c0_49], %71 {strides = array<i32>} : memref<1x4x8x1536xf32, #tpu.memory_space<vmem>>, vector<1x1x8x128xf32>,
    %72 = vector.broadcast %17 : f32 to vector<8x1xf32>
    %73 = arith.mulf %52, %72 : vector<8x1xf32>
    %74 = vector.broadcast %1 : f32 to vector<8x128xf32>
    %75 = arith.mulf %29, %74 : vector<8x128xf32>
    %76 = vector.broadcast %73 : vector<8x1xf32> to vector<8x128xf32>
    %77 = arith.addf %76, %75 : vector<8x128xf32>
    %78 = vector.broadcast %5 : f32 to vector<8x128xf32>
    %79 = arith.mulf %32, %78 : vector<8x128xf32>
    %80 = arith.addf %77, %79 : vector<8x128xf32>
    %81 = vector.broadcast %9 : f32 to vector<8x128xf32>
    %82 = arith.mulf %35, %81 : vector<8x128xf32>
    %83 = arith.addf %80, %82 : vector<8x128xf32>
    %84 = vector.broadcast %13 : f32 to vector<8x128xf32>
    %85 = arith.mulf %38, %84 : vector<8x128xf32>
    %86 = arith.addf %83, %85 : vector<8x128xf32>
    %c0_50 = arith.constant 0 : index
    %c1_51 = arith.constant 1 : index
    %87 = arith.index_cast %21 : i32 to index
    %c0_52 = arith.constant 0 : index
    %88 = vector.load %arg16[%c0_50, %c1_51, %87, %c0_52] : memref<1x4x8x1536xf32, #tpu.memory_space<vmem>>, vector<1x1x8x128xf32>
    %89 = vector.shape_cast %88 : vector<1x1x8x128xf32> to vector<8x128xf32>
    %90 = vector.shape_cast %86 : vector<8x128xf32> to vector<1x1x8x128xf32>
    tpu.vector_store %arg16[%c0_50, %c1_51, %87, %c0_52], %90 {strides = array<i32>} : memref<1x4x8x1536xf32, #tpu.memory_space<vmem>>, vector<1x1x8x128xf32>,
    %91 = vector.broadcast %18 : f32 to vector<8x1xf32>
    %92 = arith.mulf %52, %91 : vector<8x1xf32>
    %93 = vector.broadcast %2 : f32 to vector<8x128xf32>
    %94 = arith.mulf %29, %93 : vector<8x128xf32>
    %95 = vector.broadcast %92 : vector<8x1xf32> to vector<8x128xf32>
    %96 = arith.addf %95, %94 : vector<8x128xf32>
    %97 = vector.broadcast %6 : f32 to vector<8x128xf32>
    %98 = arith.mulf %32, %97 : vector<8x128xf32>
    %99 = arith.addf %96, %98 : vector<8x128xf32>
    %100 = vector.broadcast %10 : f32 to vector<8x128xf32>
    %101 = arith.mulf %35, %100 : vector<8x128xf32>
    %102 = arith.addf %99, %101 : vector<8x128xf32>
    %103 = vector.broadcast %14 : f32 to vector<8x128xf32>
    %104 = arith.mulf %38, %103 : vector<8x128xf32>
    %105 = arith.addf %102, %104 : vector<8x128xf32>
    %c0_53 = arith.constant 0 : index
    %c2_54 = arith.constant 2 : index
    %106 = arith.index_cast %21 : i32 to index
    %c0_55 = arith.constant 0 : index
    %107 = vector.load %arg16[%c0_53, %c2_54, %106, %c0_55] : memref<1x4x8x1536xf32, #tpu.memory_space<vmem>>, vector<1x1x8x128xf32>
    %108 = vector.shape_cast %107 : vector<1x1x8x128xf32> to vector<8x128xf32>
    %109 = vector.shape_cast %105 : vector<8x128xf32> to vector<1x1x8x128xf32>
    tpu.vector_store %arg16[%c0_53, %c2_54, %106, %c0_55], %109 {strides = array<i32>} : memref<1x4x8x1536xf32, #tpu.memory_space<vmem>>, vector<1x1x8x128xf32>,
    %110 = vector.broadcast %19 : f32 to vector<8x1xf32>
    %111 = arith.mulf %52, %110 : vector<8x1xf32>
    %112 = vector.broadcast %3 : f32 to vector<8x128xf32>
    %113 = arith.mulf %29, %112 : vector<8x128xf32>
    %114 = vector.broadcast %111 : vector<8x1xf32> to vector<8x128xf32>
    %115 = arith.addf %114, %113 : vector<8x128xf32>
    %116 = vector.broadcast %7 : f32 to vector<8x128xf32>
    %117 = arith.mulf %32, %116 : vector<8x128xf32>
    %118 = arith.addf %115, %117 : vector<8x128xf32>
    %119 = vector.broadcast %11 : f32 to vector<8x128xf32>
    %120 = arith.mulf %35, %119 : vector<8x128xf32>
    %121 = arith.addf %118, %120 : vector<8x128xf32>
    %122 = vector.broadcast %15 : f32 to vector<8x128xf32>
    %123 = arith.mulf %38, %122 : vector<8x128xf32>
    %124 = arith.addf %121, %123 : vector<8x128xf32>
    %c0_56 = arith.constant 0 : index
    %c3_57 = arith.constant 3 : index
    %125 = arith.index_cast %21 : i32 to index
    %c0_58 = arith.constant 0 : index
    %126 = vector.load %arg16[%c0_56, %c3_57, %125, %c0_58] : memref<1x4x8x1536xf32, #tpu.memory_space<vmem>>, vector<1x1x8x128xf32>
    %127 = vector.shape_cast %126 : vector<1x1x8x128xf32> to vector<8x128xf32>
    %128 = vector.shape_cast %124 : vector<8x128xf32> to vector<1x1x8x128xf32>
    tpu.vector_store %arg16[%c0_56, %c3_57, %125, %c0_58], %128 {strides = array<i32>} : memref<1x4x8x1536xf32, #tpu.memory_space<vmem>>, vector<1x1x8x128xf32>,
    %c0_59 = arith.constant 0 : index
    %c0_60 = arith.constant 0 : index
    %129 = arith.index_cast %21 : i32 to index
    %c0_61 = arith.constant 0 : index
    %130 = vector.load %arg5[%c0_59, %c0_60, %129, %c0_61] : memref<1x4x8x128xf32, #tpu.memory_space<vmem>>, vector<1x1x8x128xf32>
    %131 = vector.shape_cast %130 : vector<1x1x8x128xf32> to vector<8x128xf32>
    %c0_62 = arith.constant 0 : index
    %c1_63 = arith.constant 1 : index
    %132 = arith.index_cast %21 : i32 to index
    %c0_64 = arith.constant 0 : index
    %133 = vector.load %arg5[%c0_62, %c1_63, %132, %c0_64] : memref<1x4x8x128xf32, #tpu.memory_space<vmem>>, vector<1x1x8x128xf32>
    %134 = vector.shape_cast %133 : vector<1x1x8x128xf32> to vector<8x128xf32>
    %c0_65 = arith.constant 0 : index
    %c2_66 = arith.constant 2 : index
    %135 = arith.index_cast %21 : i32 to index
    %c0_67 = arith.constant 0 : index
    %136 = vector.load %arg5[%c0_65, %c2_66, %135, %c0_67] : memref<1x4x8x128xf32, #tpu.memory_space<vmem>>, vector<1x1x8x128xf32>
    %137 = vector.shape_cast %136 : vector<1x1x8x128xf32> to vector<8x128xf32>
    %c0_68 = arith.constant 0 : index
    %c3_69 = arith.constant 3 : index
    %138 = arith.index_cast %21 : i32 to index
    %c0_70 = arith.constant 0 : index
    %139 = vector.load %arg5[%c0_68, %c3_69, %138, %c0_70] : memref<1x4x8x128xf32, #tpu.memory_space<vmem>>, vector<1x1x8x128xf32>
    %140 = vector.shape_cast %139 : vector<1x1x8x128xf32> to vector<8x128xf32>
    %c12_i32_71 = arith.constant 12 : i32
    %141 = vector.broadcast %c12_i32_71 : i32 to vector<8x1xi32>
    %142 = arith.muli %141, %26 : vector<8x1xi32>
    %c1_i32_72 = arith.constant 1 : i32
    %143 = vector.broadcast %c1_i32_72 : i32 to vector<8x1xi32>
    %144 = arith.addi %142, %143 : vector<8x1xi32>
    %c11_i32_73 = arith.constant 11 : i32
    %145 = vector.broadcast %c11_i32_73 : i32 to vector<8x1xi32>
    %146 = arith.minsi %145, %144 : vector<8x1xi32>
    %c84_i32_74 = arith.constant 84 : i32
    %147 = vector.broadcast %c84_i32_74 : i32 to vector<8x1xi32>
    %148 = arith.subi %144, %147 : vector<8x1xi32>
    %c0_i32_75 = arith.constant 0 : i32
    %149 = vector.broadcast %c0_i32_75 : i32 to vector<8x1xi32>
    %150 = arith.maxsi %149, %148 : vector<8x1xi32>
    %151 = arith.subi %146, %150 : vector<8x1xi32>
    %c1_i32_76 = arith.constant 1 : i32
    %152 = vector.broadcast %c1_i32_76 : i32 to vector<8x1xi32>
    %153 = arith.addi %151, %152 : vector<8x1xi32>
    %154 = arith.sitofp %153 : vector<8x1xi32> to vector<8x1xf32>
    %155 = vector.broadcast %16 : f32 to vector<8x1xf32>
    %156 = arith.mulf %154, %155 : vector<8x1xf32>
    %157 = vector.broadcast %0 : f32 to vector<8x128xf32>
    %158 = arith.mulf %131, %157 : vector<8x128xf32>
    %159 = vector.broadcast %156 : vector<8x1xf32> to vector<8x128xf32>
    %160 = arith.addf %159, %158 : vector<8x128xf32>
    %161 = vector.broadcast %4 : f32 to vector<8x128xf32>
    %162 = arith.mulf %134, %161 : vector<8x128xf32>
    %163 = arith.addf %160, %162 : vector<8x128xf32>
    %164 = vector.broadcast %8 : f32 to vector<8x128xf32>
    %165 = arith.mulf %137, %164 : vector<8x128xf32>
    %166 = arith.addf %163, %165 : vector<8x128xf32>
    %167 = vector.broadcast %12 : f32 to vector<8x128xf32>
    %168 = arith.mulf %140, %167 : vector<8x128xf32>
    %169 = arith.addf %166, %168 : vector<8x128xf32>
    %c0_77 = arith.constant 0 : index
    %c0_78 = arith.constant 0 : index
    %170 = arith.index_cast %21 : i32 to index
    %c128 = arith.constant 128 : index
    %171 = vector.load %arg16[%c0_77, %c0_78, %170, %c128] : memref<1x4x8x1536xf32, #tpu.memory_space<vmem>>, vector<1x1x8x128xf32>
    %172 = vector.shape_cast %171 : vector<1x1x8x128xf32> to vector<8x128xf32>
    %173 = vector.shape_cast %169 : vector<8x128xf32> to vector<1x1x8x128xf32>
    tpu.vector_store %arg16[%c0_77, %c0_78, %170, %c128], %173 {strides = array<i32>} : memref<1x4x8x1536xf32, #tpu.memory_space<vmem>>, vector<1x1x8x128xf32>,
    %174 = vector.broadcast %17 : f32 to vector<8x1xf32>
    %175 = arith.mulf %154, %174 : vector<8x1xf32>
    %176 = vector.broadcast %1 : f32 to vector<8x128xf32>
    %177 = arith.mulf %131, %176 : vector<8x128xf32>
    %178 = vector.broadcast %175 : vector<8x1xf32> to vector<8x128xf32>
    %179 = arith.addf %178, %177 : vector<8x128xf32>
    %180 = vector.broadcast %5 : f32 to vector<8x128xf32>
    %181 = arith.mulf %134, %180 : vector<8x128xf32>
    %182 = arith.addf %179, %181 : vector<8x128xf32>
    %183 = vector.broadcast %9 : f32 to vector<8x128xf32>
    %184 = arith.mulf %137, %183 : vector<8x128xf32>
    %185 = arith.addf %182, %184 : vector<8x128xf32>
    %186 = vector.broadcast %13 : f32 to vector<8x128xf32>
    %187 = arith.mulf %140, %186 : vector<8x128xf32>
    %188 = arith.addf %185, %187 : vector<8x128xf32>
    %c0_79 = arith.constant 0 : index
    %c1_80 = arith.constant 1 : index
    %189 = arith.index_cast %21 : i32 to index
    %c128_81 = arith.constant 128 : index
    %190 = vector.load %arg16[%c0_79, %c1_80, %189, %c128_81] : memref<1x4x8x1536xf32, #tpu.memory_space<vmem>>, vector<1x1x8x128xf32>
    %191 = vector.shape_cast %190 : vector<1x1x8x128xf32> to vector<8x128xf32>
    %192 = vector.shape_cast %188 : vector<8x128xf32> to vector<1x1x8x128xf32>
    tpu.vector_store %arg16[%c0_79, %c1_80, %189, %c128_81], %192 {strides = array<i32>} : memref<1x4x8x1536xf32, #tpu.memory_space<vmem>>, vector<1x1x8x128xf32>,
    %193 = vector.broadcast %18 : f32 to vector<8x1xf32>
    %194 = arith.mulf %154, %193 : vector<8x1xf32>
    %195 = vector.broadcast %2 : f32 to vector<8x128xf32>
    %196 = arith.mulf %131, %195 : vector<8x128xf32>
    %197 = vector.broadcast %194 : vector<8x1xf32> to vector<8x128xf32>
    %198 = arith.addf %197, %196 : vector<8x128xf32>
    %199 = vector.broadcast %6 : f32 to vector<8x128xf32>
    %200 = arith.mulf %134, %199 : vector<8x128xf32>
    %201 = arith.addf %198, %200 : vector<8x128xf32>
    %202 = vector.broadcast %10 : f32 to vector<8x128xf32>
    %203 = arith.mulf %137, %202 : vector<8x128xf32>
    %204 = arith.addf %201, %203 : vector<8x128xf32>
    %205 = vector.broadcast %14 : f32 to vector<8x128xf32>
    %206 = arith.mulf %140, %205 : vector<8x128xf32>
    %207 = arith.addf %204, %206 : vector<8x128xf32>
    %c0_82 = arith.constant 0 : index
    %c2_83 = arith.constant 2 : index
    %208 = arith.index_cast %21 : i32 to index
    %c128_84 = arith.constant 128 : index
    %209 = vector.load %arg16[%c0_82, %c2_83, %208, %c128_84] : memref<1x4x8x1536xf32, #tpu.memory_space<vmem>>, vector<1x1x8x128xf32>
    %210 = vector.shape_cast %209 : vector<1x1x8x128xf32> to vector<8x128xf32>
    %211 = vector.shape_cast %207 : vector<8x128xf32> to vector<1x1x8x128xf32>
    tpu.vector_store %arg16[%c0_82, %c2_83, %208, %c128_84], %211 {strides = array<i32>} : memref<1x4x8x1536xf32, #tpu.memory_space<vmem>>, vector<1x1x8x128xf32>,
    %212 = vector.broadcast %19 : f32 to vector<8x1xf32>
    %213 = arith.mulf %154, %212 : vector<8x1xf32>
    %214 = vector.broadcast %3 : f32 to vector<8x128xf32>
    %215 = arith.mulf %131, %214 : vector<8x128xf32>
    %216 = vector.broadcast %213 : vector<8x1xf32> to vector<8x128xf32>
    %217 = arith.addf %216, %215 : vector<8x128xf32>
    %218 = vector.broadcast %7 : f32 to vector<8x128xf32>
    %219 = arith.mulf %134, %218 : vector<8x128xf32>
    %220 = arith.addf %217, %219 : vector<8x128xf32>
    %221 = vector.broadcast %11 : f32 to vector<8x128xf32>
    %222 = arith.mulf %137, %221 : vector<8x128xf32>
    %223 = arith.addf %220, %222 : vector<8x128xf32>
    %224 = vector.broadcast %15 : f32 to vector<8x128xf32>
    %225 = arith.mulf %140, %224 : vector<8x128xf32>
    %226 = arith.addf %223, %225 : vector<8x128xf32>
    %c0_85 = arith.constant 0 : index
    %c3_86 = arith.constant 3 : index
    %227 = arith.index_cast %21 : i32 to index
    %c128_87 = arith.constant 128 : index
    %228 = vector.load %arg16[%c0_85, %c3_86, %227, %c128_87] : memref<1x4x8x1536xf32, #tpu.memory_space<vmem>>, vector<1x1x8x128xf32>
    %229 = vector.shape_cast %228 : vector<1x1x8x128xf32> to vector<8x128xf32>
    %230 = vector.shape_cast %226 : vector<8x128xf32> to vector<1x1x8x128xf32>
    tpu.vector_store %arg16[%c0_85, %c3_86, %227, %c128_87], %230 {strides = array<i32>} : memref<1x4x8x1536xf32, #tpu.memory_space<vmem>>, vector<1x1x8x128xf32>,
    %c0_88 = arith.constant 0 : index
    %c0_89 = arith.constant 0 : index
    %231 = arith.index_cast %21 : i32 to index
    %c0_90 = arith.constant 0 : index
    %232 = vector.load %arg6[%c0_88, %c0_89, %231, %c0_90] : memref<1x4x8x128xf32, #tpu.memory_space<vmem>>, vector<1x1x8x128xf32>
    %233 = vector.shape_cast %232 : vector<1x1x8x128xf32> to vector<8x128xf32>
    %c0_91 = arith.constant 0 : index
    %c1_92 = arith.constant 1 : index
    %234 = arith.index_cast %21 : i32 to index
    %c0_93 = arith.constant 0 : index
    %235 = vector.load %arg6[%c0_91, %c1_92, %234, %c0_93] : memref<1x4x8x128xf32, #tpu.memory_space<vmem>>, vector<1x1x8x128xf32>
    %236 = vector.shape_cast %235 : vector<1x1x8x128xf32> to vector<8x128xf32>
    %c0_94 = arith.constant 0 : index
    %c2_95 = arith.constant 2 : index
    %237 = arith.index_cast %21 : i32 to index
    %c0_96 = arith.constant 0 : index
    %238 = vector.load %arg6[%c0_94, %c2_95, %237, %c0_96] : memref<1x4x8x128xf32, #tpu.memory_space<vmem>>, vector<1x1x8x128xf32>
    %239 = vector.shape_cast %238 : vector<1x1x8x128xf32> to vector<8x128xf32>
    %c0_97 = arith.constant 0 : index
    %c3_98 = arith.constant 3 : index
    %240 = arith.index_cast %21 : i32 to index
    %c0_99 = arith.constant 0 : index
    %241 = vector.load %arg6[%c0_97, %c3_98, %240, %c0_99] : memref<1x4x8x128xf32, #tpu.memory_space<vmem>>, vector<1x1x8x128xf32>
    %242 = vector.shape_cast %241 : vector<1x1x8x128xf32> to vector<8x128xf32>
    %c12_i32_100 = arith.constant 12 : i32
    %243 = vector.broadcast %c12_i32_100 : i32 to vector<8x1xi32>
    %244 = arith.muli %243, %26 : vector<8x1xi32>
    %c2_i32 = arith.constant 2 : i32
    %245 = vector.broadcast %c2_i32 : i32 to vector<8x1xi32>
    %246 = arith.addi %244, %245 : vector<8x1xi32>
    %c11_i32_101 = arith.constant 11 : i32
    %247 = vector.broadcast %c11_i32_101 : i32 to vector<8x1xi32>
    %248 = arith.minsi %247, %246 : vector<8x1xi32>
    %c84_i32_102 = arith.constant 84 : i32
    %249 = vector.broadcast %c84_i32_102 : i32 to vector<8x1xi32>
    %250 = arith.subi %246, %249 : vector<8x1xi32>
    %c0_i32_103 = arith.constant 0 : i32
    %251 = vector.broadcast %c0_i32_103 : i32 to vector<8x1xi32>
    %252 = arith.maxsi %251, %250 : vector<8x1xi32>
    %253 = arith.subi %248, %252 : vector<8x1xi32>
    %c1_i32_104 = arith.constant 1 : i32
    %254 = vector.broadcast %c1_i32_104 : i32 to vector<8x1xi32>
    %255 = arith.addi %253, %254 : vector<8x1xi32>
    %256 = arith.sitofp %255 : vector<8x1xi32> to vector<8x1xf32>
    %257 = vector.broadcast %16 : f32 to vector<8x1xf32>
    %258 = arith.mulf %256, %257 : vector<8x1xf32>
    %259 = vector.broadcast %0 : f32 to vector<8x128xf32>
    %260 = arith.mulf %233, %259 : vector<8x128xf32>
    %261 = vector.broadcast %258 : vector<8x1xf32> to vector<8x128xf32>
    %262 = arith.addf %261, %260 : vector<8x128xf32>
    %263 = vector.broadcast %4 : f32 to vector<8x128xf32>
    %264 = arith.mulf %236, %263 : vector<8x128xf32>
    %265 = arith.addf %262, %264 : vector<8x128xf32>
    %266 = vector.broadcast %8 : f32 to vector<8x128xf32>
    %267 = arith.mulf %239, %266 : vector<8x128xf32>
    %268 = arith.addf %265, %267 : vector<8x128xf32>
    %269 = vector.broadcast %12 : f32 to vector<8x128xf32>
    %270 = arith.mulf %242, %269 : vector<8x128xf32>
    %271 = arith.addf %268, %270 : vector<8x128xf32>
    %c0_105 = arith.constant 0 : index
    %c0_106 = arith.constant 0 : index
    %272 = arith.index_cast %21 : i32 to index
    %c256 = arith.constant 256 : index
    %273 = vector.load %arg16[%c0_105, %c0_106, %272, %c256] : memref<1x4x8x1536xf32, #tpu.memory_space<vmem>>, vector<1x1x8x128xf32>
    %274 = vector.shape_cast %273 : vector<1x1x8x128xf32> to vector<8x128xf32>
    %275 = vector.shape_cast %271 : vector<8x128xf32> to vector<1x1x8x128xf32>
    tpu.vector_store %arg16[%c0_105, %c0_106, %272, %c256], %275 {strides = array<i32>} : memref<1x4x8x1536xf32, #tpu.memory_space<vmem>>, vector<1x1x8x128xf32>,
    %276 = vector.broadcast %17 : f32 to vector<8x1xf32>
    %277 = arith.mulf %256, %276 : vector<8x1xf32>
    %278 = vector.broadcast %1 : f32 to vector<8x128xf32>
    %279 = arith.mulf %233, %278 : vector<8x128xf32>
    %280 = vector.broadcast %277 : vector<8x1xf32> to vector<8x128xf32>
    %281 = arith.addf %280, %279 : vector<8x128xf32>
    %282 = vector.broadcast %5 : f32 to vector<8x128xf32>
    %283 = arith.mulf %236, %282 : vector<8x128xf32>
    %284 = arith.addf %281, %283 : vector<8x128xf32>
    %285 = vector.broadcast %9 : f32 to vector<8x128xf32>
    %286 = arith.mulf %239, %285 : vector<8x128xf32>
    %287 = arith.addf %284, %286 : vector<8x128xf32>
    %288 = vector.broadcast %13 : f32 to vector<8x128xf32>
    %289 = arith.mulf %242, %288 : vector<8x128xf32>
    %290 = arith.addf %287, %289 : vector<8x128xf32>
    %c0_107 = arith.constant 0 : index
    %c1_108 = arith.constant 1 : index
    %291 = arith.index_cast %21 : i32 to index
    %c256_109 = arith.constant 256 : index
    %292 = vector.load %arg16[%c0_107, %c1_108, %291, %c256_109] : memref<1x4x8x1536xf32, #tpu.memory_space<vmem>>, vector<1x1x8x128xf32>
    %293 = vector.shape_cast %292 : vector<1x1x8x128xf32> to vector<8x128xf32>
    %294 = vector.shape_cast %290 : vector<8x128xf32> to vector<1x1x8x128xf32>
    tpu.vector_store %arg16[%c0_107, %c1_108, %291, %c256_109], %294 {strides = array<i32>} : memref<1x4x8x1536xf32, #tpu.memory_space<vmem>>, vector<1x1x8x128xf32>,
    %295 = vector.broadcast %18 : f32 to vector<8x1xf32>
    %296 = arith.mulf %256, %295 : vector<8x1xf32>
    %297 = vector.broadcast %2 : f32 to vector<8x128xf32>
    %298 = arith.mulf %233, %297 : vector<8x128xf32>
    %299 = vector.broadcast %296 : vector<8x1xf32> to vector<8x128xf32>
    %300 = arith.addf %299, %298 : vector<8x128xf32>
    %301 = vector.broadcast %6 : f32 to vector<8x128xf32>
    %302 = arith.mulf %236, %301 : vector<8x128xf32>
    %303 = arith.addf %300, %302 : vector<8x128xf32>
    %304 = vector.broadcast %10 : f32 to vector<8x128xf32>
    %305 = arith.mulf %239, %304 : vector<8x128xf32>
    %306 = arith.addf %303, %305 : vector<8x128xf32>
    %307 = vector.broadcast %14 : f32 to vector<8x128xf32>
    %308 = arith.mulf %242, %307 : vector<8x128xf32>
    %309 = arith.addf %306, %308 : vector<8x128xf32>
    %c0_110 = arith.constant 0 : index
    %c2_111 = arith.constant 2 : index
    %310 = arith.index_cast %21 : i32 to index
    %c256_112 = arith.constant 256 : index
    %311 = vector.load %arg16[%c0_110, %c2_111, %310, %c256_112] : memref<1x4x8x1536xf32, #tpu.memory_space<vmem>>, vector<1x1x8x128xf32>
    %312 = vector.shape_cast %311 : vector<1x1x8x128xf32> to vector<8x128xf32>
    %313 = vector.shape_cast %309 : vector<8x128xf32> to vector<1x1x8x128xf32>
    tpu.vector_store %arg16[%c0_110, %c2_111, %310, %c256_112], %313 {strides = array<i32>} : memref<1x4x8x1536xf32, #tpu.memory_space<vmem>>, vector<1x1x8x128xf32>,
    %314 = vector.broadcast %19 : f32 to vector<8x1xf32>
    %315 = arith.mulf %256, %314 : vector<8x1xf32>
    %316 = vector.broadcast %3 : f32 to vector<8x128xf32>
    %317 = arith.mulf %233, %316 : vector<8x128xf32>
    %318 = vector.broadcast %315 : vector<8x1xf32> to vector<8x128xf32>
    %319 = arith.addf %318, %317 : vector<8x128xf32>
    %320 = vector.broadcast %7 : f32 to vector<8x128xf32>
    %321 = arith.mulf %236, %320 : vector<8x128xf32>
    %322 = arith.addf %319, %321 : vector<8x128xf32>
    %323 = vector.broadcast %11 : f32 to vector<8x128xf32>
    %324 = arith.mulf %239, %323 : vector<8x128xf32>
    %325 = arith.addf %322, %324 : vector<8x128xf32>
    %326 = vector.broadcast %15 : f32 to vector<8x128xf32>
    %327 = arith.mulf %242, %326 : vector<8x128xf32>
    %328 = arith.addf %325, %327 : vector<8x128xf32>
    %c0_113 = arith.constant 0 : index
    %c3_114 = arith.constant 3 : index
    %329 = arith.index_cast %21 : i32 to index
    %c256_115 = arith.constant 256 : index
    %330 = vector.load %arg16[%c0_113, %c3_114, %329, %c256_115] : memref<1x4x8x1536xf32, #tpu.memory_space<vmem>>, vector<1x1x8x128xf32>
    %331 = vector.shape_cast %330 : vector<1x1x8x128xf32> to vector<8x128xf32>
    %332 = vector.shape_cast %328 : vector<8x128xf32> to vector<1x1x8x128xf32>
    tpu.vector_store %arg16[%c0_113, %c3_114, %329, %c256_115], %332 {strides = array<i32>} : memref<1x4x8x1536xf32, #tpu.memory_space<vmem>>, vector<1x1x8x128xf32>,
    %c0_116 = arith.constant 0 : index
    %c0_117 = arith.constant 0 : index
    %333 = arith.index_cast %21 : i32 to index
    %c0_118 = arith.constant 0 : index
    %334 = vector.load %arg7[%c0_116, %c0_117, %333, %c0_118] : memref<1x4x8x128xf32, #tpu.memory_space<vmem>>, vector<1x1x8x128xf32>
    %335 = vector.shape_cast %334 : vector<1x1x8x128xf32> to vector<8x128xf32>
    %c0_119 = arith.constant 0 : index
    %c1_120 = arith.constant 1 : index
    %336 = arith.index_cast %21 : i32 to index
    %c0_121 = arith.constant 0 : index
    %337 = vector.load %arg7[%c0_119, %c1_120, %336, %c0_121] : memref<1x4x8x128xf32, #tpu.memory_space<vmem>>, vector<1x1x8x128xf32>
    %338 = vector.shape_cast %337 : vector<1x1x8x128xf32> to vector<8x128xf32>
    %c0_122 = arith.constant 0 : index
    %c2_123 = arith.constant 2 : index
    %339 = arith.index_cast %21 : i32 to index
    %c0_124 = arith.constant 0 : index
    %340 = vector.load %arg7[%c0_122, %c2_123, %339, %c0_124] : memref<1x4x8x128xf32, #tpu.memory_space<vmem>>, vector<1x1x8x128xf32>
    %341 = vector.shape_cast %340 : vector<1x1x8x128xf32> to vector<8x128xf32>
    %c0_125 = arith.constant 0 : index
    %c3_126 = arith.constant 3 : index
    %342 = arith.index_cast %21 : i32 to index
    %c0_127 = arith.constant 0 : index
    %343 = vector.load %arg7[%c0_125, %c3_126, %342, %c0_127] : memref<1x4x8x128xf32, #tpu.memory_space<vmem>>, vector<1x1x8x128xf32>
    %344 = vector.shape_cast %343 : vector<1x1x8x128xf32> to vector<8x128xf32>
    %c12_i32_128 = arith.constant 12 : i32
    %345 = vector.broadcast %c12_i32_128 : i32 to vector<8x1xi32>
    %346 = arith.muli %345, %26 : vector<8x1xi32>
    %c3_i32 = arith.constant 3 : i32
    %347 = vector.broadcast %c3_i32 : i32 to vector<8x1xi32>
    %348 = arith.addi %346, %347 : vector<8x1xi32>
    %c11_i32_129 = arith.constant 11 : i32
    %349 = vector.broadcast %c11_i32_129 : i32 to vector<8x1xi32>
    %350 = arith.minsi %349, %348 : vector<8x1xi32>
    %c84_i32_130 = arith.constant 84 : i32
    %351 = vector.broadcast %c84_i32_130 : i32 to vector<8x1xi32>
    %352 = arith.subi %348, %351 : vector<8x1xi32>
    %c0_i32_131 = arith.constant 0 : i32
    %353 = vector.broadcast %c0_i32_131 : i32 to vector<8x1xi32>
    %354 = arith.maxsi %353, %352 : vector<8x1xi32>
    %355 = arith.subi %350, %354 : vector<8x1xi32>
    %c1_i32_132 = arith.constant 1 : i32
    %356 = vector.broadcast %c1_i32_132 : i32 to vector<8x1xi32>
    %357 = arith.addi %355, %356 : vector<8x1xi32>
    %358 = arith.sitofp %357 : vector<8x1xi32> to vector<8x1xf32>
    %359 = vector.broadcast %16 : f32 to vector<8x1xf32>
    %360 = arith.mulf %358, %359 : vector<8x1xf32>
    %361 = vector.broadcast %0 : f32 to vector<8x128xf32>
    %362 = arith.mulf %335, %361 : vector<8x128xf32>
    %363 = vector.broadcast %360 : vector<8x1xf32> to vector<8x128xf32>
    %364 = arith.addf %363, %362 : vector<8x128xf32>
    %365 = vector.broadcast %4 : f32 to vector<8x128xf32>
    %366 = arith.mulf %338, %365 : vector<8x128xf32>
    %367 = arith.addf %364, %366 : vector<8x128xf32>
    %368 = vector.broadcast %8 : f32 to vector<8x128xf32>
    %369 = arith.mulf %341, %368 : vector<8x128xf32>
    %370 = arith.addf %367, %369 : vector<8x128xf32>
    %371 = vector.broadcast %12 : f32 to vector<8x128xf32>
    %372 = arith.mulf %344, %371 : vector<8x128xf32>
    %373 = arith.addf %370, %372 : vector<8x128xf32>
    %c0_133 = arith.constant 0 : index
    %c0_134 = arith.constant 0 : index
    %374 = arith.index_cast %21 : i32 to index
    %c384 = arith.constant 384 : index
    %375 = vector.load %arg16[%c0_133, %c0_134, %374, %c384] : memref<1x4x8x1536xf32, #tpu.memory_space<vmem>>, vector<1x1x8x128xf32>
    %376 = vector.shape_cast %375 : vector<1x1x8x128xf32> to vector<8x128xf32>
    %377 = vector.shape_cast %373 : vector<8x128xf32> to vector<1x1x8x128xf32>
    tpu.vector_store %arg16[%c0_133, %c0_134, %374, %c384], %377 {strides = array<i32>} : memref<1x4x8x1536xf32, #tpu.memory_space<vmem>>, vector<1x1x8x128xf32>,
    %378 = vector.broadcast %17 : f32 to vector<8x1xf32>
    %379 = arith.mulf %358, %378 : vector<8x1xf32>
    %380 = vector.broadcast %1 : f32 to vector<8x128xf32>
    %381 = arith.mulf %335, %380 : vector<8x128xf32>
    %382 = vector.broadcast %379 : vector<8x1xf32> to vector<8x128xf32>
    %383 = arith.addf %382, %381 : vector<8x128xf32>
    %384 = vector.broadcast %5 : f32 to vector<8x128xf32>
    %385 = arith.mulf %338, %384 : vector<8x128xf32>
    %386 = arith.addf %383, %385 : vector<8x128xf32>
    %387 = vector.broadcast %9 : f32 to vector<8x128xf32>
    %388 = arith.mulf %341, %387 : vector<8x128xf32>
    %389 = arith.addf %386, %388 : vector<8x128xf32>
    %390 = vector.broadcast %13 : f32 to vector<8x128xf32>
    %391 = arith.mulf %344, %390 : vector<8x128xf32>
    %392 = arith.addf %389, %391 : vector<8x128xf32>
    %c0_135 = arith.constant 0 : index
    %c1_136 = arith.constant 1 : index
    %393 = arith.index_cast %21 : i32 to index
    %c384_137 = arith.constant 384 : index
    %394 = vector.load %arg16[%c0_135, %c1_136, %393, %c384_137] : memref<1x4x8x1536xf32, #tpu.memory_space<vmem>>, vector<1x1x8x128xf32>
    %395 = vector.shape_cast %394 : vector<1x1x8x128xf32> to vector<8x128xf32>
    %396 = vector.shape_cast %392 : vector<8x128xf32> to vector<1x1x8x128xf32>
    tpu.vector_store %arg16[%c0_135, %c1_136, %393, %c384_137], %396 {strides = array<i32>} : memref<1x4x8x1536xf32, #tpu.memory_space<vmem>>, vector<1x1x8x128xf32>,
    %397 = vector.broadcast %18 : f32 to vector<8x1xf32>
    %398 = arith.mulf %358, %397 : vector<8x1xf32>
    %399 = vector.broadcast %2 : f32 to vector<8x128xf32>
    %400 = arith.mulf %335, %399 : vector<8x128xf32>
    %401 = vector.broadcast %398 : vector<8x1xf32> to vector<8x128xf32>
    %402 = arith.addf %401, %400 : vector<8x128xf32>
    %403 = vector.broadcast %6 : f32 to vector<8x128xf32>
    %404 = arith.mulf %338, %403 : vector<8x128xf32>
    %405 = arith.addf %402, %404 : vector<8x128xf32>
    %406 = vector.broadcast %10 : f32 to vector<8x128xf32>
    %407 = arith.mulf %341, %406 : vector<8x128xf32>
    %408 = arith.addf %405, %407 : vector<8x128xf32>
    %409 = vector.broadcast %14 : f32 to vector<8x128xf32>
    %410 = arith.mulf %344, %409 : vector<8x128xf32>
    %411 = arith.addf %408, %410 : vector<8x128xf32>
    %c0_138 = arith.constant 0 : index
    %c2_139 = arith.constant 2 : index
    %412 = arith.index_cast %21 : i32 to index
    %c384_140 = arith.constant 384 : index
    %413 = vector.load %arg16[%c0_138, %c2_139, %412, %c384_140] : memref<1x4x8x1536xf32, #tpu.memory_space<vmem>>, vector<1x1x8x128xf32>
    %414 = vector.shape_cast %413 : vector<1x1x8x128xf32> to vector<8x128xf32>
    %415 = vector.shape_cast %411 : vector<8x128xf32> to vector<1x1x8x128xf32>
    tpu.vector_store %arg16[%c0_138, %c2_139, %412, %c384_140], %415 {strides = array<i32>} : memref<1x4x8x1536xf32, #tpu.memory_space<vmem>>, vector<1x1x8x128xf32>,
    %416 = vector.broadcast %19 : f32 to vector<8x1xf32>
    %417 = arith.mulf %358, %416 : vector<8x1xf32>
    %418 = vector.broadcast %3 : f32 to vector<8x128xf32>
    %419 = arith.mulf %335, %418 : vector<8x128xf32>
    %420 = vector.broadcast %417 : vector<8x1xf32> to vector<8x128xf32>
    %421 = arith.addf %420, %419 : vector<8x128xf32>
    %422 = vector.broadcast %7 : f32 to vector<8x128xf32>
    %423 = arith.mulf %338, %422 : vector<8x128xf32>
    %424 = arith.addf %421, %423 : vector<8x128xf32>
    %425 = vector.broadcast %11 : f32 to vector<8x128xf32>
    %426 = arith.mulf %341, %425 : vector<8x128xf32>
    %427 = arith.addf %424, %426 : vector<8x128xf32>
    %428 = vector.broadcast %15 : f32 to vector<8x128xf32>
    %429 = arith.mulf %344, %428 : vector<8x128xf32>
    %430 = arith.addf %427, %429 : vector<8x128xf32>
    %c0_141 = arith.constant 0 : index
    %c3_142 = arith.constant 3 : index
    %431 = arith.index_cast %21 : i32 to index
    %c384_143 = arith.constant 384 : index
    %432 = vector.load %arg16[%c0_141, %c3_142, %431, %c384_143] : memref<1x4x8x1536xf32, #tpu.memory_space<vmem>>, vector<1x1x8x128xf32>
    %433 = vector.shape_cast %432 : vector<1x1x8x128xf32> to vector<8x128xf32>
    %434 = vector.shape_cast %430 : vector<8x128xf32> to vector<1x1x8x128xf32>
    tpu.vector_store %arg16[%c0_141, %c3_142, %431, %c384_143], %434 {strides = array<i32>} : memref<1x4x8x1536xf32, #tpu.memory_space<vmem>>, vector<1x1x8x128xf32>,
    %c0_144 = arith.constant 0 : index
    %c0_145 = arith.constant 0 : index
    %435 = arith.index_cast %21 : i32 to index
    %c0_146 = arith.constant 0 : index
    %436 = vector.load %arg8[%c0_144, %c0_145, %435, %c0_146] : memref<1x4x8x128xf32, #tpu.memory_space<vmem>>, vector<1x1x8x128xf32>
    %437 = vector.shape_cast %436 : vector<1x1x8x128xf32> to vector<8x128xf32>
    %c0_147 = arith.constant 0 : index
    %c1_148 = arith.constant 1 : index
    %438 = arith.index_cast %21 : i32 to index
    %c0_149 = arith.constant 0 : index
    %439 = vector.load %arg8[%c0_147, %c1_148, %438, %c0_149] : memref<1x4x8x128xf32, #tpu.memory_space<vmem>>, vector<1x1x8x128xf32>
    %440 = vector.shape_cast %439 : vector<1x1x8x128xf32> to vector<8x128xf32>
    %c0_150 = arith.constant 0 : index
    %c2_151 = arith.constant 2 : index
    %441 = arith.index_cast %21 : i32 to index
    %c0_152 = arith.constant 0 : index
    %442 = vector.load %arg8[%c0_150, %c2_151, %441, %c0_152] : memref<1x4x8x128xf32, #tpu.memory_space<vmem>>, vector<1x1x8x128xf32>
    %443 = vector.shape_cast %442 : vector<1x1x8x128xf32> to vector<8x128xf32>
    %c0_153 = arith.constant 0 : index
    %c3_154 = arith.constant 3 : index
    %444 = arith.index_cast %21 : i32 to index
    %c0_155 = arith.constant 0 : index
    %445 = vector.load %arg8[%c0_153, %c3_154, %444, %c0_155] : memref<1x4x8x128xf32, #tpu.memory_space<vmem>>, vector<1x1x8x128xf32>
    %446 = vector.shape_cast %445 : vector<1x1x8x128xf32> to vector<8x128xf32>
    %c12_i32_156 = arith.constant 12 : i32
    %447 = vector.broadcast %c12_i32_156 : i32 to vector<8x1xi32>
    %448 = arith.muli %447, %26 : vector<8x1xi32>
    %c4_i32 = arith.constant 4 : i32
    %449 = vector.broadcast %c4_i32 : i32 to vector<8x1xi32>
    %450 = arith.addi %448, %449 : vector<8x1xi32>
    %c11_i32_157 = arith.constant 11 : i32
    %451 = vector.broadcast %c11_i32_157 : i32 to vector<8x1xi32>
    %452 = arith.minsi %451, %450 : vector<8x1xi32>
    %c84_i32_158 = arith.constant 84 : i32
    %453 = vector.broadcast %c84_i32_158 : i32 to vector<8x1xi32>
    %454 = arith.subi %450, %453 : vector<8x1xi32>
    %c0_i32_159 = arith.constant 0 : i32
    %455 = vector.broadcast %c0_i32_159 : i32 to vector<8x1xi32>
    %456 = arith.maxsi %455, %454 : vector<8x1xi32>
    %457 = arith.subi %452, %456 : vector<8x1xi32>
    %c1_i32_160 = arith.constant 1 : i32
    %458 = vector.broadcast %c1_i32_160 : i32 to vector<8x1xi32>
    %459 = arith.addi %457, %458 : vector<8x1xi32>
    %460 = arith.sitofp %459 : vector<8x1xi32> to vector<8x1xf32>
    %461 = vector.broadcast %16 : f32 to vector<8x1xf32>
    %462 = arith.mulf %460, %461 : vector<8x1xf32>
    %463 = vector.broadcast %0 : f32 to vector<8x128xf32>
    %464 = arith.mulf %437, %463 : vector<8x128xf32>
    %465 = vector.broadcast %462 : vector<8x1xf32> to vector<8x128xf32>
    %466 = arith.addf %465, %464 : vector<8x128xf32>
    %467 = vector.broadcast %4 : f32 to vector<8x128xf32>
    %468 = arith.mulf %440, %467 : vector<8x128xf32>
    %469 = arith.addf %466, %468 : vector<8x128xf32>
    %470 = vector.broadcast %8 : f32 to vector<8x128xf32>
    %471 = arith.mulf %443, %470 : vector<8x128xf32>
    %472 = arith.addf %469, %471 : vector<8x128xf32>
    %473 = vector.broadcast %12 : f32 to vector<8x128xf32>
    %474 = arith.mulf %446, %473 : vector<8x128xf32>
    %475 = arith.addf %472, %474 : vector<8x128xf32>
    %c0_161 = arith.constant 0 : index
    %c0_162 = arith.constant 0 : index
    %476 = arith.index_cast %21 : i32 to index
    %c512 = arith.constant 512 : index
    %477 = vector.load %arg16[%c0_161, %c0_162, %476, %c512] : memref<1x4x8x1536xf32, #tpu.memory_space<vmem>>, vector<1x1x8x128xf32>
    %478 = vector.shape_cast %477 : vector<1x1x8x128xf32> to vector<8x128xf32>
    %479 = vector.shape_cast %475 : vector<8x128xf32> to vector<1x1x8x128xf32>
    tpu.vector_store %arg16[%c0_161, %c0_162, %476, %c512], %479 {strides = array<i32>} : memref<1x4x8x1536xf32, #tpu.memory_space<vmem>>, vector<1x1x8x128xf32>,
    %480 = vector.broadcast %17 : f32 to vector<8x1xf32>
    %481 = arith.mulf %460, %480 : vector<8x1xf32>
    %482 = vector.broadcast %1 : f32 to vector<8x128xf32>
    %483 = arith.mulf %437, %482 : vector<8x128xf32>
    %484 = vector.broadcast %481 : vector<8x1xf32> to vector<8x128xf32>
    %485 = arith.addf %484, %483 : vector<8x128xf32>
    %486 = vector.broadcast %5 : f32 to vector<8x128xf32>
    %487 = arith.mulf %440, %486 : vector<8x128xf32>
    %488 = arith.addf %485, %487 : vector<8x128xf32>
    %489 = vector.broadcast %9 : f32 to vector<8x128xf32>
    %490 = arith.mulf %443, %489 : vector<8x128xf32>
    %491 = arith.addf %488, %490 : vector<8x128xf32>
    %492 = vector.broadcast %13 : f32 to vector<8x128xf32>
    %493 = arith.mulf %446, %492 : vector<8x128xf32>
    %494 = arith.addf %491, %493 : vector<8x128xf32>
    %c0_163 = arith.constant 0 : index
    %c1_164 = arith.constant 1 : index
    %495 = arith.index_cast %21 : i32 to index
    %c512_165 = arith.constant 512 : index
    %496 = vector.load %arg16[%c0_163, %c1_164, %495, %c512_165] : memref<1x4x8x1536xf32, #tpu.memory_space<vmem>>, vector<1x1x8x128xf32>
    %497 = vector.shape_cast %496 : vector<1x1x8x128xf32> to vector<8x128xf32>
    %498 = vector.shape_cast %494 : vector<8x128xf32> to vector<1x1x8x128xf32>
    tpu.vector_store %arg16[%c0_163, %c1_164, %495, %c512_165], %498 {strides = array<i32>} : memref<1x4x8x1536xf32, #tpu.memory_space<vmem>>, vector<1x1x8x128xf32>,
    %499 = vector.broadcast %18 : f32 to vector<8x1xf32>
    %500 = arith.mulf %460, %499 : vector<8x1xf32>
    %501 = vector.broadcast %2 : f32 to vector<8x128xf32>
    %502 = arith.mulf %437, %501 : vector<8x128xf32>
    %503 = vector.broadcast %500 : vector<8x1xf32> to vector<8x128xf32>
    %504 = arith.addf %503, %502 : vector<8x128xf32>
    %505 = vector.broadcast %6 : f32 to vector<8x128xf32>
    %506 = arith.mulf %440, %505 : vector<8x128xf32>
    %507 = arith.addf %504, %506 : vector<8x128xf32>
    %508 = vector.broadcast %10 : f32 to vector<8x128xf32>
    %509 = arith.mulf %443, %508 : vector<8x128xf32>
    %510 = arith.addf %507, %509 : vector<8x128xf32>
    %511 = vector.broadcast %14 : f32 to vector<8x128xf32>
    %512 = arith.mulf %446, %511 : vector<8x128xf32>
    %513 = arith.addf %510, %512 : vector<8x128xf32>
    %c0_166 = arith.constant 0 : index
    %c2_167 = arith.constant 2 : index
    %514 = arith.index_cast %21 : i32 to index
    %c512_168 = arith.constant 512 : index
    %515 = vector.load %arg16[%c0_166, %c2_167, %514, %c512_168] : memref<1x4x8x1536xf32, #tpu.memory_space<vmem>>, vector<1x1x8x128xf32>
    %516 = vector.shape_cast %515 : vector<1x1x8x128xf32> to vector<8x128xf32>
    %517 = vector.shape_cast %513 : vector<8x128xf32> to vector<1x1x8x128xf32>
    tpu.vector_store %arg16[%c0_166, %c2_167, %514, %c512_168], %517 {strides = array<i32>} : memref<1x4x8x1536xf32, #tpu.memory_space<vmem>>, vector<1x1x8x128xf32>,
    %518 = vector.broadcast %19 : f32 to vector<8x1xf32>
    %519 = arith.mulf %460, %518 : vector<8x1xf32>
    %520 = vector.broadcast %3 : f32 to vector<8x128xf32>
    %521 = arith.mulf %437, %520 : vector<8x128xf32>
    %522 = vector.broadcast %519 : vector<8x1xf32> to vector<8x128xf32>
    %523 = arith.addf %522, %521 : vector<8x128xf32>
    %524 = vector.broadcast %7 : f32 to vector<8x128xf32>
    %525 = arith.mulf %440, %524 : vector<8x128xf32>
    %526 = arith.addf %523, %525 : vector<8x128xf32>
    %527 = vector.broadcast %11 : f32 to vector<8x128xf32>
    %528 = arith.mulf %443, %527 : vector<8x128xf32>
    %529 = arith.addf %526, %528 : vector<8x128xf32>
    %530 = vector.broadcast %15 : f32 to vector<8x128xf32>
    %531 = arith.mulf %446, %530 : vector<8x128xf32>
    %532 = arith.addf %529, %531 : vector<8x128xf32>
    %c0_169 = arith.constant 0 : index
    %c3_170 = arith.constant 3 : index
    %533 = arith.index_cast %21 : i32 to index
    %c512_171 = arith.constant 512 : index
    %534 = vector.load %arg16[%c0_169, %c3_170, %533, %c512_171] : memref<1x4x8x1536xf32, #tpu.memory_space<vmem>>, vector<1x1x8x128xf32>
    %535 = vector.shape_cast %534 : vector<1x1x8x128xf32> to vector<8x128xf32>
    %536 = vector.shape_cast %532 : vector<8x128xf32> to vector<1x1x8x128xf32>
    tpu.vector_store %arg16[%c0_169, %c3_170, %533, %c512_171], %536 {strides = array<i32>} : memref<1x4x8x1536xf32, #tpu.memory_space<vmem>>, vector<1x1x8x128xf32>,
    %c0_172 = arith.constant 0 : index
    %c0_173 = arith.constant 0 : index
    %537 = arith.index_cast %21 : i32 to index
    %c0_174 = arith.constant 0 : index
    %538 = vector.load %arg9[%c0_172, %c0_173, %537, %c0_174] : memref<1x4x8x128xf32, #tpu.memory_space<vmem>>, vector<1x1x8x128xf32>
    %539 = vector.shape_cast %538 : vector<1x1x8x128xf32> to vector<8x128xf32>
    %c0_175 = arith.constant 0 : index
    %c1_176 = arith.constant 1 : index
    %540 = arith.index_cast %21 : i32 to index
    %c0_177 = arith.constant 0 : index
    %541 = vector.load %arg9[%c0_175, %c1_176, %540, %c0_177] : memref<1x4x8x128xf32, #tpu.memory_space<vmem>>, vector<1x1x8x128xf32>
    %542 = vector.shape_cast %541 : vector<1x1x8x128xf32> to vector<8x128xf32>
    %c0_178 = arith.constant 0 : index
    %c2_179 = arith.constant 2 : index
    %543 = arith.index_cast %21 : i32 to index
    %c0_180 = arith.constant 0 : index
    %544 = vector.load %arg9[%c0_178, %c2_179, %543, %c0_180] : memref<1x4x8x128xf32, #tpu.memory_space<vmem>>, vector<1x1x8x128xf32>
    %545 = vector.shape_cast %544 : vector<1x1x8x128xf32> to vector<8x128xf32>
    %c0_181 = arith.constant 0 : index
    %c3_182 = arith.constant 3 : index
    %546 = arith.index_cast %21 : i32 to index
    %c0_183 = arith.constant 0 : index
    %547 = vector.load %arg9[%c0_181, %c3_182, %546, %c0_183] : memref<1x4x8x128xf32, #tpu.memory_space<vmem>>, vector<1x1x8x128xf32>
    %548 = vector.shape_cast %547 : vector<1x1x8x128xf32> to vector<8x128xf32>
    %c12_i32_184 = arith.constant 12 : i32
    %549 = vector.broadcast %c12_i32_184 : i32 to vector<8x1xi32>
    %550 = arith.muli %549, %26 : vector<8x1xi32>
    %c5_i32 = arith.constant 5 : i32
    %551 = vector.broadcast %c5_i32 : i32 to vector<8x1xi32>
    %552 = arith.addi %550, %551 : vector<8x1xi32>
    %c11_i32_185 = arith.constant 11 : i32
    %553 = vector.broadcast %c11_i32_185 : i32 to vector<8x1xi32>
    %554 = arith.minsi %553, %552 : vector<8x1xi32>
    %c84_i32_186 = arith.constant 84 : i32
    %555 = vector.broadcast %c84_i32_186 : i32 to vector<8x1xi32>
    %556 = arith.subi %552, %555 : vector<8x1xi32>
    %c0_i32_187 = arith.constant 0 : i32
    %557 = vector.broadcast %c0_i32_187 : i32 to vector<8x1xi32>
    %558 = arith.maxsi %557, %556 : vector<8x1xi32>
    %559 = arith.subi %554, %558 : vector<8x1xi32>
    %c1_i32_188 = arith.constant 1 : i32
    %560 = vector.broadcast %c1_i32_188 : i32 to vector<8x1xi32>
    %561 = arith.addi %559, %560 : vector<8x1xi32>
    %562 = arith.sitofp %561 : vector<8x1xi32> to vector<8x1xf32>
    %563 = vector.broadcast %16 : f32 to vector<8x1xf32>
    %564 = arith.mulf %562, %563 : vector<8x1xf32>
    %565 = vector.broadcast %0 : f32 to vector<8x128xf32>
    %566 = arith.mulf %539, %565 : vector<8x128xf32>
    %567 = vector.broadcast %564 : vector<8x1xf32> to vector<8x128xf32>
    %568 = arith.addf %567, %566 : vector<8x128xf32>
    %569 = vector.broadcast %4 : f32 to vector<8x128xf32>
    %570 = arith.mulf %542, %569 : vector<8x128xf32>
    %571 = arith.addf %568, %570 : vector<8x128xf32>
    %572 = vector.broadcast %8 : f32 to vector<8x128xf32>
    %573 = arith.mulf %545, %572 : vector<8x128xf32>
    %574 = arith.addf %571, %573 : vector<8x128xf32>
    %575 = vector.broadcast %12 : f32 to vector<8x128xf32>
    %576 = arith.mulf %548, %575 : vector<8x128xf32>
    %577 = arith.addf %574, %576 : vector<8x128xf32>
    %c0_189 = arith.constant 0 : index
    %c0_190 = arith.constant 0 : index
    %578 = arith.index_cast %21 : i32 to index
    %c640 = arith.constant 640 : index
    %579 = vector.load %arg16[%c0_189, %c0_190, %578, %c640] : memref<1x4x8x1536xf32, #tpu.memory_space<vmem>>, vector<1x1x8x128xf32>
    %580 = vector.shape_cast %579 : vector<1x1x8x128xf32> to vector<8x128xf32>
    %581 = vector.shape_cast %577 : vector<8x128xf32> to vector<1x1x8x128xf32>
    tpu.vector_store %arg16[%c0_189, %c0_190, %578, %c640], %581 {strides = array<i32>} : memref<1x4x8x1536xf32, #tpu.memory_space<vmem>>, vector<1x1x8x128xf32>,
    %582 = vector.broadcast %17 : f32 to vector<8x1xf32>
    %583 = arith.mulf %562, %582 : vector<8x1xf32>
    %584 = vector.broadcast %1 : f32 to vector<8x128xf32>
    %585 = arith.mulf %539, %584 : vector<8x128xf32>
    %586 = vector.broadcast %583 : vector<8x1xf32> to vector<8x128xf32>
    %587 = arith.addf %586, %585 : vector<8x128xf32>
    %588 = vector.broadcast %5 : f32 to vector<8x128xf32>
    %589 = arith.mulf %542, %588 : vector<8x128xf32>
    %590 = arith.addf %587, %589 : vector<8x128xf32>
    %591 = vector.broadcast %9 : f32 to vector<8x128xf32>
    %592 = arith.mulf %545, %591 : vector<8x128xf32>
    %593 = arith.addf %590, %592 : vector<8x128xf32>
    %594 = vector.broadcast %13 : f32 to vector<8x128xf32>
    %595 = arith.mulf %548, %594 : vector<8x128xf32>
    %596 = arith.addf %593, %595 : vector<8x128xf32>
    %c0_191 = arith.constant 0 : index
    %c1_192 = arith.constant 1 : index
    %597 = arith.index_cast %21 : i32 to index
    %c640_193 = arith.constant 640 : index
    %598 = vector.load %arg16[%c0_191, %c1_192, %597, %c640_193] : memref<1x4x8x1536xf32, #tpu.memory_space<vmem>>, vector<1x1x8x128xf32>
    %599 = vector.shape_cast %598 : vector<1x1x8x128xf32> to vector<8x128xf32>
    %600 = vector.shape_cast %596 : vector<8x128xf32> to vector<1x1x8x128xf32>
    tpu.vector_store %arg16[%c0_191, %c1_192, %597, %c640_193], %600 {strides = array<i32>} : memref<1x4x8x1536xf32, #tpu.memory_space<vmem>>, vector<1x1x8x128xf32>,
    %601 = vector.broadcast %18 : f32 to vector<8x1xf32>
    %602 = arith.mulf %562, %601 : vector<8x1xf32>
    %603 = vector.broadcast %2 : f32 to vector<8x128xf32>
    %604 = arith.mulf %539, %603 : vector<8x128xf32>
    %605 = vector.broadcast %602 : vector<8x1xf32> to vector<8x128xf32>
    %606 = arith.addf %605, %604 : vector<8x128xf32>
    %607 = vector.broadcast %6 : f32 to vector<8x128xf32>
    %608 = arith.mulf %542, %607 : vector<8x128xf32>
    %609 = arith.addf %606, %608 : vector<8x128xf32>
    %610 = vector.broadcast %10 : f32 to vector<8x128xf32>
    %611 = arith.mulf %545, %610 : vector<8x128xf32>
    %612 = arith.addf %609, %611 : vector<8x128xf32>
    %613 = vector.broadcast %14 : f32 to vector<8x128xf32>
    %614 = arith.mulf %548, %613 : vector<8x128xf32>
    %615 = arith.addf %612, %614 : vector<8x128xf32>
    %c0_194 = arith.constant 0 : index
    %c2_195 = arith.constant 2 : index
    %616 = arith.index_cast %21 : i32 to index
    %c640_196 = arith.constant 640 : index
    %617 = vector.load %arg16[%c0_194, %c2_195, %616, %c640_196] : memref<1x4x8x1536xf32, #tpu.memory_space<vmem>>, vector<1x1x8x128xf32>
    %618 = vector.shape_cast %617 : vector<1x1x8x128xf32> to vector<8x128xf32>
    %619 = vector.shape_cast %615 : vector<8x128xf32> to vector<1x1x8x128xf32>
    tpu.vector_store %arg16[%c0_194, %c2_195, %616, %c640_196], %619 {strides = array<i32>} : memref<1x4x8x1536xf32, #tpu.memory_space<vmem>>, vector<1x1x8x128xf32>,
    %620 = vector.broadcast %19 : f32 to vector<8x1xf32>
    %621 = arith.mulf %562, %620 : vector<8x1xf32>
    %622 = vector.broadcast %3 : f32 to vector<8x128xf32>
    %623 = arith.mulf %539, %622 : vector<8x128xf32>
    %624 = vector.broadcast %621 : vector<8x1xf32> to vector<8x128xf32>
    %625 = arith.addf %624, %623 : vector<8x128xf32>
    %626 = vector.broadcast %7 : f32 to vector<8x128xf32>
    %627 = arith.mulf %542, %626 : vector<8x128xf32>
    %628 = arith.addf %625, %627 : vector<8x128xf32>
    %629 = vector.broadcast %11 : f32 to vector<8x128xf32>
    %630 = arith.mulf %545, %629 : vector<8x128xf32>
    %631 = arith.addf %628, %630 : vector<8x128xf32>
    %632 = vector.broadcast %15 : f32 to vector<8x128xf32>
    %633 = arith.mulf %548, %632 : vector<8x128xf32>
    %634 = arith.addf %631, %633 : vector<8x128xf32>
    %c0_197 = arith.constant 0 : index
    %c3_198 = arith.constant 3 : index
    %635 = arith.index_cast %21 : i32 to index
    %c640_199 = arith.constant 640 : index
    %636 = vector.load %arg16[%c0_197, %c3_198, %635, %c640_199] : memref<1x4x8x1536xf32, #tpu.memory_space<vmem>>, vector<1x1x8x128xf32>
    %637 = vector.shape_cast %636 : vector<1x1x8x128xf32> to vector<8x128xf32>
    %638 = vector.shape_cast %634 : vector<8x128xf32> to vector<1x1x8x128xf32>
    tpu.vector_store %arg16[%c0_197, %c3_198, %635, %c640_199], %638 {strides = array<i32>} : memref<1x4x8x1536xf32, #tpu.memory_space<vmem>>, vector<1x1x8x128xf32>,
    %c0_200 = arith.constant 0 : index
    %c0_201 = arith.constant 0 : index
    %639 = arith.index_cast %21 : i32 to index
    %c0_202 = arith.constant 0 : index
    %640 = vector.load %arg10[%c0_200, %c0_201, %639, %c0_202] : memref<1x4x8x128xf32, #tpu.memory_space<vmem>>, vector<1x1x8x128xf32>
    %641 = vector.shape_cast %640 : vector<1x1x8x128xf32> to vector<8x128xf32>
    %c0_203 = arith.constant 0 : index
    %c1_204 = arith.constant 1 : index
    %642 = arith.index_cast %21 : i32 to index
    %c0_205 = arith.constant 0 : index
    %643 = vector.load %arg10[%c0_203, %c1_204, %642, %c0_205] : memref<1x4x8x128xf32, #tpu.memory_space<vmem>>, vector<1x1x8x128xf32>
    %644 = vector.shape_cast %643 : vector<1x1x8x128xf32> to vector<8x128xf32>
    %c0_206 = arith.constant 0 : index
    %c2_207 = arith.constant 2 : index
    %645 = arith.index_cast %21 : i32 to index
    %c0_208 = arith.constant 0 : index
    %646 = vector.load %arg10[%c0_206, %c2_207, %645, %c0_208] : memref<1x4x8x128xf32, #tpu.memory_space<vmem>>, vector<1x1x8x128xf32>
    %647 = vector.shape_cast %646 : vector<1x1x8x128xf32> to vector<8x128xf32>
    %c0_209 = arith.constant 0 : index
    %c3_210 = arith.constant 3 : index
    %648 = arith.index_cast %21 : i32 to index
    %c0_211 = arith.constant 0 : index
    %649 = vector.load %arg10[%c0_209, %c3_210, %648, %c0_211] : memref<1x4x8x128xf32, #tpu.memory_space<vmem>>, vector<1x1x8x128xf32>
    %650 = vector.shape_cast %649 : vector<1x1x8x128xf32> to vector<8x128xf32>
    %c12_i32_212 = arith.constant 12 : i32
    %651 = vector.broadcast %c12_i32_212 : i32 to vector<8x1xi32>
    %652 = arith.muli %651, %26 : vector<8x1xi32>
    %c6_i32 = arith.constant 6 : i32
    %653 = vector.broadcast %c6_i32 : i32 to vector<8x1xi32>
    %654 = arith.addi %652, %653 : vector<8x1xi32>
    %c11_i32_213 = arith.constant 11 : i32
    %655 = vector.broadcast %c11_i32_213 : i32 to vector<8x1xi32>
    %656 = arith.minsi %655, %654 : vector<8x1xi32>
    %c84_i32_214 = arith.constant 84 : i32
    %657 = vector.broadcast %c84_i32_214 : i32 to vector<8x1xi32>
    %658 = arith.subi %654, %657 : vector<8x1xi32>
    %c0_i32_215 = arith.constant 0 : i32
    %659 = vector.broadcast %c0_i32_215 : i32 to vector<8x1xi32>
    %660 = arith.maxsi %659, %658 : vector<8x1xi32>
    %661 = arith.subi %656, %660 : vector<8x1xi32>
    %c1_i32_216 = arith.constant 1 : i32
    %662 = vector.broadcast %c1_i32_216 : i32 to vector<8x1xi32>
    %663 = arith.addi %661, %662 : vector<8x1xi32>
    %664 = arith.sitofp %663 : vector<8x1xi32> to vector<8x1xf32>
    %665 = vector.broadcast %16 : f32 to vector<8x1xf32>
    %666 = arith.mulf %664, %665 : vector<8x1xf32>
    %667 = vector.broadcast %0 : f32 to vector<8x128xf32>
    %668 = arith.mulf %641, %667 : vector<8x128xf32>
    %669 = vector.broadcast %666 : vector<8x1xf32> to vector<8x128xf32>
    %670 = arith.addf %669, %668 : vector<8x128xf32>
    %671 = vector.broadcast %4 : f32 to vector<8x128xf32>
    %672 = arith.mulf %644, %671 : vector<8x128xf32>
    %673 = arith.addf %670, %672 : vector<8x128xf32>
    %674 = vector.broadcast %8 : f32 to vector<8x128xf32>
    %675 = arith.mulf %647, %674 : vector<8x128xf32>
    %676 = arith.addf %673, %675 : vector<8x128xf32>
    %677 = vector.broadcast %12 : f32 to vector<8x128xf32>
    %678 = arith.mulf %650, %677 : vector<8x128xf32>
    %679 = arith.addf %676, %678 : vector<8x128xf32>
    %c0_217 = arith.constant 0 : index
    %c0_218 = arith.constant 0 : index
    %680 = arith.index_cast %21 : i32 to index
    %c768 = arith.constant 768 : index
    %681 = vector.load %arg16[%c0_217, %c0_218, %680, %c768] : memref<1x4x8x1536xf32, #tpu.memory_space<vmem>>, vector<1x1x8x128xf32>
    %682 = vector.shape_cast %681 : vector<1x1x8x128xf32> to vector<8x128xf32>
    %683 = vector.shape_cast %679 : vector<8x128xf32> to vector<1x1x8x128xf32>
    tpu.vector_store %arg16[%c0_217, %c0_218, %680, %c768], %683 {strides = array<i32>} : memref<1x4x8x1536xf32, #tpu.memory_space<vmem>>, vector<1x1x8x128xf32>,
    %684 = vector.broadcast %17 : f32 to vector<8x1xf32>
    %685 = arith.mulf %664, %684 : vector<8x1xf32>
    %686 = vector.broadcast %1 : f32 to vector<8x128xf32>
    %687 = arith.mulf %641, %686 : vector<8x128xf32>
    %688 = vector.broadcast %685 : vector<8x1xf32> to vector<8x128xf32>
    %689 = arith.addf %688, %687 : vector<8x128xf32>
    %690 = vector.broadcast %5 : f32 to vector<8x128xf32>
    %691 = arith.mulf %644, %690 : vector<8x128xf32>
    %692 = arith.addf %689, %691 : vector<8x128xf32>
    %693 = vector.broadcast %9 : f32 to vector<8x128xf32>
    %694 = arith.mulf %647, %693 : vector<8x128xf32>
    %695 = arith.addf %692, %694 : vector<8x128xf32>
    %696 = vector.broadcast %13 : f32 to vector<8x128xf32>
    %697 = arith.mulf %650, %696 : vector<8x128xf32>
    %698 = arith.addf %695, %697 : vector<8x128xf32>
    %c0_219 = arith.constant 0 : index
    %c1_220 = arith.constant 1 : index
    %699 = arith.index_cast %21 : i32 to index
    %c768_221 = arith.constant 768 : index
    %700 = vector.load %arg16[%c0_219, %c1_220, %699, %c768_221] : memref<1x4x8x1536xf32, #tpu.memory_space<vmem>>, vector<1x1x8x128xf32>
    %701 = vector.shape_cast %700 : vector<1x1x8x128xf32> to vector<8x128xf32>
    %702 = vector.shape_cast %698 : vector<8x128xf32> to vector<1x1x8x128xf32>
    tpu.vector_store %arg16[%c0_219, %c1_220, %699, %c768_221], %702 {strides = array<i32>} : memref<1x4x8x1536xf32, #tpu.memory_space<vmem>>, vector<1x1x8x128xf32>,
    %703 = vector.broadcast %18 : f32 to vector<8x1xf32>
    %704 = arith.mulf %664, %703 : vector<8x1xf32>
    %705 = vector.broadcast %2 : f32 to vector<8x128xf32>
    %706 = arith.mulf %641, %705 : vector<8x128xf32>
    %707 = vector.broadcast %704 : vector<8x1xf32> to vector<8x128xf32>
    %708 = arith.addf %707, %706 : vector<8x128xf32>
    %709 = vector.broadcast %6 : f32 to vector<8x128xf32>
    %710 = arith.mulf %644, %709 : vector<8x128xf32>
    %711 = arith.addf %708, %710 : vector<8x128xf32>
    %712 = vector.broadcast %10 : f32 to vector<8x128xf32>
    %713 = arith.mulf %647, %712 : vector<8x128xf32>
    %714 = arith.addf %711, %713 : vector<8x128xf32>
    %715 = vector.broadcast %14 : f32 to vector<8x128xf32>
    %716 = arith.mulf %650, %715 : vector<8x128xf32>
    %717 = arith.addf %714, %716 : vector<8x128xf32>
    %c0_222 = arith.constant 0 : index
    %c2_223 = arith.constant 2 : index
    %718 = arith.index_cast %21 : i32 to index
    %c768_224 = arith.constant 768 : index
    %719 = vector.load %arg16[%c0_222, %c2_223, %718, %c768_224] : memref<1x4x8x1536xf32, #tpu.memory_space<vmem>>, vector<1x1x8x128xf32>
    %720 = vector.shape_cast %719 : vector<1x1x8x128xf32> to vector<8x128xf32>
    %721 = vector.shape_cast %717 : vector<8x128xf32> to vector<1x1x8x128xf32>
    tpu.vector_store %arg16[%c0_222, %c2_223, %718, %c768_224], %721 {strides = array<i32>} : memref<1x4x8x1536xf32, #tpu.memory_space<vmem>>, vector<1x1x8x128xf32>,
    %722 = vector.broadcast %19 : f32 to vector<8x1xf32>
    %723 = arith.mulf %664, %722 : vector<8x1xf32>
    %724 = vector.broadcast %3 : f32 to vector<8x128xf32>
    %725 = arith.mulf %641, %724 : vector<8x128xf32>
    %726 = vector.broadcast %723 : vector<8x1xf32> to vector<8x128xf32>
    %727 = arith.addf %726, %725 : vector<8x128xf32>
    %728 = vector.broadcast %7 : f32 to vector<8x128xf32>
    %729 = arith.mulf %644, %728 : vector<8x128xf32>
    %730 = arith.addf %727, %729 : vector<8x128xf32>
    %731 = vector.broadcast %11 : f32 to vector<8x128xf32>
    %732 = arith.mulf %647, %731 : vector<8x128xf32>
    %733 = arith.addf %730, %732 : vector<8x128xf32>
    %734 = vector.broadcast %15 : f32 to vector<8x128xf32>
    %735 = arith.mulf %650, %734 : vector<8x128xf32>
    %736 = arith.addf %733, %735 : vector<8x128xf32>
    %c0_225 = arith.constant 0 : index
    %c3_226 = arith.constant 3 : index
    %737 = arith.index_cast %21 : i32 to index
    %c768_227 = arith.constant 768 : index
    %738 = vector.load %arg16[%c0_225, %c3_226, %737, %c768_227] : memref<1x4x8x1536xf32, #tpu.memory_space<vmem>>, vector<1x1x8x128xf32>
    %739 = vector.shape_cast %738 : vector<1x1x8x128xf32> to vector<8x128xf32>
    %740 = vector.shape_cast %736 : vector<8x128xf32> to vector<1x1x8x128xf32>
    tpu.vector_store %arg16[%c0_225, %c3_226, %737, %c768_227], %740 {strides = array<i32>} : memref<1x4x8x1536xf32, #tpu.memory_space<vmem>>, vector<1x1x8x128xf32>,
    %c0_228 = arith.constant 0 : index
    %c0_229 = arith.constant 0 : index
    %741 = arith.index_cast %21 : i32 to index
    %c0_230 = arith.constant 0 : index
    %742 = vector.load %arg11[%c0_228, %c0_229, %741, %c0_230] : memref<1x4x8x128xf32, #tpu.memory_space<vmem>>, vector<1x1x8x128xf32>
    %743 = vector.shape_cast %742 : vector<1x1x8x128xf32> to vector<8x128xf32>
    %c0_231 = arith.constant 0 : index
    %c1_232 = arith.constant 1 : index
    %744 = arith.index_cast %21 : i32 to index
    %c0_233 = arith.constant 0 : index
    %745 = vector.load %arg11[%c0_231, %c1_232, %744, %c0_233] : memref<1x4x8x128xf32, #tpu.memory_space<vmem>>, vector<1x1x8x128xf32>
    %746 = vector.shape_cast %745 : vector<1x1x8x128xf32> to vector<8x128xf32>
    %c0_234 = arith.constant 0 : index
    %c2_235 = arith.constant 2 : index
    %747 = arith.index_cast %21 : i32 to index
    %c0_236 = arith.constant 0 : index
    %748 = vector.load %arg11[%c0_234, %c2_235, %747, %c0_236] : memref<1x4x8x128xf32, #tpu.memory_space<vmem>>, vector<1x1x8x128xf32>
    %749 = vector.shape_cast %748 : vector<1x1x8x128xf32> to vector<8x128xf32>
    %c0_237 = arith.constant 0 : index
    %c3_238 = arith.constant 3 : index
    %750 = arith.index_cast %21 : i32 to index
    %c0_239 = arith.constant 0 : index
    %751 = vector.load %arg11[%c0_237, %c3_238, %750, %c0_239] : memref<1x4x8x128xf32, #tpu.memory_space<vmem>>, vector<1x1x8x128xf32>
    %752 = vector.shape_cast %751 : vector<1x1x8x128xf32> to vector<8x128xf32>
    %c12_i32_240 = arith.constant 12 : i32
    %753 = vector.broadcast %c12_i32_240 : i32 to vector<8x1xi32>
    %754 = arith.muli %753, %26 : vector<8x1xi32>
    %c7_i32 = arith.constant 7 : i32
    %755 = vector.broadcast %c7_i32 : i32 to vector<8x1xi32>
    %756 = arith.addi %754, %755 : vector<8x1xi32>
    %c11_i32_241 = arith.constant 11 : i32
    %757 = vector.broadcast %c11_i32_241 : i32 to vector<8x1xi32>
    %758 = arith.minsi %757, %756 : vector<8x1xi32>
    %c84_i32_242 = arith.constant 84 : i32
    %759 = vector.broadcast %c84_i32_242 : i32 to vector<8x1xi32>
    %760 = arith.subi %756, %759 : vector<8x1xi32>
    %c0_i32_243 = arith.constant 0 : i32
    %761 = vector.broadcast %c0_i32_243 : i32 to vector<8x1xi32>
    %762 = arith.maxsi %761, %760 : vector<8x1xi32>
    %763 = arith.subi %758, %762 : vector<8x1xi32>
    %c1_i32_244 = arith.constant 1 : i32
    %764 = vector.broadcast %c1_i32_244 : i32 to vector<8x1xi32>
    %765 = arith.addi %763, %764 : vector<8x1xi32>
    %766 = arith.sitofp %765 : vector<8x1xi32> to vector<8x1xf32>
    %767 = vector.broadcast %16 : f32 to vector<8x1xf32>
    %768 = arith.mulf %766, %767 : vector<8x1xf32>
    %769 = vector.broadcast %0 : f32 to vector<8x128xf32>
    %770 = arith.mulf %743, %769 : vector<8x128xf32>
    %771 = vector.broadcast %768 : vector<8x1xf32> to vector<8x128xf32>
    %772 = arith.addf %771, %770 : vector<8x128xf32>
    %773 = vector.broadcast %4 : f32 to vector<8x128xf32>
    %774 = arith.mulf %746, %773 : vector<8x128xf32>
    %775 = arith.addf %772, %774 : vector<8x128xf32>
    %776 = vector.broadcast %8 : f32 to vector<8x128xf32>
    %777 = arith.mulf %749, %776 : vector<8x128xf32>
    %778 = arith.addf %775, %777 : vector<8x128xf32>
    %779 = vector.broadcast %12 : f32 to vector<8x128xf32>
    %780 = arith.mulf %752, %779 : vector<8x128xf32>
    %781 = arith.addf %778, %780 : vector<8x128xf32>
    %c0_245 = arith.constant 0 : index
    %c0_246 = arith.constant 0 : index
    %782 = arith.index_cast %21 : i32 to index
    %c896 = arith.constant 896 : index
    %783 = vector.load %arg16[%c0_245, %c0_246, %782, %c896] : memref<1x4x8x1536xf32, #tpu.memory_space<vmem>>, vector<1x1x8x128xf32>
    %784 = vector.shape_cast %783 : vector<1x1x8x128xf32> to vector<8x128xf32>
    %785 = vector.shape_cast %781 : vector<8x128xf32> to vector<1x1x8x128xf32>
    tpu.vector_store %arg16[%c0_245, %c0_246, %782, %c896], %785 {strides = array<i32>} : memref<1x4x8x1536xf32, #tpu.memory_space<vmem>>, vector<1x1x8x128xf32>,
    %786 = vector.broadcast %17 : f32 to vector<8x1xf32>
    %787 = arith.mulf %766, %786 : vector<8x1xf32>
    %788 = vector.broadcast %1 : f32 to vector<8x128xf32>
    %789 = arith.mulf %743, %788 : vector<8x128xf32>
    %790 = vector.broadcast %787 : vector<8x1xf32> to vector<8x128xf32>
    %791 = arith.addf %790, %789 : vector<8x128xf32>
    %792 = vector.broadcast %5 : f32 to vector<8x128xf32>
    %793 = arith.mulf %746, %792 : vector<8x128xf32>
    %794 = arith.addf %791, %793 : vector<8x128xf32>
    %795 = vector.broadcast %9 : f32 to vector<8x128xf32>
    %796 = arith.mulf %749, %795 : vector<8x128xf32>
    %797 = arith.addf %794, %796 : vector<8x128xf32>
    %798 = vector.broadcast %13 : f32 to vector<8x128xf32>
    %799 = arith.mulf %752, %798 : vector<8x128xf32>
    %800 = arith.addf %797, %799 : vector<8x128xf32>
    %c0_247 = arith.constant 0 : index
    %c1_248 = arith.constant 1 : index
    %801 = arith.index_cast %21 : i32 to index
    %c896_249 = arith.constant 896 : index
    %802 = vector.load %arg16[%c0_247, %c1_248, %801, %c896_249] : memref<1x4x8x1536xf32, #tpu.memory_space<vmem>>, vector<1x1x8x128xf32>
    %803 = vector.shape_cast %802 : vector<1x1x8x128xf32> to vector<8x128xf32>
    %804 = vector.shape_cast %800 : vector<8x128xf32> to vector<1x1x8x128xf32>
    tpu.vector_store %arg16[%c0_247, %c1_248, %801, %c896_249], %804 {strides = array<i32>} : memref<1x4x8x1536xf32, #tpu.memory_space<vmem>>, vector<1x1x8x128xf32>,
    %805 = vector.broadcast %18 : f32 to vector<8x1xf32>
    %806 = arith.mulf %766, %805 : vector<8x1xf32>
    %807 = vector.broadcast %2 : f32 to vector<8x128xf32>
    %808 = arith.mulf %743, %807 : vector<8x128xf32>
    %809 = vector.broadcast %806 : vector<8x1xf32> to vector<8x128xf32>
    %810 = arith.addf %809, %808 : vector<8x128xf32>
    %811 = vector.broadcast %6 : f32 to vector<8x128xf32>
    %812 = arith.mulf %746, %811 : vector<8x128xf32>
    %813 = arith.addf %810, %812 : vector<8x128xf32>
    %814 = vector.broadcast %10 : f32 to vector<8x128xf32>
    %815 = arith.mulf %749, %814 : vector<8x128xf32>
    %816 = arith.addf %813, %815 : vector<8x128xf32>
    %817 = vector.broadcast %14 : f32 to vector<8x128xf32>
    %818 = arith.mulf %752, %817 : vector<8x128xf32>
    %819 = arith.addf %816, %818 : vector<8x128xf32>
    %c0_250 = arith.constant 0 : index
    %c2_251 = arith.constant 2 : index
    %820 = arith.index_cast %21 : i32 to index
    %c896_252 = arith.constant 896 : index
    %821 = vector.load %arg16[%c0_250, %c2_251, %820, %c896_252] : memref<1x4x8x1536xf32, #tpu.memory_space<vmem>>, vector<1x1x8x128xf32>
    %822 = vector.shape_cast %821 : vector<1x1x8x128xf32> to vector<8x128xf32>
    %823 = vector.shape_cast %819 : vector<8x128xf32> to vector<1x1x8x128xf32>
    tpu.vector_store %arg16[%c0_250, %c2_251, %820, %c896_252], %823 {strides = array<i32>} : memref<1x4x8x1536xf32, #tpu.memory_space<vmem>>, vector<1x1x8x128xf32>,
    %824 = vector.broadcast %19 : f32 to vector<8x1xf32>
    %825 = arith.mulf %766, %824 : vector<8x1xf32>
    %826 = vector.broadcast %3 : f32 to vector<8x128xf32>
    %827 = arith.mulf %743, %826 : vector<8x128xf32>
    %828 = vector.broadcast %825 : vector<8x1xf32> to vector<8x128xf32>
    %829 = arith.addf %828, %827 : vector<8x128xf32>
    %830 = vector.broadcast %7 : f32 to vector<8x128xf32>
    %831 = arith.mulf %746, %830 : vector<8x128xf32>
    %832 = arith.addf %829, %831 : vector<8x128xf32>
    %833 = vector.broadcast %11 : f32 to vector<8x128xf32>
    %834 = arith.mulf %749, %833 : vector<8x128xf32>
    %835 = arith.addf %832, %834 : vector<8x128xf32>
    %836 = vector.broadcast %15 : f32 to vector<8x128xf32>
    %837 = arith.mulf %752, %836 : vector<8x128xf32>
    %838 = arith.addf %835, %837 : vector<8x128xf32>
    %c0_253 = arith.constant 0 : index
    %c3_254 = arith.constant 3 : index
    %839 = arith.index_cast %21 : i32 to index
    %c896_255 = arith.constant 896 : index
    %840 = vector.load %arg16[%c0_253, %c3_254, %839, %c896_255] : memref<1x4x8x1536xf32, #tpu.memory_space<vmem>>, vector<1x1x8x128xf32>
    %841 = vector.shape_cast %840 : vector<1x1x8x128xf32> to vector<8x128xf32>
    %842 = vector.shape_cast %838 : vector<8x128xf32> to vector<1x1x8x128xf32>
    tpu.vector_store %arg16[%c0_253, %c3_254, %839, %c896_255], %842 {strides = array<i32>} : memref<1x4x8x1536xf32, #tpu.memory_space<vmem>>, vector<1x1x8x128xf32>,
    %c0_256 = arith.constant 0 : index
    %c0_257 = arith.constant 0 : index
    %843 = arith.index_cast %21 : i32 to index
    %c0_258 = arith.constant 0 : index
    %844 = vector.load %arg12[%c0_256, %c0_257, %843, %c0_258] : memref<1x4x8x128xf32, #tpu.memory_space<vmem>>, vector<1x1x8x128xf32>
    %845 = vector.shape_cast %844 : vector<1x1x8x128xf32> to vector<8x128xf32>
    %c0_259 = arith.constant 0 : index
    %c1_260 = arith.constant 1 : index
    %846 = arith.index_cast %21 : i32 to index
    %c0_261 = arith.constant 0 : index
    %847 = vector.load %arg12[%c0_259, %c1_260, %846, %c0_261] : memref<1x4x8x128xf32, #tpu.memory_space<vmem>>, vector<1x1x8x128xf32>
    %848 = vector.shape_cast %847 : vector<1x1x8x128xf32> to vector<8x128xf32>
    %c0_262 = arith.constant 0 : index
    %c2_263 = arith.constant 2 : index
    %849 = arith.index_cast %21 : i32 to index
    %c0_264 = arith.constant 0 : index
    %850 = vector.load %arg12[%c0_262, %c2_263, %849, %c0_264] : memref<1x4x8x128xf32, #tpu.memory_space<vmem>>, vector<1x1x8x128xf32>
    %851 = vector.shape_cast %850 : vector<1x1x8x128xf32> to vector<8x128xf32>
    %c0_265 = arith.constant 0 : index
    %c3_266 = arith.constant 3 : index
    %852 = arith.index_cast %21 : i32 to index
    %c0_267 = arith.constant 0 : index
    %853 = vector.load %arg12[%c0_265, %c3_266, %852, %c0_267] : memref<1x4x8x128xf32, #tpu.memory_space<vmem>>, vector<1x1x8x128xf32>
    %854 = vector.shape_cast %853 : vector<1x1x8x128xf32> to vector<8x128xf32>
    %c12_i32_268 = arith.constant 12 : i32
    %855 = vector.broadcast %c12_i32_268 : i32 to vector<8x1xi32>
    %856 = arith.muli %855, %26 : vector<8x1xi32>
    %c8_i32_269 = arith.constant 8 : i32
    %857 = vector.broadcast %c8_i32_269 : i32 to vector<8x1xi32>
    %858 = arith.addi %856, %857 : vector<8x1xi32>
    %c11_i32_270 = arith.constant 11 : i32
    %859 = vector.broadcast %c11_i32_270 : i32 to vector<8x1xi32>
    %860 = arith.minsi %859, %858 : vector<8x1xi32>
    %c84_i32_271 = arith.constant 84 : i32
    %861 = vector.broadcast %c84_i32_271 : i32 to vector<8x1xi32>
    %862 = arith.subi %858, %861 : vector<8x1xi32>
    %c0_i32_272 = arith.constant 0 : i32
    %863 = vector.broadcast %c0_i32_272 : i32 to vector<8x1xi32>
    %864 = arith.maxsi %863, %862 : vector<8x1xi32>
    %865 = arith.subi %860, %864 : vector<8x1xi32>
    %c1_i32_273 = arith.constant 1 : i32
    %866 = vector.broadcast %c1_i32_273 : i32 to vector<8x1xi32>
    %867 = arith.addi %865, %866 : vector<8x1xi32>
    %868 = arith.sitofp %867 : vector<8x1xi32> to vector<8x1xf32>
    %869 = vector.broadcast %16 : f32 to vector<8x1xf32>
    %870 = arith.mulf %868, %869 : vector<8x1xf32>
    %871 = vector.broadcast %0 : f32 to vector<8x128xf32>
    %872 = arith.mulf %845, %871 : vector<8x128xf32>
    %873 = vector.broadcast %870 : vector<8x1xf32> to vector<8x128xf32>
    %874 = arith.addf %873, %872 : vector<8x128xf32>
    %875 = vector.broadcast %4 : f32 to vector<8x128xf32>
    %876 = arith.mulf %848, %875 : vector<8x128xf32>
    %877 = arith.addf %874, %876 : vector<8x128xf32>
    %878 = vector.broadcast %8 : f32 to vector<8x128xf32>
    %879 = arith.mulf %851, %878 : vector<8x128xf32>
    %880 = arith.addf %877, %879 : vector<8x128xf32>
    %881 = vector.broadcast %12 : f32 to vector<8x128xf32>
    %882 = arith.mulf %854, %881 : vector<8x128xf32>
    %883 = arith.addf %880, %882 : vector<8x128xf32>
    %c0_274 = arith.constant 0 : index
    %c0_275 = arith.constant 0 : index
    %884 = arith.index_cast %21 : i32 to index
    %c1024 = arith.constant 1024 : index
    %885 = vector.load %arg16[%c0_274, %c0_275, %884, %c1024] : memref<1x4x8x1536xf32, #tpu.memory_space<vmem>>, vector<1x1x8x128xf32>
    %886 = vector.shape_cast %885 : vector<1x1x8x128xf32> to vector<8x128xf32>
    %887 = vector.shape_cast %883 : vector<8x128xf32> to vector<1x1x8x128xf32>
    tpu.vector_store %arg16[%c0_274, %c0_275, %884, %c1024], %887 {strides = array<i32>} : memref<1x4x8x1536xf32, #tpu.memory_space<vmem>>, vector<1x1x8x128xf32>,
    %888 = vector.broadcast %17 : f32 to vector<8x1xf32>
    %889 = arith.mulf %868, %888 : vector<8x1xf32>
    %890 = vector.broadcast %1 : f32 to vector<8x128xf32>
    %891 = arith.mulf %845, %890 : vector<8x128xf32>
    %892 = vector.broadcast %889 : vector<8x1xf32> to vector<8x128xf32>
    %893 = arith.addf %892, %891 : vector<8x128xf32>
    %894 = vector.broadcast %5 : f32 to vector<8x128xf32>
    %895 = arith.mulf %848, %894 : vector<8x128xf32>
    %896 = arith.addf %893, %895 : vector<8x128xf32>
    %897 = vector.broadcast %9 : f32 to vector<8x128xf32>
    %898 = arith.mulf %851, %897 : vector<8x128xf32>
    %899 = arith.addf %896, %898 : vector<8x128xf32>
    %900 = vector.broadcast %13 : f32 to vector<8x128xf32>
    %901 = arith.mulf %854, %900 : vector<8x128xf32>
    %902 = arith.addf %899, %901 : vector<8x128xf32>
    %c0_276 = arith.constant 0 : index
    %c1_277 = arith.constant 1 : index
    %903 = arith.index_cast %21 : i32 to index
    %c1024_278 = arith.constant 1024 : index
    %904 = vector.load %arg16[%c0_276, %c1_277, %903, %c1024_278] : memref<1x4x8x1536xf32, #tpu.memory_space<vmem>>, vector<1x1x8x128xf32>
    %905 = vector.shape_cast %904 : vector<1x1x8x128xf32> to vector<8x128xf32>
    %906 = vector.shape_cast %902 : vector<8x128xf32> to vector<1x1x8x128xf32>
    tpu.vector_store %arg16[%c0_276, %c1_277, %903, %c1024_278], %906 {strides = array<i32>} : memref<1x4x8x1536xf32, #tpu.memory_space<vmem>>, vector<1x1x8x128xf32>,
    %907 = vector.broadcast %18 : f32 to vector<8x1xf32>
    %908 = arith.mulf %868, %907 : vector<8x1xf32>
    %909 = vector.broadcast %2 : f32 to vector<8x128xf32>
    %910 = arith.mulf %845, %909 : vector<8x128xf32>
    %911 = vector.broadcast %908 : vector<8x1xf32> to vector<8x128xf32>
    %912 = arith.addf %911, %910 : vector<8x128xf32>
    %913 = vector.broadcast %6 : f32 to vector<8x128xf32>
    %914 = arith.mulf %848, %913 : vector<8x128xf32>
    %915 = arith.addf %912, %914 : vector<8x128xf32>
    %916 = vector.broadcast %10 : f32 to vector<8x128xf32>
    %917 = arith.mulf %851, %916 : vector<8x128xf32>
    %918 = arith.addf %915, %917 : vector<8x128xf32>
    %919 = vector.broadcast %14 : f32 to vector<8x128xf32>
    %920 = arith.mulf %854, %919 : vector<8x128xf32>
    %921 = arith.addf %918, %920 : vector<8x128xf32>
    %c0_279 = arith.constant 0 : index
    %c2_280 = arith.constant 2 : index
    %922 = arith.index_cast %21 : i32 to index
    %c1024_281 = arith.constant 1024 : index
    %923 = vector.load %arg16[%c0_279, %c2_280, %922, %c1024_281] : memref<1x4x8x1536xf32, #tpu.memory_space<vmem>>, vector<1x1x8x128xf32>
    %924 = vector.shape_cast %923 : vector<1x1x8x128xf32> to vector<8x128xf32>
    %925 = vector.shape_cast %921 : vector<8x128xf32> to vector<1x1x8x128xf32>
    tpu.vector_store %arg16[%c0_279, %c2_280, %922, %c1024_281], %925 {strides = array<i32>} : memref<1x4x8x1536xf32, #tpu.memory_space<vmem>>, vector<1x1x8x128xf32>,
    %926 = vector.broadcast %19 : f32 to vector<8x1xf32>
    %927 = arith.mulf %868, %926 : vector<8x1xf32>
    %928 = vector.broadcast %3 : f32 to vector<8x128xf32>
    %929 = arith.mulf %845, %928 : vector<8x128xf32>
    %930 = vector.broadcast %927 : vector<8x1xf32> to vector<8x128xf32>
    %931 = arith.addf %930, %929 : vector<8x128xf32>
    %932 = vector.broadcast %7 : f32 to vector<8x128xf32>
    %933 = arith.mulf %848, %932 : vector<8x128xf32>
    %934 = arith.addf %931, %933 : vector<8x128xf32>
    %935 = vector.broadcast %11 : f32 to vector<8x128xf32>
    %936 = arith.mulf %851, %935 : vector<8x128xf32>
    %937 = arith.addf %934, %936 : vector<8x128xf32>
    %938 = vector.broadcast %15 : f32 to vector<8x128xf32>
    %939 = arith.mulf %854, %938 : vector<8x128xf32>
    %940 = arith.addf %937, %939 : vector<8x128xf32>
    %c0_282 = arith.constant 0 : index
    %c3_283 = arith.constant 3 : index
    %941 = arith.index_cast %21 : i32 to index
    %c1024_284 = arith.constant 1024 : index
    %942 = vector.load %arg16[%c0_282, %c3_283, %941, %c1024_284] : memref<1x4x8x1536xf32, #tpu.memory_space<vmem>>, vector<1x1x8x128xf32>
    %943 = vector.shape_cast %942 : vector<1x1x8x128xf32> to vector<8x128xf32>
    %944 = vector.shape_cast %940 : vector<8x128xf32> to vector<1x1x8x128xf32>
    tpu.vector_store %arg16[%c0_282, %c3_283, %941, %c1024_284], %944 {strides = array<i32>} : memref<1x4x8x1536xf32, #tpu.memory_space<vmem>>, vector<1x1x8x128xf32>,
    %c0_285 = arith.constant 0 : index
    %c0_286 = arith.constant 0 : index
    %945 = arith.index_cast %21 : i32 to index
    %c0_287 = arith.constant 0 : index
    %946 = vector.load %arg13[%c0_285, %c0_286, %945, %c0_287] : memref<1x4x8x128xf32, #tpu.memory_space<vmem>>, vector<1x1x8x128xf32>
    %947 = vector.shape_cast %946 : vector<1x1x8x128xf32> to vector<8x128xf32>
    %c0_288 = arith.constant 0 : index
    %c1_289 = arith.constant 1 : index
    %948 = arith.index_cast %21 : i32 to index
    %c0_290 = arith.constant 0 : index
    %949 = vector.load %arg13[%c0_288, %c1_289, %948, %c0_290] : memref<1x4x8x128xf32, #tpu.memory_space<vmem>>, vector<1x1x8x128xf32>
    %950 = vector.shape_cast %949 : vector<1x1x8x128xf32> to vector<8x128xf32>
    %c0_291 = arith.constant 0 : index
    %c2_292 = arith.constant 2 : index
    %951 = arith.index_cast %21 : i32 to index
    %c0_293 = arith.constant 0 : index
    %952 = vector.load %arg13[%c0_291, %c2_292, %951, %c0_293] : memref<1x4x8x128xf32, #tpu.memory_space<vmem>>, vector<1x1x8x128xf32>
    %953 = vector.shape_cast %952 : vector<1x1x8x128xf32> to vector<8x128xf32>
    %c0_294 = arith.constant 0 : index
    %c3_295 = arith.constant 3 : index
    %954 = arith.index_cast %21 : i32 to index
    %c0_296 = arith.constant 0 : index
    %955 = vector.load %arg13[%c0_294, %c3_295, %954, %c0_296] : memref<1x4x8x128xf32, #tpu.memory_space<vmem>>, vector<1x1x8x128xf32>
    %956 = vector.shape_cast %955 : vector<1x1x8x128xf32> to vector<8x128xf32>
    %c12_i32_297 = arith.constant 12 : i32
    %957 = vector.broadcast %c12_i32_297 : i32 to vector<8x1xi32>
    %958 = arith.muli %957, %26 : vector<8x1xi32>
    %c9_i32 = arith.constant 9 : i32
    %959 = vector.broadcast %c9_i32 : i32 to vector<8x1xi32>
    %960 = arith.addi %958, %959 : vector<8x1xi32>
    %c11_i32_298 = arith.constant 11 : i32
    %961 = vector.broadcast %c11_i32_298 : i32 to vector<8x1xi32>
    %962 = arith.minsi %961, %960 : vector<8x1xi32>
    %c84_i32_299 = arith.constant 84 : i32
    %963 = vector.broadcast %c84_i32_299 : i32 to vector<8x1xi32>
    %964 = arith.subi %960, %963 : vector<8x1xi32>
    %c0_i32_300 = arith.constant 0 : i32
    %965 = vector.broadcast %c0_i32_300 : i32 to vector<8x1xi32>
    %966 = arith.maxsi %965, %964 : vector<8x1xi32>
    %967 = arith.subi %962, %966 : vector<8x1xi32>
    %c1_i32_301 = arith.constant 1 : i32
    %968 = vector.broadcast %c1_i32_301 : i32 to vector<8x1xi32>
    %969 = arith.addi %967, %968 : vector<8x1xi32>
    %970 = arith.sitofp %969 : vector<8x1xi32> to vector<8x1xf32>
    %971 = vector.broadcast %16 : f32 to vector<8x1xf32>
    %972 = arith.mulf %970, %971 : vector<8x1xf32>
    %973 = vector.broadcast %0 : f32 to vector<8x128xf32>
    %974 = arith.mulf %947, %973 : vector<8x128xf32>
    %975 = vector.broadcast %972 : vector<8x1xf32> to vector<8x128xf32>
    %976 = arith.addf %975, %974 : vector<8x128xf32>
    %977 = vector.broadcast %4 : f32 to vector<8x128xf32>
    %978 = arith.mulf %950, %977 : vector<8x128xf32>
    %979 = arith.addf %976, %978 : vector<8x128xf32>
    %980 = vector.broadcast %8 : f32 to vector<8x128xf32>
    %981 = arith.mulf %953, %980 : vector<8x128xf32>
    %982 = arith.addf %979, %981 : vector<8x128xf32>
    %983 = vector.broadcast %12 : f32 to vector<8x128xf32>
    %984 = arith.mulf %956, %983 : vector<8x128xf32>
    %985 = arith.addf %982, %984 : vector<8x128xf32>
    %c0_302 = arith.constant 0 : index
    %c0_303 = arith.constant 0 : index
    %986 = arith.index_cast %21 : i32 to index
    %c1152 = arith.constant 1152 : index
    %987 = vector.load %arg16[%c0_302, %c0_303, %986, %c1152] : memref<1x4x8x1536xf32, #tpu.memory_space<vmem>>, vector<1x1x8x128xf32>
    %988 = vector.shape_cast %987 : vector<1x1x8x128xf32> to vector<8x128xf32>
    %989 = vector.shape_cast %985 : vector<8x128xf32> to vector<1x1x8x128xf32>
    tpu.vector_store %arg16[%c0_302, %c0_303, %986, %c1152], %989 {strides = array<i32>} : memref<1x4x8x1536xf32, #tpu.memory_space<vmem>>, vector<1x1x8x128xf32>,
    %990 = vector.broadcast %17 : f32 to vector<8x1xf32>
    %991 = arith.mulf %970, %990 : vector<8x1xf32>
    %992 = vector.broadcast %1 : f32 to vector<8x128xf32>
    %993 = arith.mulf %947, %992 : vector<8x128xf32>
    %994 = vector.broadcast %991 : vector<8x1xf32> to vector<8x128xf32>
    %995 = arith.addf %994, %993 : vector<8x128xf32>
    %996 = vector.broadcast %5 : f32 to vector<8x128xf32>
    %997 = arith.mulf %950, %996 : vector<8x128xf32>
    %998 = arith.addf %995, %997 : vector<8x128xf32>
    %999 = vector.broadcast %9 : f32 to vector<8x128xf32>
    %1000 = arith.mulf %953, %999 : vector<8x128xf32>
    %1001 = arith.addf %998, %1000 : vector<8x128xf32>
    %1002 = vector.broadcast %13 : f32 to vector<8x128xf32>
    %1003 = arith.mulf %956, %1002 : vector<8x128xf32>
    %1004 = arith.addf %1001, %1003 : vector<8x128xf32>
    %c0_304 = arith.constant 0 : index
    %c1_305 = arith.constant 1 : index
    %1005 = arith.index_cast %21 : i32 to index
    %c1152_306 = arith.constant 1152 : index
    %1006 = vector.load %arg16[%c0_304, %c1_305, %1005, %c1152_306] : memref<1x4x8x1536xf32, #tpu.memory_space<vmem>>, vector<1x1x8x128xf32>
    %1007 = vector.shape_cast %1006 : vector<1x1x8x128xf32> to vector<8x128xf32>
    %1008 = vector.shape_cast %1004 : vector<8x128xf32> to vector<1x1x8x128xf32>
    tpu.vector_store %arg16[%c0_304, %c1_305, %1005, %c1152_306], %1008 {strides = array<i32>} : memref<1x4x8x1536xf32, #tpu.memory_space<vmem>>, vector<1x1x8x128xf32>,
    %1009 = vector.broadcast %18 : f32 to vector<8x1xf32>
    %1010 = arith.mulf %970, %1009 : vector<8x1xf32>
    %1011 = vector.broadcast %2 : f32 to vector<8x128xf32>
    %1012 = arith.mulf %947, %1011 : vector<8x128xf32>
    %1013 = vector.broadcast %1010 : vector<8x1xf32> to vector<8x128xf32>
    %1014 = arith.addf %1013, %1012 : vector<8x128xf32>
    %1015 = vector.broadcast %6 : f32 to vector<8x128xf32>
    %1016 = arith.mulf %950, %1015 : vector<8x128xf32>
    %1017 = arith.addf %1014, %1016 : vector<8x128xf32>
    %1018 = vector.broadcast %10 : f32 to vector<8x128xf32>
    %1019 = arith.mulf %953, %1018 : vector<8x128xf32>
    %1020 = arith.addf %1017, %1019 : vector<8x128xf32>
    %1021 = vector.broadcast %14 : f32 to vector<8x128xf32>
    %1022 = arith.mulf %956, %1021 : vector<8x128xf32>
    %1023 = arith.addf %1020, %1022 : vector<8x128xf32>
    %c0_307 = arith.constant 0 : index
    %c2_308 = arith.constant 2 : index
    %1024 = arith.index_cast %21 : i32 to index
    %c1152_309 = arith.constant 1152 : index
    %1025 = vector.load %arg16[%c0_307, %c2_308, %1024, %c1152_309] : memref<1x4x8x1536xf32, #tpu.memory_space<vmem>>, vector<1x1x8x128xf32>
    %1026 = vector.shape_cast %1025 : vector<1x1x8x128xf32> to vector<8x128xf32>
    %1027 = vector.shape_cast %1023 : vector<8x128xf32> to vector<1x1x8x128xf32>
    tpu.vector_store %arg16[%c0_307, %c2_308, %1024, %c1152_309], %1027 {strides = array<i32>} : memref<1x4x8x1536xf32, #tpu.memory_space<vmem>>, vector<1x1x8x128xf32>,
    %1028 = vector.broadcast %19 : f32 to vector<8x1xf32>
    %1029 = arith.mulf %970, %1028 : vector<8x1xf32>
    %1030 = vector.broadcast %3 : f32 to vector<8x128xf32>
    %1031 = arith.mulf %947, %1030 : vector<8x128xf32>
    %1032 = vector.broadcast %1029 : vector<8x1xf32> to vector<8x128xf32>
    %1033 = arith.addf %1032, %1031 : vector<8x128xf32>
    %1034 = vector.broadcast %7 : f32 to vector<8x128xf32>
    %1035 = arith.mulf %950, %1034 : vector<8x128xf32>
    %1036 = arith.addf %1033, %1035 : vector<8x128xf32>
    %1037 = vector.broadcast %11 : f32 to vector<8x128xf32>
    %1038 = arith.mulf %953, %1037 : vector<8x128xf32>
    %1039 = arith.addf %1036, %1038 : vector<8x128xf32>
    %1040 = vector.broadcast %15 : f32 to vector<8x128xf32>
    %1041 = arith.mulf %956, %1040 : vector<8x128xf32>
    %1042 = arith.addf %1039, %1041 : vector<8x128xf32>
    %c0_310 = arith.constant 0 : index
    %c3_311 = arith.constant 3 : index
    %1043 = arith.index_cast %21 : i32 to index
    %c1152_312 = arith.constant 1152 : index
    %1044 = vector.load %arg16[%c0_310, %c3_311, %1043, %c1152_312] : memref<1x4x8x1536xf32, #tpu.memory_space<vmem>>, vector<1x1x8x128xf32>
    %1045 = vector.shape_cast %1044 : vector<1x1x8x128xf32> to vector<8x128xf32>
    %1046 = vector.shape_cast %1042 : vector<8x128xf32> to vector<1x1x8x128xf32>
    tpu.vector_store %arg16[%c0_310, %c3_311, %1043, %c1152_312], %1046 {strides = array<i32>} : memref<1x4x8x1536xf32, #tpu.memory_space<vmem>>, vector<1x1x8x128xf32>,
    %c0_313 = arith.constant 0 : index
    %c0_314 = arith.constant 0 : index
    %1047 = arith.index_cast %21 : i32 to index
    %c0_315 = arith.constant 0 : index
    %1048 = vector.load %arg14[%c0_313, %c0_314, %1047, %c0_315] : memref<1x4x8x128xf32, #tpu.memory_space<vmem>>, vector<1x1x8x128xf32>
    %1049 = vector.shape_cast %1048 : vector<1x1x8x128xf32> to vector<8x128xf32>
    %c0_316 = arith.constant 0 : index
    %c1_317 = arith.constant 1 : index
    %1050 = arith.index_cast %21 : i32 to index
    %c0_318 = arith.constant 0 : index
    %1051 = vector.load %arg14[%c0_316, %c1_317, %1050, %c0_318] : memref<1x4x8x128xf32, #tpu.memory_space<vmem>>, vector<1x1x8x128xf32>
    %1052 = vector.shape_cast %1051 : vector<1x1x8x128xf32> to vector<8x128xf32>
    %c0_319 = arith.constant 0 : index
    %c2_320 = arith.constant 2 : index
    %1053 = arith.index_cast %21 : i32 to index
    %c0_321 = arith.constant 0 : index
    %1054 = vector.load %arg14[%c0_319, %c2_320, %1053, %c0_321] : memref<1x4x8x128xf32, #tpu.memory_space<vmem>>, vector<1x1x8x128xf32>
    %1055 = vector.shape_cast %1054 : vector<1x1x8x128xf32> to vector<8x128xf32>
    %c0_322 = arith.constant 0 : index
    %c3_323 = arith.constant 3 : index
    %1056 = arith.index_cast %21 : i32 to index
    %c0_324 = arith.constant 0 : index
    %1057 = vector.load %arg14[%c0_322, %c3_323, %1056, %c0_324] : memref<1x4x8x128xf32, #tpu.memory_space<vmem>>, vector<1x1x8x128xf32>
    %1058 = vector.shape_cast %1057 : vector<1x1x8x128xf32> to vector<8x128xf32>
    %c12_i32_325 = arith.constant 12 : i32
    %1059 = vector.broadcast %c12_i32_325 : i32 to vector<8x1xi32>
    %1060 = arith.muli %1059, %26 : vector<8x1xi32>
    %c10_i32 = arith.constant 10 : i32
    %1061 = vector.broadcast %c10_i32 : i32 to vector<8x1xi32>
    %1062 = arith.addi %1060, %1061 : vector<8x1xi32>
    %c11_i32_326 = arith.constant 11 : i32
    %1063 = vector.broadcast %c11_i32_326 : i32 to vector<8x1xi32>
    %1064 = arith.minsi %1063, %1062 : vector<8x1xi32>
    %c84_i32_327 = arith.constant 84 : i32
    %1065 = vector.broadcast %c84_i32_327 : i32 to vector<8x1xi32>
    %1066 = arith.subi %1062, %1065 : vector<8x1xi32>
    %c0_i32_328 = arith.constant 0 : i32
    %1067 = vector.broadcast %c0_i32_328 : i32 to vector<8x1xi32>
    %1068 = arith.maxsi %1067, %1066 : vector<8x1xi32>
    %1069 = arith.subi %1064, %1068 : vector<8x1xi32>
    %c1_i32_329 = arith.constant 1 : i32
    %1070 = vector.broadcast %c1_i32_329 : i32 to vector<8x1xi32>
    %1071 = arith.addi %1069, %1070 : vector<8x1xi32>
    %1072 = arith.sitofp %1071 : vector<8x1xi32> to vector<8x1xf32>
    %1073 = vector.broadcast %16 : f32 to vector<8x1xf32>
    %1074 = arith.mulf %1072, %1073 : vector<8x1xf32>
    %1075 = vector.broadcast %0 : f32 to vector<8x128xf32>
    %1076 = arith.mulf %1049, %1075 : vector<8x128xf32>
    %1077 = vector.broadcast %1074 : vector<8x1xf32> to vector<8x128xf32>
    %1078 = arith.addf %1077, %1076 : vector<8x128xf32>
    %1079 = vector.broadcast %4 : f32 to vector<8x128xf32>
    %1080 = arith.mulf %1052, %1079 : vector<8x128xf32>
    %1081 = arith.addf %1078, %1080 : vector<8x128xf32>
    %1082 = vector.broadcast %8 : f32 to vector<8x128xf32>
    %1083 = arith.mulf %1055, %1082 : vector<8x128xf32>
    %1084 = arith.addf %1081, %1083 : vector<8x128xf32>
    %1085 = vector.broadcast %12 : f32 to vector<8x128xf32>
    %1086 = arith.mulf %1058, %1085 : vector<8x128xf32>
    %1087 = arith.addf %1084, %1086 : vector<8x128xf32>
    %c0_330 = arith.constant 0 : index
    %c0_331 = arith.constant 0 : index
    %1088 = arith.index_cast %21 : i32 to index
    %c1280 = arith.constant 1280 : index
    %1089 = vector.load %arg16[%c0_330, %c0_331, %1088, %c1280] : memref<1x4x8x1536xf32, #tpu.memory_space<vmem>>, vector<1x1x8x128xf32>
    %1090 = vector.shape_cast %1089 : vector<1x1x8x128xf32> to vector<8x128xf32>
    %1091 = vector.shape_cast %1087 : vector<8x128xf32> to vector<1x1x8x128xf32>
    tpu.vector_store %arg16[%c0_330, %c0_331, %1088, %c1280], %1091 {strides = array<i32>} : memref<1x4x8x1536xf32, #tpu.memory_space<vmem>>, vector<1x1x8x128xf32>,
    %1092 = vector.broadcast %17 : f32 to vector<8x1xf32>
    %1093 = arith.mulf %1072, %1092 : vector<8x1xf32>
    %1094 = vector.broadcast %1 : f32 to vector<8x128xf32>
    %1095 = arith.mulf %1049, %1094 : vector<8x128xf32>
    %1096 = vector.broadcast %1093 : vector<8x1xf32> to vector<8x128xf32>
    %1097 = arith.addf %1096, %1095 : vector<8x128xf32>
    %1098 = vector.broadcast %5 : f32 to vector<8x128xf32>
    %1099 = arith.mulf %1052, %1098 : vector<8x128xf32>
    %1100 = arith.addf %1097, %1099 : vector<8x128xf32>
    %1101 = vector.broadcast %9 : f32 to vector<8x128xf32>
    %1102 = arith.mulf %1055, %1101 : vector<8x128xf32>
    %1103 = arith.addf %1100, %1102 : vector<8x128xf32>
    %1104 = vector.broadcast %13 : f32 to vector<8x128xf32>
    %1105 = arith.mulf %1058, %1104 : vector<8x128xf32>
    %1106 = arith.addf %1103, %1105 : vector<8x128xf32>
    %c0_332 = arith.constant 0 : index
    %c1_333 = arith.constant 1 : index
    %1107 = arith.index_cast %21 : i32 to index
    %c1280_334 = arith.constant 1280 : index
    %1108 = vector.load %arg16[%c0_332, %c1_333, %1107, %c1280_334] : memref<1x4x8x1536xf32, #tpu.memory_space<vmem>>, vector<1x1x8x128xf32>
    %1109 = vector.shape_cast %1108 : vector<1x1x8x128xf32> to vector<8x128xf32>
    %1110 = vector.shape_cast %1106 : vector<8x128xf32> to vector<1x1x8x128xf32>
    tpu.vector_store %arg16[%c0_332, %c1_333, %1107, %c1280_334], %1110 {strides = array<i32>} : memref<1x4x8x1536xf32, #tpu.memory_space<vmem>>, vector<1x1x8x128xf32>,
    %1111 = vector.broadcast %18 : f32 to vector<8x1xf32>
    %1112 = arith.mulf %1072, %1111 : vector<8x1xf32>
    %1113 = vector.broadcast %2 : f32 to vector<8x128xf32>
    %1114 = arith.mulf %1049, %1113 : vector<8x128xf32>
    %1115 = vector.broadcast %1112 : vector<8x1xf32> to vector<8x128xf32>
    %1116 = arith.addf %1115, %1114 : vector<8x128xf32>
    %1117 = vector.broadcast %6 : f32 to vector<8x128xf32>
    %1118 = arith.mulf %1052, %1117 : vector<8x128xf32>
    %1119 = arith.addf %1116, %1118 : vector<8x128xf32>
    %1120 = vector.broadcast %10 : f32 to vector<8x128xf32>
    %1121 = arith.mulf %1055, %1120 : vector<8x128xf32>
    %1122 = arith.addf %1119, %1121 : vector<8x128xf32>
    %1123 = vector.broadcast %14 : f32 to vector<8x128xf32>
    %1124 = arith.mulf %1058, %1123 : vector<8x128xf32>
    %1125 = arith.addf %1122, %1124 : vector<8x128xf32>
    %c0_335 = arith.constant 0 : index
    %c2_336 = arith.constant 2 : index
    %1126 = arith.index_cast %21 : i32 to index
    %c1280_337 = arith.constant 1280 : index
    %1127 = vector.load %arg16[%c0_335, %c2_336, %1126, %c1280_337] : memref<1x4x8x1536xf32, #tpu.memory_space<vmem>>, vector<1x1x8x128xf32>
    %1128 = vector.shape_cast %1127 : vector<1x1x8x128xf32> to vector<8x128xf32>
    %1129 = vector.shape_cast %1125 : vector<8x128xf32> to vector<1x1x8x128xf32>
    tpu.vector_store %arg16[%c0_335, %c2_336, %1126, %c1280_337], %1129 {strides = array<i32>} : memref<1x4x8x1536xf32, #tpu.memory_space<vmem>>, vector<1x1x8x128xf32>,
    %1130 = vector.broadcast %19 : f32 to vector<8x1xf32>
    %1131 = arith.mulf %1072, %1130 : vector<8x1xf32>
    %1132 = vector.broadcast %3 : f32 to vector<8x128xf32>
    %1133 = arith.mulf %1049, %1132 : vector<8x128xf32>
    %1134 = vector.broadcast %1131 : vector<8x1xf32> to vector<8x128xf32>
    %1135 = arith.addf %1134, %1133 : vector<8x128xf32>
    %1136 = vector.broadcast %7 : f32 to vector<8x128xf32>
    %1137 = arith.mulf %1052, %1136 : vector<8x128xf32>
    %1138 = arith.addf %1135, %1137 : vector<8x128xf32>
    %1139 = vector.broadcast %11 : f32 to vector<8x128xf32>
    %1140 = arith.mulf %1055, %1139 : vector<8x128xf32>
    %1141 = arith.addf %1138, %1140 : vector<8x128xf32>
    %1142 = vector.broadcast %15 : f32 to vector<8x128xf32>
    %1143 = arith.mulf %1058, %1142 : vector<8x128xf32>
    %1144 = arith.addf %1141, %1143 : vector<8x128xf32>
    %c0_338 = arith.constant 0 : index
    %c3_339 = arith.constant 3 : index
    %1145 = arith.index_cast %21 : i32 to index
    %c1280_340 = arith.constant 1280 : index
    %1146 = vector.load %arg16[%c0_338, %c3_339, %1145, %c1280_340] : memref<1x4x8x1536xf32, #tpu.memory_space<vmem>>, vector<1x1x8x128xf32>
    %1147 = vector.shape_cast %1146 : vector<1x1x8x128xf32> to vector<8x128xf32>
    %1148 = vector.shape_cast %1144 : vector<8x128xf32> to vector<1x1x8x128xf32>
    tpu.vector_store %arg16[%c0_338, %c3_339, %1145, %c1280_340], %1148 {strides = array<i32>} : memref<1x4x8x1536xf32, #tpu.memory_space<vmem>>, vector<1x1x8x128xf32>,
    %c0_341 = arith.constant 0 : index
    %c0_342 = arith.constant 0 : index
    %1149 = arith.index_cast %21 : i32 to index
    %c0_343 = arith.constant 0 : index
    %1150 = vector.load %arg15[%c0_341, %c0_342, %1149, %c0_343] : memref<1x4x8x128xf32, #tpu.memory_space<vmem>>, vector<1x1x8x128xf32>
    %1151 = vector.shape_cast %1150 : vector<1x1x8x128xf32> to vector<8x128xf32>
    %c0_344 = arith.constant 0 : index
    %c1_345 = arith.constant 1 : index
    %1152 = arith.index_cast %21 : i32 to index
    %c0_346 = arith.constant 0 : index
    %1153 = vector.load %arg15[%c0_344, %c1_345, %1152, %c0_346] : memref<1x4x8x128xf32, #tpu.memory_space<vmem>>, vector<1x1x8x128xf32>
    %1154 = vector.shape_cast %1153 : vector<1x1x8x128xf32> to vector<8x128xf32>
    %c0_347 = arith.constant 0 : index
    %c2_348 = arith.constant 2 : index
    %1155 = arith.index_cast %21 : i32 to index
    %c0_349 = arith.constant 0 : index
    %1156 = vector.load %arg15[%c0_347, %c2_348, %1155, %c0_349] : memref<1x4x8x128xf32, #tpu.memory_space<vmem>>, vector<1x1x8x128xf32>
    %1157 = vector.shape_cast %1156 : vector<1x1x8x128xf32> to vector<8x128xf32>
    %c0_350 = arith.constant 0 : index
    %c3_351 = arith.constant 3 : index
    %1158 = arith.index_cast %21 : i32 to index
    %c0_352 = arith.constant 0 : index
    %1159 = vector.load %arg15[%c0_350, %c3_351, %1158, %c0_352] : memref<1x4x8x128xf32, #tpu.memory_space<vmem>>, vector<1x1x8x128xf32>
    %1160 = vector.shape_cast %1159 : vector<1x1x8x128xf32> to vector<8x128xf32>
    %c12_i32_353 = arith.constant 12 : i32
    %1161 = vector.broadcast %c12_i32_353 : i32 to vector<8x1xi32>
    %1162 = arith.muli %1161, %26 : vector<8x1xi32>
    %c11_i32_354 = arith.constant 11 : i32
    %1163 = vector.broadcast %c11_i32_354 : i32 to vector<8x1xi32>
    %1164 = arith.addi %1162, %1163 : vector<8x1xi32>
    %c11_i32_355 = arith.constant 11 : i32
    %1165 = vector.broadcast %c11_i32_355 : i32 to vector<8x1xi32>
    %1166 = arith.minsi %1165, %1164 : vector<8x1xi32>
    %c84_i32_356 = arith.constant 84 : i32
    %1167 = vector.broadcast %c84_i32_356 : i32 to vector<8x1xi32>
    %1168 = arith.subi %1164, %1167 : vector<8x1xi32>
    %c0_i32_357 = arith.constant 0 : i32
    %1169 = vector.broadcast %c0_i32_357 : i32 to vector<8x1xi32>
    %1170 = arith.maxsi %1169, %1168 : vector<8x1xi32>
    %1171 = arith.subi %1166, %1170 : vector<8x1xi32>
    %c1_i32_358 = arith.constant 1 : i32
    %1172 = vector.broadcast %c1_i32_358 : i32 to vector<8x1xi32>
    %1173 = arith.addi %1171, %1172 : vector<8x1xi32>
    %1174 = arith.sitofp %1173 : vector<8x1xi32> to vector<8x1xf32>
    %1175 = vector.broadcast %16 : f32 to vector<8x1xf32>
    %1176 = arith.mulf %1174, %1175 : vector<8x1xf32>
    %1177 = vector.broadcast %0 : f32 to vector<8x128xf32>
    %1178 = arith.mulf %1151, %1177 : vector<8x128xf32>
    %1179 = vector.broadcast %1176 : vector<8x1xf32> to vector<8x128xf32>
    %1180 = arith.addf %1179, %1178 : vector<8x128xf32>
    %1181 = vector.broadcast %4 : f32 to vector<8x128xf32>
    %1182 = arith.mulf %1154, %1181 : vector<8x128xf32>
    %1183 = arith.addf %1180, %1182 : vector<8x128xf32>
    %1184 = vector.broadcast %8 : f32 to vector<8x128xf32>
    %1185 = arith.mulf %1157, %1184 : vector<8x128xf32>
    %1186 = arith.addf %1183, %1185 : vector<8x128xf32>
    %1187 = vector.broadcast %12 : f32 to vector<8x128xf32>
    %1188 = arith.mulf %1160, %1187 : vector<8x128xf32>
    %1189 = arith.addf %1186, %1188 : vector<8x128xf32>
    %c0_359 = arith.constant 0 : index
    %c0_360 = arith.constant 0 : index
    %1190 = arith.index_cast %21 : i32 to index
    %c1408 = arith.constant 1408 : index
    %1191 = vector.load %arg16[%c0_359, %c0_360, %1190, %c1408] : memref<1x4x8x1536xf32, #tpu.memory_space<vmem>>, vector<1x1x8x128xf32>
    %1192 = vector.shape_cast %1191 : vector<1x1x8x128xf32> to vector<8x128xf32>
    %1193 = vector.shape_cast %1189 : vector<8x128xf32> to vector<1x1x8x128xf32>
    tpu.vector_store %arg16[%c0_359, %c0_360, %1190, %c1408], %1193 {strides = array<i32>} : memref<1x4x8x1536xf32, #tpu.memory_space<vmem>>, vector<1x1x8x128xf32>,
    %1194 = vector.broadcast %17 : f32 to vector<8x1xf32>
    %1195 = arith.mulf %1174, %1194 : vector<8x1xf32>
    %1196 = vector.broadcast %1 : f32 to vector<8x128xf32>
    %1197 = arith.mulf %1151, %1196 : vector<8x128xf32>
    %1198 = vector.broadcast %1195 : vector<8x1xf32> to vector<8x128xf32>
    %1199 = arith.addf %1198, %1197 : vector<8x128xf32>
    %1200 = vector.broadcast %5 : f32 to vector<8x128xf32>
    %1201 = arith.mulf %1154, %1200 : vector<8x128xf32>
    %1202 = arith.addf %1199, %1201 : vector<8x128xf32>
    %1203 = vector.broadcast %9 : f32 to vector<8x128xf32>
    %1204 = arith.mulf %1157, %1203 : vector<8x128xf32>
    %1205 = arith.addf %1202, %1204 : vector<8x128xf32>
    %1206 = vector.broadcast %13 : f32 to vector<8x128xf32>
    %1207 = arith.mulf %1160, %1206 : vector<8x128xf32>
    %1208 = arith.addf %1205, %1207 : vector<8x128xf32>
    %c0_361 = arith.constant 0 : index
    %c1_362 = arith.constant 1 : index
    %1209 = arith.index_cast %21 : i32 to index
    %c1408_363 = arith.constant 1408 : index
    %1210 = vector.load %arg16[%c0_361, %c1_362, %1209, %c1408_363] : memref<1x4x8x1536xf32, #tpu.memory_space<vmem>>, vector<1x1x8x128xf32>
    %1211 = vector.shape_cast %1210 : vector<1x1x8x128xf32> to vector<8x128xf32>
    %1212 = vector.shape_cast %1208 : vector<8x128xf32> to vector<1x1x8x128xf32>
    tpu.vector_store %arg16[%c0_361, %c1_362, %1209, %c1408_363], %1212 {strides = array<i32>} : memref<1x4x8x1536xf32, #tpu.memory_space<vmem>>, vector<1x1x8x128xf32>,
    %1213 = vector.broadcast %18 : f32 to vector<8x1xf32>
    %1214 = arith.mulf %1174, %1213 : vector<8x1xf32>
    %1215 = vector.broadcast %2 : f32 to vector<8x128xf32>
    %1216 = arith.mulf %1151, %1215 : vector<8x128xf32>
    %1217 = vector.broadcast %1214 : vector<8x1xf32> to vector<8x128xf32>
    %1218 = arith.addf %1217, %1216 : vector<8x128xf32>
    %1219 = vector.broadcast %6 : f32 to vector<8x128xf32>
    %1220 = arith.mulf %1154, %1219 : vector<8x128xf32>
    %1221 = arith.addf %1218, %1220 : vector<8x128xf32>
    %1222 = vector.broadcast %10 : f32 to vector<8x128xf32>
    %1223 = arith.mulf %1157, %1222 : vector<8x128xf32>
    %1224 = arith.addf %1221, %1223 : vector<8x128xf32>
    %1225 = vector.broadcast %14 : f32 to vector<8x128xf32>
    %1226 = arith.mulf %1160, %1225 : vector<8x128xf32>
    %1227 = arith.addf %1224, %1226 : vector<8x128xf32>
    %c0_364 = arith.constant 0 : index
    %c2_365 = arith.constant 2 : index
    %1228 = arith.index_cast %21 : i32 to index
    %c1408_366 = arith.constant 1408 : index
    %1229 = vector.load %arg16[%c0_364, %c2_365, %1228, %c1408_366] : memref<1x4x8x1536xf32, #tpu.memory_space<vmem>>, vector<1x1x8x128xf32>
    %1230 = vector.shape_cast %1229 : vector<1x1x8x128xf32> to vector<8x128xf32>
    %1231 = vector.shape_cast %1227 : vector<8x128xf32> to vector<1x1x8x128xf32>
    tpu.vector_store %arg16[%c0_364, %c2_365, %1228, %c1408_366], %1231 {strides = array<i32>} : memref<1x4x8x1536xf32, #tpu.memory_space<vmem>>, vector<1x1x8x128xf32>,
    %1232 = vector.broadcast %19 : f32 to vector<8x1xf32>
    %1233 = arith.mulf %1174, %1232 : vector<8x1xf32>
    %1234 = vector.broadcast %3 : f32 to vector<8x128xf32>
    %1235 = arith.mulf %1151, %1234 : vector<8x128xf32>
    %1236 = vector.broadcast %1233 : vector<8x1xf32> to vector<8x128xf32>
    %1237 = arith.addf %1236, %1235 : vector<8x128xf32>
    %1238 = vector.broadcast %7 : f32 to vector<8x128xf32>
    %1239 = arith.mulf %1154, %1238 : vector<8x128xf32>
    %1240 = arith.addf %1237, %1239 : vector<8x128xf32>
    %1241 = vector.broadcast %11 : f32 to vector<8x128xf32>
    %1242 = arith.mulf %1157, %1241 : vector<8x128xf32>
    %1243 = arith.addf %1240, %1242 : vector<8x128xf32>
    %1244 = vector.broadcast %15 : f32 to vector<8x128xf32>
    %1245 = arith.mulf %1160, %1244 : vector<8x128xf32>
    %1246 = arith.addf %1243, %1245 : vector<8x128xf32>
    %c0_367 = arith.constant 0 : index
    %c3_368 = arith.constant 3 : index
    %1247 = arith.index_cast %21 : i32 to index
    %c1408_369 = arith.constant 1408 : index
    %1248 = vector.load %arg16[%c0_367, %c3_368, %1247, %c1408_369] : memref<1x4x8x1536xf32, #tpu.memory_space<vmem>>, vector<1x1x8x128xf32>
    %1249 = vector.shape_cast %1248 : vector<1x1x8x128xf32> to vector<8x128xf32>
    %1250 = vector.shape_cast %1246 : vector<8x128xf32> to vector<1x1x8x128xf32>
    tpu.vector_store %arg16[%c0_367, %c3_368, %1247, %c1408_369], %1250 {strides = array<i32>} : memref<1x4x8x1536xf32, #tpu.memory_space<vmem>>, vector<1x1x8x128xf32>,
    %c1_i32_370 = arith.constant 1 : i32
    return
  }
  func.func @transform_0(%arg0: i32, %arg1: i32, %arg2: memref<4x4xf32, #tpu.memory_space<smem>>, %arg3: memref<4xf32, #tpu.memory_space<smem>>) -> (i32, i32, i32, i32) {
    %c0_i32 = arith.constant 0 : i32
    %c0_i32_0 = arith.constant 0 : i32
    %c0_i32_1 = arith.constant 0 : i32
    return %arg0, %c0_i32, %arg1, %c0_i32_0 : i32, i32, i32, i32
  }
  func.func @transform_1(%arg0: i32, %arg1: i32, %arg2: memref<4x4xf32, #tpu.memory_space<smem>>, %arg3: memref<4xf32, #tpu.memory_space<smem>>) -> (i32, i32, i32, i32) {
    %c0_i32 = arith.constant 0 : i32
    %c0_i32_0 = arith.constant 0 : i32
    %c0_i32_1 = arith.constant 0 : i32
    return %arg0, %c0_i32, %arg1, %c0_i32_0 : i32, i32, i32, i32
  }
  func.func @transform_2(%arg0: i32, %arg1: i32, %arg2: memref<4x4xf32, #tpu.memory_space<smem>>, %arg3: memref<4xf32, #tpu.memory_space<smem>>) -> (i32, i32, i32, i32) {
    %c0_i32 = arith.constant 0 : i32
    %c0_i32_0 = arith.constant 0 : i32
    %c0_i32_1 = arith.constant 0 : i32
    return %arg0, %c0_i32, %arg1, %c0_i32_0 : i32, i32, i32, i32
  }
  func.func @transform_3(%arg0: i32, %arg1: i32, %arg2: memref<4x4xf32, #tpu.memory_space<smem>>, %arg3: memref<4xf32, #tpu.memory_space<smem>>) -> (i32, i32, i32, i32) {
    %c0_i32 = arith.constant 0 : i32
    %c0_i32_0 = arith.constant 0 : i32
    %c0_i32_1 = arith.constant 0 : i32
    return %arg0, %c0_i32, %arg1, %c0_i32_0 : i32, i32, i32, i32
  }
  func.func @transform_4(%arg0: i32, %arg1: i32, %arg2: memref<4x4xf32, #tpu.memory_space<smem>>, %arg3: memref<4xf32, #tpu.memory_space<smem>>) -> (i32, i32, i32, i32) {
    %c0_i32 = arith.constant 0 : i32
    %c0_i32_0 = arith.constant 0 : i32
    %c0_i32_1 = arith.constant 0 : i32
    return %arg0, %c0_i32, %arg1, %c0_i32_0 : i32, i32, i32, i32
  }
  func.func @transform_5(%arg0: i32, %arg1: i32, %arg2: memref<4x4xf32, #tpu.memory_space<smem>>, %arg3: memref<4xf32, #tpu.memory_space<smem>>) -> (i32, i32, i32, i32) {
    %c0_i32 = arith.constant 0 : i32
    %c0_i32_0 = arith.constant 0 : i32
    %c0_i32_1 = arith.constant 0 : i32
    return %arg0, %c0_i32, %arg1, %c0_i32_0 : i32, i32, i32, i32
  }
  func.func @transform_6(%arg0: i32, %arg1: i32, %arg2: memref<4x4xf32, #tpu.memory_space<smem>>, %arg3: memref<4xf32, #tpu.memory_space<smem>>) -> (i32, i32, i32, i32) {
    %c0_i32 = arith.constant 0 : i32
    %c0_i32_0 = arith.constant 0 : i32
    %c0_i32_1 = arith.constant 0 : i32
    return %arg0, %c0_i32, %arg1, %c0_i32_0 : i32, i32, i32, i32
  }
  func.func @transform_7(%arg0: i32, %arg1: i32, %arg2: memref<4x4xf32, #tpu.memory_space<smem>>, %arg3: memref<4xf32, #tpu.memory_space<smem>>) -> (i32, i32, i32, i32) {
    %c0_i32 = arith.constant 0 : i32
    %c0_i32_0 = arith.constant 0 : i32
    %c0_i32_1 = arith.constant 0 : i32
    return %arg0, %c0_i32, %arg1, %c0_i32_0 : i32, i32, i32, i32
  }
  func.func @transform_8(%arg0: i32, %arg1: i32, %arg2: memref<4x4xf32, #tpu.memory_space<smem>>, %arg3: memref<4xf32, #tpu.memory_space<smem>>) -> (i32, i32, i32, i32) {
    %c0_i32 = arith.constant 0 : i32
    %c0_i32_0 = arith.constant 0 : i32
    %c0_i32_1 = arith.constant 0 : i32
    return %arg0, %c0_i32, %arg1, %c0_i32_0 : i32, i32, i32, i32
  }
  func.func @transform_9(%arg0: i32, %arg1: i32, %arg2: memref<4x4xf32, #tpu.memory_space<smem>>, %arg3: memref<4xf32, #tpu.memory_space<smem>>) -> (i32, i32, i32, i32) {
    %c0_i32 = arith.constant 0 : i32
    %c0_i32_0 = arith.constant 0 : i32
    %c0_i32_1 = arith.constant 0 : i32
    return %arg0, %c0_i32, %arg1, %c0_i32_0 : i32, i32, i32, i32
  }
  func.func @transform_10(%arg0: i32, %arg1: i32, %arg2: memref<4x4xf32, #tpu.memory_space<smem>>, %arg3: memref<4xf32, #tpu.memory_space<smem>>) -> (i32, i32, i32, i32) {
    %c0_i32 = arith.constant 0 : i32
    %c0_i32_0 = arith.constant 0 : i32
    %c0_i32_1 = arith.constant 0 : i32
    return %arg0, %c0_i32, %arg1, %c0_i32_0 : i32, i32, i32, i32
  }
  func.func @transform_11(%arg0: i32, %arg1: i32, %arg2: memref<4x4xf32, #tpu.memory_space<smem>>, %arg3: memref<4xf32, #tpu.memory_space<smem>>) -> (i32, i32, i32, i32) {
    %c0_i32 = arith.constant 0 : i32
    %c0_i32_0 = arith.constant 0 : i32
    %c0_i32_1 = arith.constant 0 : i32
    return %arg0, %c0_i32, %arg1, %c0_i32_0 : i32, i32, i32, i32
  }
  func.func @transform_12(%arg0: i32, %arg1: i32, %arg2: memref<4x4xf32, #tpu.memory_space<smem>>, %arg3: memref<4xf32, #tpu.memory_space<smem>>) -> (i32, i32, i32, i32) {
    %c0_i32 = arith.constant 0 : i32
    %c0_i32_0 = arith.constant 0 : i32
    %c0_i32_1 = arith.constant 0 : i32
    return %arg0, %c0_i32, %arg1, %c0_i32_0 : i32, i32, i32, i32
  }
}

</mosaic_0001>

<bundles_post_ra>
// kernel: tpu_custom_call.1
= control target key start
LH: loop header
LB: loop body
LE: loop exit
PB: predicated region body
PF: predicated region fallthrough
CT: control target
= control target key end

     0   :  { %s4180_s0 = inlined_call_operand.hbm [shape: f32[4,4], index: 0, kind: input, shape index: {}]   ;;  %s4181_s2 = inlined_call_operand.hbm [shape: f32[2,4,8,128], index: 2, kind: input, shape index: {}]   ;;  %s4182_s3 = inlined_call_operand.hbm [shape: f32[2,4,8,128], index: 3, kind: input, shape index: {}]   ;;  %s4183_s4 = inlined_call_operand.hbm [shape: f32[2,4,8,128], index: 4, kind: input, shape index: {}]   ;;  %s4184_s5 = inlined_call_operand.hbm [shape: f32[2,4,8,128], index: 5, kind: input, shape index: {}]   ;;  %s4185_s6 = inlined_call_operand.hbm [shape: f32[2,4,8,128], index: 6, kind: input, shape index: {}]   ;;  %s4186_s7 = inlined_call_operand.hbm [shape: f32[2,4,8,128], index: 7, kind: input, shape index: {}]   ;;  %s4187_s8 = inlined_call_operand.hbm [shape: f32[2,4,8,128], index: 8, kind: input, shape index: {}]   ;;  %s4188_s9 = inlined_call_operand.hbm [shape: f32[2,4,8,128], index: 9, kind: input, shape index: {}]   ;;  %s4189_s10 = inlined_call_operand.hbm [shape: f32[2,4,8,128], index: 10, kind: input, shape index: {}]   ;;  %s4190_s11 = inlined_call_operand.hbm [shape: f32[2,4,8,128], index: 11, kind: input, shape index: {}]   ;;  %s4191_s12 = inlined_call_operand.hbm [shape: f32[2,4,8,128], index: 12, kind: input, shape index: {}]   ;;  %s4192_s13 = inlined_call_operand.hbm [shape: f32[2,4,8,128], index: 13, kind: input, shape index: {}]   ;;  %s4193_s14 = inlined_call_operand.hbm [shape: f32[2,4,8,1536], index: 14, kind: output, shape index: {}]   ;;  %s4194_s1 = inlined_call_operand.vmem [shape: f32[4], index: 1, kind: input, shape index: {}]  }
   0x1   :  { %4221 = sst [smem:[#allocation52_spill]] %s4181_s2  ;;  %s2346_s15 = scalar_lea.hbm %s4180_s0, 64 }
   0x2   :  { %4222 = sst [smem:[#allocation53_spill]] %s4182_s3  ;;  %p2347_p0 = scmp.ne.s32.totalorder %s4180_s0, %s2346_s15 }
   0x3   :  { %4223 = sst [smem:[#allocation54_spill]] %s4183_s4  ;;  %p2350_p1 = scmp.lt.u32.totalorder %s2346_s15, %s4180_s0 }
   0x4   :  { %4224 = sst [smem:[#allocation55_spill]] %s4184_s5 }
   0x5   :  { %4225 = sst [smem:[#allocation56_spill]] %s4185_s6  ;;  %p2352_p2 = pnand %p2350_p1, %p2347_p0 }
   0x6   :  { %4226 = sst [smem:[#allocation57_spill]] %s4186_s7 }
   0x7   :  { %4227 = sst [smem:[#allocation58_spill]] %s4187_s8 }
   0x8   :  { %4228 = sst [smem:[#allocation59_spill]] %s4188_s9 }
   0x9   :  { %4229 = sst [smem:[#allocation60_spill]] %s4190_s11 }
   0xa   :  { %4230 = sst [smem:[#allocation61_spill]] %s4193_s14 }
   0xb   :  { %2355 = shalt.err (!%p2352_p2)  }
   0xc   :  { %s2838_s20 = smov [#allocation3]   ;;  %s21_s25 = sshll.u32 %s4194_s1, 4  ;;  %s22_s25 = int_to_ptr.vmem [resolvable:$true] %s21_s25 }
   0xd   :  { %20 = dma.hbm_to_smem %s4180_s0, 64, %s2838_s20, [#allocation2] }
   0xe   :  { %s2356_s26 = scalar_lea.vmem %s22_s25, 16  ;;  %p2361_p4 = scmp.lt.s32.totalorder %s22_s25, %s22_s25 }
   0xf   :  { %p2357_p3 = scmp.ne.s32.totalorder %s22_s25, %s2356_s26  ;;  %p2362_p5 = scmp.lt.s32.totalorder %s2356_s26, %s2356_s26 }
  0x11   :  { %p2363_p6 = por %p2362_p5, %p2361_p4 }
  0x13   :  { %p2364_p7 = pnand %p2363_p6, %p2357_p3 }
  0x15   :  { %2367 = shalt.err (!%p2364_p7)  }
  0x16   :  { %s2839_s27 = smov [#allocation4]  }
  0x17   :  { %24 = dma.vmem_to_smem %s22_s25, 16, %s2839_s27, [#allocation2] }
  0x18   :  { %2780 = dma.done.wait [#allocation2], 80 }
  0x19   :  { %2781 = vsyncadd [#allocation2], 4294967216 }
  0x1a   :  { %26 = sfence }
  0x1b   :  { %27 = vsyncpa [#allocation6], 0 }
  0x1c   :  { %29 = vsyncpa [#allocation6 + $0x1], 0 }
  0x1d   :  { %30 = vsyncpa [#allocation9], 0 }
  0x1e   :  { %32 = vsyncpa [#allocation9 + $0x1], 0 }
  0x1f   :  { %33 = vsyncpa [#allocation12], 0 }
  0x20   :  { %35 = vsyncpa [#allocation12 + $0x1], 0 }
  0x21   :  { %36 = vsyncpa [#allocation15], 0 }
  0x22   :  { %38 = vsyncpa [#allocation15 + $0x1], 0 }
  0x23   :  { %39 = vsyncpa [#allocation18], 0 }
  0x24   :  { %41 = vsyncpa [#allocation18 + $0x1], 0 }
  0x25   :  { %42 = vsyncpa [#allocation21], 0 }
  0x26   :  { %44 = vsyncpa [#allocation21 + $0x1], 0 }
  0x27   :  { %45 = vsyncpa [#allocation24], 0 }
  0x28   :  { %47 = vsyncpa [#allocation24 + $0x1], 0 }
  0x29   :  { %48 = vsyncpa [#allocation7], 0 }
  0x2a   :  { %50 = vsyncpa [#allocation7 + $0x1], 0  ;;  %s2947_s0 = smov 0   ;;  %s2949_s1 = smov 0  }
  0x2b   :  { %s2951_s28 = smov 0   ;;  %s2953_s29 = smov 0  }
  0x2c   :  { %s2955_s30 = smov 0   ;;  %s2957_s15 = smov 0  }
  0x2d LB: > { %4231 = sst [smem:[#allocation35_spill]] %s2816_s0  ;;  %s2978_s16 = sadd.s32 4294967295, %s2836_s15   ;;  %s2836_s15 = sphi %s2957_s15, %s56_s15   ;;  %s2832_s30 = sphi %s2955_s30, %s4302_s30   ;;  %s2828_s29 = sphi %s2953_s29, %s4301_s29   ;;  %s2824_s28 = sphi %s2951_s28, %s4300_s28   ;;  %s2820_s1 = sphi %s2949_s1, %s4304_s1   ;;  %s2816_s0 = sphi %s2947_s0, %s4303_s0  }
  0x2e   : > { %4232 = sst [smem:[#allocation36_spill]] %s2824_s28  ;;  %s2052_s17 = sadd.s32 4294967294, %s2836_s15  }
  0x2f   : > { %4233 = sst [smem:[#allocation37_spill]] %s2828_s29  ;;  %s68_s18 = sadd.s32 1, %s2832_s30 }
  0x30   : > { %4234 = sst [smem:[#allocation38_spill]] %s2832_s30  ;;  %s77_s19 = sadd.s32 1, %s2824_s28 }
  0x31   : > { %4235 = sst [smem:[#allocation39_spill]] %s2836_s15  ;;  %p70_p8 = scmp.ge.s32.totalorder %s68_s18, 2 }
  0x32   : > { %4236 = sst [smem:[#allocation40_spill]] %s2978_s16  ;;  %p84_p9 = scmp.ne.s32.totalorder %s2824_s28, %s2820_s1 }
  0x33   : > { %p85_p10 = scmp.eq.s32.totalorder %s2836_s15, 0  ;;  %p90_p11 = scmp.ne.s32.totalorder %s2820_s1, %s2816_s0 }
  0x34   : > { %s4306_s18 = smov (%p70_p8, %s68_s18), 0  ;;  %p91_p13 = scmp.eq.s32.totalorder %s2978_s16, 0 }
  0x35   : > { %4237 = sst [smem:[#allocation41_spill]] %s4306_s18  ;;  %p2990_p12 = por %p85_p10, %p84_p9 }
  0x36   : > { %s72_s21 = ssub.s32 %s2832_s30, %s4306_s18  ;;  %p424_p0 = scmp.eq.s32.totalorder %s2978_s16, 1 }
  0x37   : > { %p75_p1 = scmp.eq.s32.totalorder %s72_s21, 0  ;;  %p2998_p2 = por %p91_p13, %p90_p11 }
  0x38   : > { %p3002_p3 = por %p424_p0, %p84_p9  ;;  %p430_p4 = scmp.eq.s32.totalorder %s2052_s17, 1 }
  0x39   : > { %s4239_s22 = scalar_select %p2998_p2, 1, 0 }
  0x3a   : > { %s4240_s23 = scalar_select %p3002_p3, 1, 0 }
  0x3b   : > { %s3007_s24 = scalar_select %p75_p1, %s2824_s28, %s77_s19  }
  0x3c   : > { %4241 = sst [smem:[#allocation42_spill]] %s4240_s23  ;;  %p3009_p5 = por %p430_p4, %p90_p11 }
  0x3d   : > { %4242 = sst [smem:[#allocation43_spill]] %s3007_s24  ;;  %p2290_p7 = scmp.lt.s32.totalorder %s2836_s15, 2 }
  0x3e   : > { %s4243_s25 = scalar_select %p3009_p5, 1, 0 }
  0x3f   : > { %s3016_s26 = sand.u32 1, %s2824_s28   ;;  %s3022_s21 = sshll.u32 %s2832_s30, 9 }
  0x40   : > { %4244 = sst [smem:[#allocation44_spill]] %s4243_s25  ;;  %s3019_s27 = sshll.u32 %s3016_s26, 5 }
  0x41   : > { %p3026_p8 = pnand %p2290_p7, %p2990_p12  ;;  %s3031_s19 = sand.u32 1, %s2836_s15  }
  0x42   : > { %s4246_s3 = sld [smem:[#allocation53_spill]]  ;;  %s476_s30 = scalar_lea.vmem [#allocation8], %s3019_s27 }
  0x43   : > { %s484_s20 = sshll.u32 %s476_s30, 4  ;;  %p3049_p12 = pneg %p3026_p8  ;;  %s3041_s20 = int_to_ptr.vmem [resolvable:$true] %s484_s20 }
  0x48   : > { %s3037_s28 = scalar_lea.hbm %s4246_s3, %s3022_s21  ;;  %s2373_s30 = scalar_lea.hbm %s4246_s3, 1024 }
  0x49   : > { %s2368_s0 = scalar_lea.hbm %s3037_s28, 512  ;;  %p2374_p1 = scmp.lt.u32.totalorder %s3037_s28, %s4246_s3 }
  0x4a   : > { %p2369_p11 = scmp.ne.s32.totalorder %s3037_s28, %s2368_s0  ;;  %p2375_p4 = scmp.lt.u32.totalorder %s2373_s30, %s2368_s0 }
  0x4b   : > { %p2377_p6 = scmp.lt.u32.totalorder %s2368_s0, %s3037_s28 }
  0x4c   : > { %p2371_p13 = pnand %p3049_p12, %p2369_p11  ;;  %p2376_p7 = por %p2375_p4, %p2374_p1 }
  0x4e   : > { %p2372_p0 = pneg %p2371_p13  ;;  %p2378_p9 = por %p2377_p6, %p2376_p7 }
  0x50   : > { %p2379_p10 = pnand %p2378_p9, %p2372_p0 }
  0x52   : > { %2382 = shalt.err (!%p2379_p10)
}
  0x53   : > { %s2383_s25 = scalar_lea.vmem %s3041_s20, 512  ;;  %s2840_s18 = smov [#allocation8]  }
  0x54   : > { %p2384_p11 = scmp.ne.s32.totalorder %s3041_s20, %s2383_s25  ;;  %s2388_s24 = sshll.u32 %s2840_s18, 4  ;;  %s2389_s24 = int_to_ptr.vmem [resolvable:$false] %s2388_s24 }
  0x55   : > { %s2390_s29 = scalar_lea.vmem %s2389_s24, 1024  ;;  %p2391_p3 = scmp.lt.s32.totalorder %s3041_s20, %s2389_s24 }
  0x56   : > { %p2386_p13 = pnand %p2384_p11, %p3049_p12  ;;  %p2392_p2 = scmp.lt.s32.totalorder %s2390_s29, %s2383_s25 }
  0x58   : > { %p2387_p5 = pneg %p2386_p13  ;;  %p2393_p1 = por %p2392_p2, %p2391_p3 }
  0x5a   : > { %p2394_p4 = pnand %p2393_p1, %p2387_p5 }
  0x5c   : > { %2397 = shalt.err (!%p2394_p4)
}
  0x5d   : > { %s4206_s0 = smov 128   ;;  %s4208_s23 = smov 8  }
  0x5e   : > { %s4248_s25 = scalar_lea.sflag [#allocation9], %s3031_s19  ;;  %p4249_p2 = scmp.lt.s32.totalorder %s2836_s15, 3 }
  0x5f   : > { %2255 = dma.hbm_to_vmem [thread:$0]  (!%p3026_p8), %s3037_s28, 512, %s3041_s20, %s4248_s25, %s4206_s0, %s4206_s0, %s4208_s23  }
  0x60   : > { %p4250_p3 = scmp.ge.s32.totalorder %s2836_s15, 1  ;;  %s4252_s5 = sld [smem:[#allocation55_spill]] }
  0x61   : > { %s520_s3 = scalar_lea.vmem [#allocation11], %s3019_s27  ;;  %s4212_s28 = scalar_lea.sflag [#allocation12], %s3031_s19 }
  0x62   : > { %p3081_p5 = pnand %p4250_p3, %p4249_p2  ;;  %s528_s16 = sshll.u32 %s520_s3, 4  ;;  %s3092_s16 = int_to_ptr.vmem [resolvable:$true] %s528_s16 }
  0x64   : > { %s4251_s30 = scalar_select %p3081_p5, 1, 0 }
  0x66   : > { %s3089_s29 = scalar_lea.hbm %s4252_s5, %s3022_s21  ;;  %s2403_s18 = scalar_lea.hbm %s4252_s5, 1024 }
  0x67   : > { %s2398_s20 = scalar_lea.hbm %s3089_s29, 512  ;;  %p2404_p0 = scmp.lt.u32.totalorder %s3089_s29, %s4252_s5 }
  0x68   : > { %p2399_p6 = scmp.ne.s32.totalorder %s3089_s29, %s2398_s20  ;;  %p2405_p7 = scmp.lt.u32.totalorder %s2403_s18, %s2398_s20 }
  0x69   : > { %p2407_p13 = scmp.lt.u32.totalorder %s2398_s20, %s3089_s29 }
  0x6a   : > { %p2401_p9 = pnand %p2399_p6, %p3049_p12  ;;  %p2406_p11 = por %p2405_p7, %p2404_p0 }
  0x6c   : > { %p2402_p10 = pneg %p2401_p9  ;;  %p2408_p1 = por %p2407_p13, %p2406_p11 }
  0x6e   : > { %p2409_p4 = pnand %p2408_p1, %p2402_p10 }
  0x70   : > { %2412 = shalt.err (!%p2409_p4)
}
  0x71   : > { %s2413_s3 = scalar_lea.vmem %s3092_s16, 512  ;;  %s2843_s0 = smov [#allocation11]  }
  0x72   : > { %p2414_p2 = scmp.ne.s32.totalorder %s3092_s16, %s2413_s3  ;;  %s2418_s25 = sshll.u32 %s2843_s0, 4  ;;  %s2419_s25 = int_to_ptr.vmem [resolvable:$false] %s2418_s25 }
  0x73   : > { %s2420_s23 = scalar_lea.vmem %s2419_s25, 1024  ;;  %p2421_p9 = scmp.lt.s32.totalorder %s3092_s16, %s2419_s25 }
  0x74   : > { %p2416_p3 = pnand %p2414_p2, %p3049_p12  ;;  %p2422_p5 = scmp.lt.s32.totalorder %s2420_s23, %s2413_s3 }
  0x76   : > { %p2417_p6 = pneg %p2416_p3  ;;  %p2423_p0 = por %p2422_p5, %p2421_p9 }
  0x78   : > { %p2424_p7 = pnand %p2423_p0, %p2417_p6 }
  0x7a   : > { %2427 = shalt.err (!%p2424_p7)
}
  0x7b   : > { %s4253_s20 = smov 8   ;;  %s4254_s18 = smov 128  }
  0x7c   : > { %2261 = dma.hbm_to_vmem [thread:$0]  (!%p3026_p8), %s3089_s29, 512, %s3092_s16, %s4212_s28, %s4254_s18, %s4254_s18, %s4253_s20  }
  0x7d   : > { %s4255_s7 = sld [smem:[#allocation57_spill]]  ;;  %s564_s25 = scalar_lea.vmem [#allocation14], %s3019_s27 }
  0x7e   : > { %s572_s23 = sshll.u32 %s564_s25, 4  ;;  %s4213_s5 = scalar_lea.sflag [#allocation15], %s3031_s19  ;;  %s3128_s23 = int_to_ptr.vmem [resolvable:$true] %s572_s23 }
  0x83   : > { %s3125_s3 = scalar_lea.hbm %s4255_s7, %s3022_s21  ;;  %s2433_s24 = scalar_lea.hbm %s4255_s7, 1024 }
  0x84   : > { %s2428_s15 = scalar_lea.hbm %s3125_s3, 512  ;;  %p2434_p13 = scmp.lt.u32.totalorder %s3125_s3, %s4255_s7 }
  0x85   : > { %p2429_p5 = scmp.ne.s32.totalorder %s3125_s3, %s2428_s15  ;;  %p2435_p1 = scmp.lt.u32.totalorder %s2433_s24, %s2428_s15 }
  0x86   : > { %p2437_p2 = scmp.lt.u32.totalorder %s2428_s15, %s3125_s3 }
  0x87   : > { %p2431_p10 = pnand %p2429_p5, %p3049_p12  ;;  %p2436_p4 = por %p2435_p1, %p2434_p13 }
  0x89   : > { %p2432_p11 = pneg %p2431_p10  ;;  %p2438_p3 = por %p2437_p2, %p2436_p4 }
  0x8b   : > { %p2439_p6 = pnand %p2438_p3, %p2432_p11 }
  0x8d   : > { %2442 = shalt.err (!%p2439_p6)
}
  0x8e   : > { %s2443_s25 = scalar_lea.vmem %s3128_s23, 512  ;;  %s2844_s16 = smov [#allocation14]  }
  0x8f   : > { %p2444_p9 = scmp.ne.s32.totalorder %s3128_s23, %s2443_s25  ;;  %s2448_s29 = sshll.u32 %s2844_s16, 4  ;;  %s2449_s29 = int_to_ptr.vmem [resolvable:$false] %s2448_s29 }
  0x90   : > { %s2450_s28 = scalar_lea.vmem %s2449_s29, 1024  ;;  %p2451_p5 = scmp.lt.s32.totalorder %s3128_s23, %s2449_s29 }
  0x91   : > { %p2446_p0 = pnand %p2444_p9, %p3049_p12  ;;  %p2452_p10 = scmp.lt.s32.totalorder %s2450_s28, %s2443_s25 }
  0x93   : > { %p2447_p7 = pneg %p2446_p0  ;;  %p2453_p13 = por %p2452_p10, %p2451_p5 }
  0x95   : > { %p2454_p1 = pnand %p2453_p13, %p2447_p7 }
  0x97   : > { %2457 = shalt.err (!%p2454_p1)
}
  0x98   : > { %2267 = dma.hbm_to_vmem [thread:$0]  (!%p3026_p8), %s3125_s3, 512, %s3128_s23, %s4213_s5, %s4254_s18, %s4254_s18, %s4253_s20  }
  0x99   : > { %s4256_s9 = sld [smem:[#allocation59_spill]]  ;;  %s608_s25 = scalar_lea.vmem [#allocation17], %s3019_s27 }
  0x9a   : > { %s616_s16 = sshll.u32 %s608_s25, 4  ;;  %s4214_s29 = scalar_lea.sflag [#allocation18], %s3031_s19  ;;  %s3164_s16 = int_to_ptr.vmem [resolvable:$true] %s616_s16 }
  0x9f   : > { %s3161_s0 = scalar_lea.hbm %s4256_s9, %s3022_s21  ;;  %s2463_s15 = scalar_lea.hbm %s4256_s9, 1024 }
  0xa0   : > { %s2458_s28 = scalar_lea.hbm %s3161_s0, 512  ;;  %p2464_p3 = scmp.lt.u32.totalorder %s3161_s0, %s4256_s9 }
  0xa1   : > { %p2459_p11 = scmp.ne.s32.totalorder %s3161_s0, %s2458_s28  ;;  %p2465_p6 = scmp.lt.u32.totalorder %s2463_s15, %s2458_s28 }
  0xa2   : > { %p2467_p0 = scmp.lt.u32.totalorder %s2458_s28, %s3161_s0 }
  0xa3   : > { %p2461_p4 = pnand %p2459_p11, %p3049_p12  ;;  %p2466_p9 = por %p2465_p6, %p2464_p3 }
  0xa5   : > { %p2462_p2 = pneg %p2461_p4  ;;  %p2468_p7 = por %p2467_p0, %p2466_p9 }
  0xa7   : > { %p2469_p5 = pnand %p2468_p7, %p2462_p2 }
  0xa9   : > { %2472 = shalt.err (!%p2469_p5)
}
  0xaa   : > { %s2473_s25 = scalar_lea.vmem %s3164_s16, 512  ;;  %s2845_s3 = smov [#allocation17]  }
  0xab   : > { %p2474_p10 = scmp.ne.s32.totalorder %s3164_s16, %s2473_s25  ;;  %s2478_s23 = sshll.u32 %s2845_s3, 4  ;;  %s2479_s23 = int_to_ptr.vmem [resolvable:$false] %s2478_s23 }
  0xac   : > { %s2480_s5 = scalar_lea.vmem %s2479_s23, 1024  ;;  %p2481_p11 = scmp.lt.s32.totalorder %s3164_s16, %s2479_s23 }
  0xad   : > { %p2476_p13 = pnand %p2474_p10, %p3049_p12  ;;  %p2482_p4 = scmp.lt.s32.totalorder %s2480_s5, %s2473_s25 }
  0xaf   : > { %p2477_p1 = pneg %p2476_p13  ;;  %p2483_p3 = por %p2482_p4, %p2481_p11 }
  0xb1   : > { %p2484_p6 = pnand %p2483_p3, %p2477_p1 }
  0xb3   : > { %2487 = shalt.err (!%p2484_p6)
}
  0xb4   : > { %2273 = dma.hbm_to_vmem [thread:$0]  (!%p3026_p8), %s3161_s0, 512, %s3164_s16, %s4214_s29, %s4254_s18, %s4254_s18, %s4253_s20  }
  0xb5   : > { %s4257_s11 = sld [smem:[#allocation60_spill]]  ;;  %s652_s25 = scalar_lea.vmem [#allocation20], %s3019_s27 }
  0xb6   : > { %s660_s3 = sshll.u32 %s652_s25, 4  ;;  %s4215_s23 = scalar_lea.sflag [#allocation21], %s3031_s19  ;;  %s3200_s3 = int_to_ptr.vmem [resolvable:$true] %s660_s3 }
  0xbb   : > { %s3197_s24 = scalar_lea.hbm %s4257_s11, %s3022_s21  ;;  %s2493_s28 = scalar_lea.hbm %s4257_s11, 1024 }
  0xbc   : > { %s2488_s5 = scalar_lea.hbm %s3197_s24, 512  ;;  %p2494_p7 = scmp.lt.u32.totalorder %s3197_s24, %s4257_s11 }
  0xbd   : > { %p2489_p2 = scmp.ne.s32.totalorder %s3197_s24, %s2488_s5  ;;  %p2495_p5 = scmp.lt.u32.totalorder %s2493_s28, %s2488_s5 }
  0xbe   : > { %p2497_p13 = scmp.lt.u32.totalorder %s2488_s5, %s3197_s24 }
  0xbf   : > { %p2491_p9 = pnand %p2489_p2, %p3049_p12  ;;  %p2496_p10 = por %p2495_p5, %p2494_p7 }
  0xc1   : > { %p2492_p0 = pneg %p2491_p9  ;;  %p2498_p1 = por %p2497_p13, %p2496_p10 }
  0xc3   : > { %p2499_p11 = pnand %p2498_p1, %p2492_p0 }
  0xc5   : > { %2502 = shalt.err (!%p2499_p11)
}
  0xc6   : > { %s2503_s25 = scalar_lea.vmem %s3200_s3, 512  ;;  %s2846_s0 = smov [#allocation20]  }
  0xc7   : > { %p2504_p4 = scmp.ne.s32.totalorder %s3200_s3, %s2503_s25  ;;  %s2508_s16 = sshll.u32 %s2846_s0, 4  ;;  %s2509_s16 = int_to_ptr.vmem [resolvable:$false] %s2508_s16 }
  0xc8   : > { %s2510_s29 = scalar_lea.vmem %s2509_s16, 1024  ;;  %p2511_p2 = scmp.lt.s32.totalorder %s3200_s3, %s2509_s16 }
  0xc9   : > { %p2506_p3 = pnand %p2504_p4, %p3049_p12  ;;  %p2512_p9 = scmp.lt.s32.totalorder %s2510_s29, %s2503_s25 }
  0xcb   : > { %p2507_p6 = pneg %p2506_p3  ;;  %p2513_p7 = por %p2512_p9, %p2511_p2 }
  0xcd   : > { %p2514_p5 = pnand %p2513_p7, %p2507_p6 }
  0xcf   : > { %2517 = shalt.err (!%p2514_p5)
}
  0xd0   : > { %2279 = dma.hbm_to_vmem [thread:$0]  (!%p3026_p8), %s3197_s24, 512, %s3200_s3, %s4215_s23, %s4254_s18, %s4254_s18, %s4253_s20  }
  0xd1   : > { %s4258_s2 = sld [smem:[#allocation52_spill]]  ;;  %s454_s25 = scalar_lea.vmem [#allocation5], %s3019_s27 }
  0xd2   : > { %s462_s0 = sshll.u32 %s454_s25, 4  ;;  %s4259_s4 = sld [smem:[#allocation54_spill]]  ;;  %s3236_s0 = int_to_ptr.vmem [resolvable:$true] %s462_s0 }
  0xd3   : > { %s451_s9 = scalar_lea.sflag [#allocation6], %s3016_s26 }
  0xd7   : > { %s3233_s15 = scalar_lea.hbm %s4258_s2, %s3022_s21  ;;  %s2523_s28 = scalar_lea.hbm %s4258_s2, 1024 }
  0xd8   : > { %s3242_s7 = scalar_lea.hbm %s4259_s4, %s3022_s21  ;;  %s2518_s24 = scalar_lea.hbm %s3233_s15, 512 }
  0xd9   : > { %p2519_p0 = scmp.ne.s32.totalorder %s3233_s15, %s2518_s24  ;;  %p2524_p1 = scmp.lt.u32.totalorder %s3233_s15, %s4258_s2 }
  0xda   : > { %p2525_p11 = scmp.lt.u32.totalorder %s2523_s28, %s2518_s24  ;;  %p2527_p3 = scmp.lt.u32.totalorder %s2518_s24, %s3233_s15 }
  0xdb   : > { %p2521_p10 = pnand %p2519_p0, %p3049_p12 }
  0xdc   : > { %p2526_p4 = por %p2525_p11, %p2524_p1 }
  0xdd   : > { %p2522_p13 = pneg %p2521_p10 }
  0xde   : > { %p2528_p6 = por %p2527_p3, %p2526_p4 }
  0xe0   : > { %p2529_p2 = pnand %p2528_p6, %p2522_p13 }
  0xe2   : > { %2532 = shalt.err (!%p2529_p2)
}
  0xe3   : > { %s2533_s25 = scalar_lea.vmem %s3236_s0, 512  ;;  %s2847_s16 = smov [#allocation5]  }
  0xe4   : > { %p2534_p9 = scmp.ne.s32.totalorder %s3236_s0, %s2533_s25  ;;  %s2538_s29 = sshll.u32 %s2847_s16, 4  ;;  %s2539_s29 = int_to_ptr.vmem [resolvable:$false] %s2538_s29 }
  0xe5   : > { %s2540_s11 = scalar_lea.vmem %s2539_s29, 1024  ;;  %p2541_p0 = scmp.lt.s32.totalorder %s3236_s0, %s2539_s29 }
  0xe6   : > { %p2536_p7 = pnand %p2534_p9, %p3049_p12  ;;  %p2542_p10 = scmp.lt.s32.totalorder %s2540_s11, %s2533_s25 }
  0xe8   : > { %p2537_p5 = pneg %p2536_p7  ;;  %p2543_p1 = por %p2542_p10, %p2541_p0 }
  0xea   : > { %p2544_p11 = pnand %p2543_p1, %p2537_p5 }
  0xec   : > { %2547 = shalt.err (!%p2544_p11)
}
  0xed   : > { %2252 = dma.hbm_to_vmem [thread:$0]  (!%p3026_p8), %s3233_s15, 512, %s3236_s0, %s451_s9, %s4254_s18, %s4254_s18, %s4253_s20  }
  0xee   : > { %s498_s23 = scalar_lea.vmem [#allocation10], %s3019_s27  ;;  %s4260_s6 = sld [smem:[#allocation56_spill]] }
  0xef   : > { %s506_s24 = sshll.u32 %s498_s23, 4  ;;  %s2548_s25 = scalar_lea.hbm %s3242_s7, 512  ;;  %s3272_s24 = int_to_ptr.vmem [resolvable:$true] %s506_s24 }
  0xf0   : > { %p2549_p13 = scmp.ne.s32.totalorder %s3242_s7, %s2548_s25  ;;  %s2553_s11 = scalar_lea.hbm %s4259_s4, 1024 }
  0xf1   : > { %p2554_p6 = scmp.lt.u32.totalorder %s3242_s7, %s4259_s4  ;;  %p2555_p2 = scmp.lt.u32.totalorder %s2553_s11, %s2548_s25 }
  0xf2   : > { %p2551_p4 = pnand %p2549_p13, %p3049_p12  ;;  %p2557_p7 = scmp.lt.u32.totalorder %s2548_s25, %s3242_s7 }
  0xf3   : > { %p2556_p9 = por %p2555_p2, %p2554_p6 }
  0xf4   : > { %s3278_s28 = scalar_lea.hbm %s4260_s6, %s3022_s21  ;;  %p2552_p3 = pneg %p2551_p4 }
  0xf5   : > { %p2558_p5 = por %p2557_p7, %p2556_p9 }
  0xf7   : > { %p2559_p0 = pnand %p2558_p5, %p2552_p3 }
  0xf9   : > { %2562 = shalt.err (!%p2559_p0)
}
  0xfa   : > { %s2563_s15 = scalar_lea.vmem %s3272_s24, 512  ;;  %s2848_s0 = smov [#allocation10]  }
  0xfb   : > { %p2564_p10 = scmp.ne.s32.totalorder %s3272_s24, %s2563_s15  ;;  %s2568_s23 = sshll.u32 %s2848_s0, 4  ;;  %s2569_s23 = int_to_ptr.vmem [resolvable:$false] %s2568_s23 }
  0xfc   : > { %s2570_s2 = scalar_lea.vmem %s2569_s23, 1024  ;;  %p2571_p13 = scmp.lt.s32.totalorder %s3272_s24, %s2569_s23 }
  0xfd   : > { %p2566_p1 = pnand %p2564_p10, %p3049_p12  ;;  %p2572_p4 = scmp.lt.s32.totalorder %s2570_s2, %s2563_s15 }
  0xff   : > { %p2567_p11 = pneg %p2566_p1  ;;  %p2573_p6 = por %p2572_p4, %p2571_p13 }
 0x101   : > { %p2574_p2 = pnand %p2573_p6, %p2567_p11 }
 0x103   : > { %2577 = shalt.err (!%p2574_p2)
}
 0x104   : > { %s4261_s3 = scalar_lea.sflag [#allocation9], %s3031_s19  ;;  %s542_s5 = scalar_lea.vmem [#allocation13], %s3019_s27 }
 0x105   : > { %2258 = dma.hbm_to_vmem [thread:$0]  (!%p3026_p8), %s3242_s7, 512, %s3272_s24, %s4261_s3, %s4254_s18, %s4254_s18, %s4253_s20  }
 0x106   : > { %s550_s25 = sshll.u32 %s542_s5, 4  ;;  %s4262_s8 = sld [smem:[#allocation58_spill]]  ;;  %s3307_s25 = int_to_ptr.vmem [resolvable:$true] %s550_s25 }
 0x107   : > { %s2578_s9 = scalar_lea.hbm %s3278_s28, 512  ;;  %s2583_s23 = scalar_lea.hbm %s4260_s6, 1024 }
 0x108   : > { %p2579_p3 = scmp.ne.s32.totalorder %s3278_s28, %s2578_s9  ;;  %p2584_p5 = scmp.lt.u32.totalorder %s3278_s28, %s4260_s6 }
 0x109   : > { %p2585_p0 = scmp.lt.u32.totalorder %s2583_s23, %s2578_s9  ;;  %p2587_p1 = scmp.lt.u32.totalorder %s2578_s9, %s3278_s28 }
 0x10a   : > { %p2581_p9 = pnand %p2579_p3, %p3049_p12 }
 0x10b   : > { %p2586_p10 = por %p2585_p0, %p2584_p5 }
 0x10c   : > { %s3313_s11 = scalar_lea.hbm %s4262_s8, %s3022_s21  ;;  %p2582_p7 = pneg %p2581_p9 }
 0x10d   : > { %p2588_p11 = por %p2587_p1, %p2586_p10 }
 0x10f   : > { %p2589_p13 = pnand %p2588_p11, %p2582_p7 }
 0x111   : > { %2592 = shalt.err (!%p2589_p13)
}
 0x112   : > { %s2593_s24 = scalar_lea.vmem %s3307_s25, 512  ;;  %s2849_s3 = smov [#allocation13]  }
 0x113   : > { %p2594_p4 = scmp.ne.s32.totalorder %s3307_s25, %s2593_s24  ;;  %s2598_s5 = sshll.u32 %s2849_s3, 4  ;;  %s2599_s5 = int_to_ptr.vmem [resolvable:$false] %s2598_s5 }
 0x114   : > { %s2600_s16 = scalar_lea.vmem %s2599_s5, 1024  ;;  %p2601_p3 = scmp.lt.s32.totalorder %s3307_s25, %s2599_s5 }
 0x115   : > { %p2596_p6 = pnand %p2594_p4, %p3049_p12  ;;  %p2602_p9 = scmp.lt.s32.totalorder %s2600_s16, %s2593_s24 }
 0x117   : > { %p2597_p2 = pneg %p2596_p6  ;;  %p2603_p5 = por %p2602_p9, %p2601_p3 }
 0x119   : > { %p2604_p0 = pnand %p2603_p5, %p2597_p2 }
 0x11b   : > { %2607 = shalt.err (!%p2604_p0)
}
 0x11c   : > { %s4263_s29 = scalar_lea.sflag [#allocation12], %s3031_s19  ;;  %s586_s9 = scalar_lea.vmem [#allocation16], %s3019_s27 }
 0x11d   : > { %2264 = dma.hbm_to_vmem [thread:$0]  (!%p3026_p8), %s3278_s28, 512, %s3307_s25, %s4263_s29, %s4254_s18, %s4254_s18, %s4253_s20  }
 0x11e   : > { %s594_s15 = sshll.u32 %s586_s9, 4  ;;  %s3348_s2 = scalar_lea.hbm %s4189_s10, %s3022_s21  ;;  %s3342_s15 = int_to_ptr.vmem [resolvable:$true] %s594_s15 }
 0x11f   : > { %s2608_s7 = scalar_lea.hbm %s3313_s11, 512  ;;  %s2613_s5 = scalar_lea.hbm %s4262_s8, 1024 }
 0x120   : > { %p2609_p7 = scmp.ne.s32.totalorder %s3313_s11, %s2608_s7  ;;  %p2614_p11 = scmp.lt.u32.totalorder %s3313_s11, %s4262_s8 }
 0x121   : > { %p2615_p13 = scmp.lt.u32.totalorder %s2613_s5, %s2608_s7  ;;  %p2617_p6 = scmp.lt.u32.totalorder %s2608_s7, %s3313_s11 }
 0x122   : > { %p2611_p10 = pnand %p2609_p7, %p3049_p12 }
 0x123   : > { %p2616_p4 = por %p2615_p13, %p2614_p11 }
 0x124   : > { %p2612_p1 = pneg %p2611_p10 }
 0x125   : > { %p2618_p2 = por %p2617_p6, %p2616_p4 }
 0x127   : > { %p2619_p3 = pnand %p2618_p2, %p2612_p1 }
 0x129   : > { %2622 = shalt.err (!%p2619_p3)
}
 0x12a   : > { %s2623_s25 = scalar_lea.vmem %s3342_s15, 512  ;;  %s2850_s29 = smov [#allocation16]  }
 0x12b   : > { %p2624_p9 = scmp.ne.s32.totalorder %s3342_s15, %s2623_s25  ;;  %s2628_s9 = sshll.u32 %s2850_s29, 4  ;;  %s2629_s9 = int_to_ptr.vmem [resolvable:$false] %s2628_s9 }
 0x12c   : > { %s2630_s0 = scalar_lea.vmem %s2629_s9, 1024  ;;  %p2631_p7 = scmp.lt.s32.totalorder %s3342_s15, %s2629_s9 }
 0x12d   : > { %p2626_p5 = pnand %p2624_p9, %p3049_p12  ;;  %p2632_p10 = scmp.lt.s32.totalorder %s2630_s0, %s2623_s25 }
 0x12f   : > { %p2627_p0 = pneg %p2626_p5  ;;  %p2633_p11 = por %p2632_p10, %p2631_p7 }
 0x131   : > { %p2634_p13 = pnand %p2633_p11, %p2627_p0 }
 0x133   : > { %2637 = shalt.err (!%p2634_p13)
}
 0x134   : > { %s4264_s23 = scalar_lea.sflag [#allocation15], %s3031_s19  ;;  %s630_s7 = scalar_lea.vmem [#allocation19], %s3019_s27 }
 0x135   : > { %2270 = dma.hbm_to_vmem [thread:$0]  (!%p3026_p8), %s3313_s11, 512, %s3342_s15, %s4264_s23, %s4254_s18, %s4254_s18, %s4253_s20  }
 0x136   : > { %s638_s24 = sshll.u32 %s630_s7, 4  ;;  %s3383_s16 = scalar_lea.hbm %s4191_s12, %s3022_s21  ;;  %s3377_s24 = int_to_ptr.vmem [resolvable:$true] %s638_s24 }
 0x137   : > { %s2638_s28 = scalar_lea.hbm %s3348_s2, 512  ;;  %s2643_s9 = scalar_lea.hbm %s4189_s10, 1024 }
 0x138   : > { %p2639_p1 = scmp.ne.s32.totalorder %s3348_s2, %s2638_s28  ;;  %p2644_p2 = scmp.lt.u32.totalorder %s3348_s2, %s4189_s10 }
 0x139   : > { %p2645_p3 = scmp.lt.u32.totalorder %s2643_s9, %s2638_s28  ;;  %p2647_p5 = scmp.lt.u32.totalorder %s2638_s28, %s3348_s2 }
 0x13a   : > { %p2641_p4 = pnand %p2639_p1, %p3049_p12 }
 0x13b   : > { %p2646_p9 = por %p2645_p3, %p2644_p2 }
 0x13c   : > { %p2642_p6 = pneg %p2641_p4 }
 0x13d   : > { %p2648_p0 = por %p2647_p5, %p2646_p9 }
 0x13f   : > { %p2649_p7 = pnand %p2648_p0, %p2642_p6 }
 0x141   : > { %2652 = shalt.err (!%p2649_p7)
}
 0x142   : > { %s2653_s15 = scalar_lea.vmem %s3377_s24, 512  ;;  %s2851_s23 = smov [#allocation19]  }
 0x143   : > { %p2654_p10 = scmp.ne.s32.totalorder %s3377_s24, %s2653_s15  ;;  %s2658_s7 = sshll.u32 %s2851_s23, 4  ;;  %s2659_s7 = int_to_ptr.vmem [resolvable:$false] %s2658_s7 }
 0x144   : > { %s2660_s3 = scalar_lea.vmem %s2659_s7, 1024  ;;  %p2661_p1 = scmp.lt.s32.totalorder %s3377_s24, %s2659_s7 }
 0x145   : > { %p2656_p11 = pnand %p2654_p10, %p3049_p12  ;;  %p2662_p4 = scmp.lt.s32.totalorder %s2660_s3, %s2653_s15 }
 0x147   : > { %p2657_p13 = pneg %p2656_p11  ;;  %p2663_p2 = por %p2662_p4, %p2661_p1 }
 0x149   : > { %p2664_p3 = pnand %p2663_p2, %p2657_p13 }
 0x14b   : > { %2667 = shalt.err (!%p2664_p3)
}
 0x14c   : > { %s4265_s5 = scalar_lea.sflag [#allocation18], %s3031_s19  ;;  %s674_s28 = scalar_lea.vmem [#allocation22], %s3019_s27 }
 0x14d   : > { %2276 = dma.hbm_to_vmem [thread:$0]  (!%p3026_p8), %s3348_s2, 512, %s3377_s24, %s4265_s5, %s4254_s18, %s4254_s18, %s4253_s20  }
 0x14e   : > { %s682_s25 = sshll.u32 %s674_s28, 4  ;;  %s2668_s29 = scalar_lea.hbm %s3383_s16, 512  ;;  %s3412_s25 = int_to_ptr.vmem [resolvable:$true] %s682_s25 }
 0x14f   : > { %p2669_p6 = scmp.ne.s32.totalorder %s3383_s16, %s2668_s29  ;;  %s2673_s11 = scalar_lea.hbm %s4191_s12, 1024 }
 0x150   : > { %p2674_p0 = scmp.lt.u32.totalorder %s3383_s16, %s4191_s12  ;;  %p2675_p7 = scmp.lt.u32.totalorder %s2673_s11, %s2668_s29 }
 0x151   : > { %p2671_p9 = pnand %p2669_p6, %p3049_p12  ;;  %p2677_p11 = scmp.lt.u32.totalorder %s2668_s29, %s3383_s16 }
 0x152   : > { %p2676_p10 = por %p2675_p7, %p2674_p0 }
 0x153   : > { %p2672_p5 = pneg %p2671_p9 }
 0x154   : > { %p2678_p13 = por %p2677_p11, %p2676_p10 }
 0x156   : > { %p2679_p1 = pnand %p2678_p13, %p2672_p5 }
 0x158   : > { %2682 = shalt.err (!%p2679_p1)
}
 0x159   : > { %s2683_s2 = scalar_lea.vmem %s3412_s25, 512  ;;  %s2852_s24 = smov [#allocation22]  }
 0x15a   : > { %p2684_p4 = scmp.ne.s32.totalorder %s3412_s25, %s2683_s2  ;;  %s2688_s7 = sshll.u32 %s2852_s24, 4  ;;  %s2689_s7 = int_to_ptr.vmem [resolvable:$false] %s2688_s7 }
 0x15b   : > { %s2690_s3 = scalar_lea.vmem %s2689_s7, 1024  ;;  %p2691_p6 = scmp.lt.s32.totalorder %s3412_s25, %s2689_s7 }
 0x15c   : > { %p2686_p2 = pnand %p2684_p4, %p3049_p12  ;;  %p2692_p9 = scmp.lt.s32.totalorder %s2690_s3, %s2683_s2 }
 0x15e   : > { %p2687_p3 = pneg %p2686_p2  ;;  %p2693_p0 = por %p2692_p9, %p2691_p6 }
 0x160   : > { %p2694_p7 = pnand %p2693_p0, %p2687_p3 }
 0x162   : > { %2697 = shalt.err (!%p2694_p7)
}
 0x163   : > { %s4266_s5 = scalar_lea.sflag [#allocation21], %s3031_s19  ;;  %s3444_s9 = scalar_lea.hbm %s4192_s13, %s3022_s21 }
 0x164   : > { %2282 = dma.hbm_to_vmem [thread:$0]  (!%p3026_p8), %s3383_s16, 512, %s3412_s25, %s4266_s5, %s4254_s18, %s4254_s18, %s4253_s20  }
 0x165   : > { %s696_s0 = scalar_lea.vmem [#allocation23], %s3019_s27  ;;  %s693_s19 = scalar_lea.sflag [#allocation24], %s3016_s26 }
 0x166   : > { %s704_s11 = sshll.u32 %s696_s0, 4  ;;  %s2698_s15 = scalar_lea.hbm %s3444_s9, 512  ;;  %s3447_s11 = int_to_ptr.vmem [resolvable:$true] %s704_s11 }
 0x167   : > { %p2699_p5 = scmp.ne.s32.totalorder %s3444_s9, %s2698_s15  ;;  %s2703_s23 = scalar_lea.hbm %s4192_s13, 1024 }
 0x168   : > { %p2704_p13 = scmp.lt.u32.totalorder %s3444_s9, %s4192_s13  ;;  %p2705_p1 = scmp.lt.u32.totalorder %s2703_s23, %s2698_s15 }
 0x169   : > { %p2701_p10 = pnand %p2699_p5, %p3049_p12  ;;  %p2707_p2 = scmp.lt.u32.totalorder %s2698_s15, %s3444_s9 }
 0x16a   : > { %p2706_p4 = por %p2705_p1, %p2704_p13 }
 0x16b   : > { %p2702_p11 = pneg %p2701_p10 }
 0x16c   : > { %p2708_p3 = por %p2707_p2, %p2706_p4 }
 0x16e   : > { %p2709_p6 = pnand %p2708_p3, %p2702_p11 }
 0x170   : > { %2712 = shalt.err (!%p2709_p6)
}
 0x171   : > { %s2713_s27 = scalar_lea.vmem %s3447_s11, 512  ;;  %s2853_s24 = smov [#allocation23]  }
 0x172   : > { %p2714_p9 = scmp.ne.s32.totalorder %s3447_s11, %s2713_s27  ;;  %s2718_s7 = sshll.u32 %s2853_s24, 4  ;;  %s2719_s7 = int_to_ptr.vmem [resolvable:$false] %s2718_s7 }
 0x173   : > { %s2720_s3 = scalar_lea.vmem %s2719_s7, 1024  ;;  %p2721_p5 = scmp.lt.s32.totalorder %s3447_s11, %s2719_s7 }
 0x174   : > { %p2716_p0 = pnand %p2714_p9, %p3049_p12  ;;  %p2722_p10 = scmp.lt.s32.totalorder %s2720_s3, %s2713_s27 }
 0x176   : > { %p2717_p7 = pneg %p2716_p0  ;;  %p2723_p13 = por %p2722_p10, %p2721_p5 }
 0x178   : > { %p2724_p1 = pnand %p2723_p13, %p2717_p7 }
 0x17a   : > { %2727 = shalt.err (!%p2724_p1)
}
 0x17b   : > { %2285 = dma.hbm_to_vmem [thread:$0]  (!%p3026_p8), %s3444_s9, 512, %s3447_s11, %s693_s19, %s4254_s18, %s4254_s18, %s4253_s20  }
 0x17c   : > { %p4267_p12 = scmp.ne.s32.totalorder %s4251_s30, 0 }
 0x17e   : > { %716 = sbr.rel (%p4267_p12) target bundleno = 582 (0x246), region = 68 }
 0x185   : > { %s3479_s14 = sand.u32 1, %s2820_s1   ;;  %p4268_p11 = scmp.ne.s32.totalorder %s4239_s22, 0 }
 0x186   : > { %s3482_s5 = sshll.u32 %s3479_s14, 5  ;;  %s719_s17 = scalar_lea.sflag [#allocation6], %s3479_s14 }
 0x187   : > { %s3486_s28 = scalar_lea.vmem [#allocation5], %s3482_s5 }
 0x188   : > { %2783 = dma.done.wait (%p4268_p11), %s719_s17, 512  }
 0x189   : > { %2785 = vsyncadd (%p4268_p11), %s719_s17, 4294966784  ;;  %s4269_s26 = sld [smem:[#allocation40_spill]]  ;;  %s3494_s18 = scalar_lea.vmem [#allocation8], %s3482_s5 }
 0x18f   : > { %s727_s30 = sand.u32 1, %s4269_s26  }
 0x190   : > { %s728_s20 = scalar_lea.sflag [#allocation9], %s727_s30 }
 0x191   : > { %2787 = dma.done.wait (%p4268_p11), %s728_s20, 1024  }
 0x192   : > { %2789 = vsyncadd (%p4268_p11), %s728_s20, 4294966272  ;;  %s3501_s29 = scalar_lea.vmem [#allocation10], %s3482_s5  ;;  %s746_s9 = scalar_lea.sflag [#allocation12], %s727_s30 }
 0x193   : > { %s3504_s0 = scalar_lea.vmem [#allocation11], %s3482_s5 }
 0x194   : > { %2791 = dma.done.wait (%p4268_p11), %s746_s9, 1024  }
 0x195   : > { %2793 = vsyncadd (%p4268_p11), %s746_s9, 4294966272  ;;  %s3511_s11 = scalar_lea.vmem [#allocation13], %s3482_s5  ;;  %s764_s19 = scalar_lea.sflag [#allocation15], %s727_s30 }
 0x196   : > { %s3514_s15 = scalar_lea.vmem [#allocation14], %s3482_s5 }
 0x197   : > { %2795 = dma.done.wait (%p4268_p11), %s764_s19, 1024  }
 0x198   : > { %2797 = vsyncadd (%p4268_p11), %s764_s19, 4294966272  ;;  %s3521_s16 = scalar_lea.vmem [#allocation16], %s3482_s5  ;;  %s782_s25 = scalar_lea.sflag [#allocation18], %s727_s30 }
 0x199   : > { %s3524_s23 = scalar_lea.vmem [#allocation17], %s3482_s5 }
 0x19a   : > { %2799 = dma.done.wait (%p4268_p11), %s782_s25, 1024  }
 0x19b   : > { %2801 = vsyncadd (%p4268_p11), %s782_s25, 4294966272  ;;  %s3531_s21 = scalar_lea.vmem [#allocation19], %s3482_s5  ;;  %s800_s2 = scalar_lea.sflag [#allocation21], %s727_s30 }
 0x19c   : > { %s3534_s27 = scalar_lea.vmem [#allocation20], %s3482_s5 }
 0x19d   : > { %2803 = dma.done.wait (%p4268_p11), %s800_s2, 1024  }
 0x19e   : > { %2805 = vsyncadd (%p4268_p11), %s800_s2, 4294966272  ;;  %s3541_s24 = scalar_lea.vmem [#allocation22], %s3482_s5  ;;  %s818_s7 = scalar_lea.sflag [#allocation24], %s3479_s14 }
 0x19f   : > { %s3545_s3 = scalar_lea.vmem [#allocation23], %s3482_s5 }
 0x1a0   : > { %2807 = dma.done.wait (%p4268_p11), %s818_s7, 512  }
 0x1a1   : > { %2809 = vsyncadd (%p4268_p11), %s818_s7, 4294966784  ;;  %v937_v0 = vlaneseq  ;;  %s917_s17 = sld [smem:[#allocation3]]  ;;  %s2104_s5 = sld [smem:[#allocation3 + $0x1]]  ;;  %v943_v4 = vld [vmem:[%s3486_s28] sm:$0xff]  ;;  %v2122_v5 = vld [vmem:[%s3486_s28 + $0x8] sm:$0xff] }
 0x1a2   : > { %s2107_s26 = sld [smem:[#allocation3 + $0x80]]  ;;  %s2108_s19 = sld [smem:[#allocation3 + $0x81]]  ;;  %v2123_v6 = vld [vmem:[%s3486_s28 + $0x10] sm:$0xff]  ;;  %v3574_v9 = vld [vmem:[%s3486_s28 + $0x18] sm:$0xff]  ;;  %v1034_v60 = vld [vmem:[%s3494_s18] sm:$0xff] }
 0x1a3   : > { %s2111_s30 = sld [smem:[#allocation3 + $0x100]]  ;;  %v938_v1 = vshrl.u32 %v937_v0, 7  ;;  %s3555_s25 = sld [smem:[#allocation3 + $0x101]] }
 0x1a4   : > { %s3551_s20 = sld [smem:[#allocation3 + $0x180]]  ;;  %s3557_s22 = sld [smem:[#allocation3 + $0x181]] }
 0x1a5   : > { %s933_s9 = sld [smem:[#allocation4]]  ;;  %v3553_v2 = vmul.u32 12, %v938_v1  ;;  %s3561_s2 = sld [smem:[#allocation4 + $0x1]] }
 0x1a6   : > { %s3563_s7 = sld [smem:[#allocation3 + $0x2]] }
 0x1a7   : > { %vm954_vm0 = vcmp.lt.s32.totalorder %v3553_v2, 11  ;;  %v2125_v3 = vadd.s32 4294967212, %v3553_v2  ;;  %v3569_v8 = vstv %s917_s17  ;;  %s3571_s4 = sld [smem:[#allocation3 + $0x82]]  ;;  %s2106_s17 = sld [smem:[#allocation3 + $0x3]]  ;;  %v3592_v19 = vstv %s2104_s5 }
 0x1a8   : > { %v955_v7 = vsel %vm954_vm0, %v3553_v2, 11  ;;  %v965_v10 = vmul.f32 %v3569_v8, %v943_v4  ;;  %v3577_v11 = vstv %s2107_s26  ;;  %s3581_s6 = sld [smem:[#allocation3 + $0x102]]  ;;  %v3594_v20 = vstv %s2108_s19  ;;  %s2110_s26 = sld [smem:[#allocation3 + $0x83]] }
 0x1a9   : > { %vm957_vm1 = vcmp.gt.s32.totalorder %v2125_v3, 0  ;;  %4270 = vst [vmem:[#allocation45_spill] sm:$0xff] %v3577_v11  ;;  %v3579_v12 = vstv %s2111_s30  ;;  %s3583_s8 = sld [smem:[#allocation3 + $0x182]]  ;;  %v968_v15 = vmul.f32 %v2122_v5, %v3577_v11  ;;  %s2114_s30 = sld [smem:[#allocation3 + $0x103]]  ;;  %v983_v22 = vmul.f32 %v3592_v19, %v943_v4 }
 0x1aa   : > { %4271 = vst [vmem:[#allocation46_spill] sm:$0xff] %v3579_v12  ;;  %v958_v13 = vsel %vm957_vm1, %v2125_v3, 0  ;;  %v971_v16 = vmul.f32 %v2123_v6, %v3579_v12  ;;  %s2120_s28 = sld [smem:[#allocation4 + $0x2]]  ;;  %v3590_v18 = vstv %s3551_s20  ;;  %v986_v23 = vmul.f32 %v2122_v5, %v3594_v20  ;;  %s3603_s20 = sld [smem:[#allocation3 + $0x183]] }
 0x1ab   : > { %v3585_v14 = vstv %s933_s9  ;;  %v959_v17 = vsub.s32 %v955_v7, %v958_v13  ;;  %4272 = vst [vmem:[#allocation47_spill] sm:$0xff] %v3590_v18  ;;  %v974_v21 = vmul.f32 %v3574_v9, %v3590_v18  ;;  %v3601_v24 = vstv %s3555_s25  ;;  %s2121_s9 = sld [smem:[#allocation4 + $0x3]] }
 0x1ac   : > { %v3606_v26 = vstv %s3561_s2  ;;  %v989_v27 = vmul.f32 %v2123_v6, %v3601_v24  ;;  %v3610_v28 = vstv %s3557_s22  ;;  %v3615_v30 = vstv %s3563_s7 }
 0x1ad   : > { %v960_v25 = vadd.s32 1, %v959_v17  ;;  %4273 = vst [vmem:[#allocation48_spill] sm:$0xff] %v3610_v28  ;;  %v992_v29 = vmul.f32 %v3574_v9, %v3610_v28  ;;  %v3618_v31 = vstv %s3571_s4  ;;  %v1041_v32 = vadd.s32 1, %v3553_v2  ;;  %s2221_s4 = smul.u32 384, %s3479_s14 }
 0x1ae   : > { %v1001_v34 = vmul.f32 %v3615_v30, %v943_v4  ;;  %v1004_v35 = vmul.f32 %v2122_v5, %v3618_v31  ;;  %v3624_v36 = vstv %s3581_s6  ;;  %v3632_v40 = vstv %s2106_s17 }
 0x1af   : > { %v961_v33 = vcvt.s32.f32 %v960_v25  ;;  %v1007_v38 = vmul.f32 %v2123_v6, %v3624_v36  ;;  %v3630_v39 = vstv %s3583_s8  ;;  %v1019_v46 = vmul.f32 %v3632_v40, %v943_v4  ;;  %v2129_v4 = vld [vmem:[%s3494_s18 + $0x8] sm:$0xff]  ;;  %s3665_s6 = scalar_lea.vmem [#allocation25], %s2221_s4  ;;  %s4288_s8 = sld [smem:[#allocation37_spill]] }
 0x1b0   : > { %v3626_v37 = vstv %s2120_s28  ;;  %v1010_v44 = vmul.f32 %v3574_v9, %v3630_v39  ;;  %v3642_v47 = vstv %s2110_s26  ;;  %v3644_v48 = vstv %s2114_s30 }
 0x1b1   : > { %v963_v41 = vmul.f32 %v3585_v14, %v961_v33  ;;  %v981_v42 = vmul.f32 %v3606_v26, %v961_v33  ;;  %v999_v43 = vmul.f32 %v3626_v37, %v961_v33  ;;  %v3639_v45 = vstv %s2121_s9 }
 0x1b2   : > { %v1017_v52 = vmul.f32 %v3639_v45, %v961_v33  ;;  %v1022_v53 = vmul.f32 %v2122_v5, %v3642_v47  ;;  %v1025_v54 = vmul.f32 %v2123_v6, %v3644_v48  ;;  %v3651_v55 = vstv %s3603_s20  ;;  %v2130_v5 = vld [vmem:[%s3494_s18 + $0x10] sm:$0xff]  ;;  %v2131_v6 = vld [vmem:[%s3494_s18 + $0x18] sm:$0xff] }
 0x1b3   : > { %v966_v49 = vadd.f32 %v965_v10, %v963_v41  ;;  %v984_v50 = vadd.f32 %v983_v22, %v981_v42  ;;  %v1002_v51 = vadd.f32 %v1001_v34, %v999_v43  ;;  %vm1042_vm2 = vcmp.lt.s32.totalorder %v1041_v32, 11  ;;  %v1090_v41 = vld [vmem:[%s3501_s29] sm:$0xff]  ;;  %v2136_v42 = vld [vmem:[%s3501_s29 + $0x8] sm:$0xff]  ;;  %v2137_v43 = vld [vmem:[%s3501_s29 + $0x10] sm:$0xff] }
 0x1b4   : > { %v1020_v59 = vadd.f32 %v1019_v46, %v1017_v52  ;;  %v1028_v61 = vmul.f32 %v3574_v9, %v3651_v55  ;;  %v2132_v62 = vadd.s32 4294967212, %v1041_v32  ;;  %v1043_v7 = vsel %vm1042_vm2, %v1041_v32, 11 }
 0x1b5   : > { %v969_v56 = vadd.f32 %v968_v15, %v966_v49  ;;  %v987_v57 = vadd.f32 %v986_v23, %v984_v50  ;;  %v1005_v58 = vadd.f32 %v1004_v35, %v1002_v51  ;;  %v1051_v10 = vmul.f32 %v1034_v60, %v3569_v8  ;;  %v2138_v51 = vld [vmem:[%s3501_s29 + $0x18] sm:$0xff]  ;;  %s2222_s18 = smul.u32 6144, %s4288_s8  ;;  %s1666_s29 = sshll.u32 %s3665_s6, 4  ;;  %s4127_s29 = int_to_ptr.vmem [resolvable:$true] %s1666_s29 }
 0x1b6   : > { %v1023_v3 = vadd.f32 %v1022_v53, %v1020_v59  ;;  %vm1045_vm3 = vcmp.gt.s32.totalorder %v2132_v62, 0  ;;  %v1053_v9 = vmul.f32 %v2129_v4, %v3577_v11  ;;  %v3663_v25 = vmul.f32 %v2131_v6, %v3590_v18 }
 0x1b7   : > { %v972_v63 = vadd.f32 %v971_v16, %v969_v56  ;;  %v990_v0 = vadd.f32 %v989_v27, %v987_v57  ;;  %v1008_v1 = vadd.f32 %v1007_v38, %v1005_v58  ;;  %v1046_v23 = vsel %vm1045_vm3, %v2132_v62, 0 }
 0x1b8   : > { %v1026_v22 = vadd.f32 %v1025_v54, %v1023_v3  ;;  %v1055_v16 = vmul.f32 %v2130_v5, %v3579_v12  ;;  %v1047_v27 = vsub.s32 %v1043_v7, %v1046_v23  ;;  %v1063_v32 = vmul.f32 %v2129_v4, %v3594_v20 }
 0x1b9   : > { %v975_v13 = vadd.f32 %v974_v21, %v972_v63  ;;  %v993_v15 = vadd.f32 %v992_v29, %v990_v0  ;;  %v1011_v17 = vadd.f32 %v1010_v44, %v1008_v1  ;;  %v1061_v29 = vmul.f32 %v1034_v60, %v3592_v19 }
 0x1ba   : > { %v1029_v21 = vadd.f32 %v1028_v61, %v1026_v22  ;;  %v1065_v33 = vmul.f32 %v2130_v5, %v3601_v24  ;;  %v1067_v34 = vmul.f32 %v2131_v6, %v3610_v28  ;;  %v1071_v35 = vmul.f32 %v1034_v60, %v3615_v30 }
 0x1bb   : > { %979 = vst [vmem:[%s3665_s6] sm:$0xff] %v975_v13  ;;  %2126 = vst [vmem:[%s3665_s6 + $0x60] sm:$0xff] %v993_v15  ;;  %v1073_v38 = vmul.f32 %v2129_v4, %v3618_v31  ;;  %v1048_v44 = vadd.s32 1, %v1047_v27  ;;  %v1075_v46 = vmul.f32 %v2130_v5, %v3624_v36  ;;  %v1077_v49 = vmul.f32 %v2131_v6, %v3630_v39 }
 0x1bc   : > { %2127 = vst [vmem:[%s3665_s6 + $0xc0] sm:$0xff] %v1011_v17  ;;  %2128 = vst [vmem:[%s3665_s6 + $0x120] sm:$0xff] %v1029_v21  ;;  %v1081_v50 = vmul.f32 %v1034_v60, %v3632_v40  ;;  %v1083_v52 = vmul.f32 %v2129_v4, %v3642_v47  ;;  %v1085_v53 = vmul.f32 %v2130_v5, %v3644_v48  ;;  %v1097_v56 = vadd.s32 2, %v3553_v2 }
 0x1bd   : > { %v1087_v54 = vmul.f32 %v2131_v6, %v3651_v55  ;;  %v1049_v57 = vcvt.s32.f32 %v1048_v44  ;;  %v3689_v58 = vmul.f32 %v1090_v41, %v3569_v8  ;;  %v3692_v59 = vmul.f32 %v2136_v42, %v3577_v11 }
 0x1be   : > { %v3695_v61 = vmul.f32 %v2137_v43, %v3579_v12  ;;  %vm1098_vm4 = vcmp.lt.s32.totalorder %v1097_v56, 11  ;;  %v2139_v60 = vadd.s32 4294967212, %v1097_v56  ;;  %v3698_v62 = vmul.f32 %v2138_v51, %v3590_v18 }
 0x1bf   : > { %v1117_v63 = vmul.f32 %v1090_v41, %v3592_v19  ;;  %v1050_v0 = vmul.f32 %v1049_v57, %v3585_v14  ;;  %v1060_v1 = vmul.f32 %v1049_v57, %v3606_v26  ;;  %v1070_v3 = vmul.f32 %v1049_v57, %v3626_v37 }
 0x1c0   : > { %4274 = vst [vmem:[#allocation49_spill] sm:$0xff] %v3695_v61  ;;  %4275 = vst [vmem:[#allocation50_spill] sm:$0xff] %v3698_v62  ;;  %v1080_v4 = vmul.f32 %v1049_v57, %v3639_v45  ;;  %v1099_v5 = vsel %vm1098_vm4, %v1097_v56, 11  ;;  %vm1101_vm5 = vcmp.gt.s32.totalorder %v2139_v60, 0  ;;  %v3706_v6 = vmul.f32 %v2136_v42, %v3594_v20 }
 0x1c1   : > { %v3709_v7 = vmul.f32 %v2137_v43, %v3601_v24  ;;  %v1052_v13 = vadd.f32 %v1051_v10, %v1050_v0  ;;  %v1062_v15 = vadd.f32 %v1061_v29, %v1060_v1  ;;  %v1072_v17 = vadd.f32 %v1071_v35, %v1070_v3 }
 0x1c2   : > { %v1082_v22 = vadd.f32 %v1081_v50, %v1080_v4  ;;  %v1102_v23 = vsel %vm1101_vm5, %v2139_v60, 0  ;;  %v3712_v21 = vmul.f32 %v2138_v51, %v3610_v28  ;;  %v1127_v27 = vmul.f32 %v1090_v41, %v3615_v30  ;;  %v2144_v4 = vld [vmem:[%s3504_s0 + $0x10] sm:$0xff] }
 0x1c3   : > { %4276 = vst [vmem:[#allocation51_spill] sm:$0xff] %v3709_v7  ;;  %v1129_v44 = vmul.f32 %v2136_v42, %v3618_v31  ;;  %v1054_v56 = vadd.f32 %v1053_v9, %v1052_v13  ;;  %v1064_v57 = vadd.f32 %v1063_v32, %v1062_v15  ;;  %v1074_v62 = vadd.f32 %v1073_v38, %v1072_v17  ;;  %v1146_v38 = vld [vmem:[%s3504_s0] sm:$0xff] }
 0x1c4   : > { %v1084_v61 = vadd.f32 %v1083_v52, %v1082_v22  ;;  %v1103_v7 = vsub.s32 %v1099_v5, %v1102_v23  ;;  %v1131_v10 = vmul.f32 %v2137_v43, %v3624_v36  ;;  %v3718_v29 = vmul.f32 %v2138_v51, %v3630_v39  ;;  %v2143_v52 = vld [vmem:[%s3504_s0 + $0x8] sm:$0xff] }
 0x1c5   : > { %v1137_v35 = vmul.f32 %v1090_v41, %v3632_v40  ;;  %v1056_v50 = vadd.f32 %v1055_v16, %v1054_v56  ;;  %v1066_v60 = vadd.f32 %v1065_v33, %v1064_v57  ;;  %v1076_v0 = vadd.f32 %v1075_v46, %v1074_v62  ;;  %v2145_v62 = vld [vmem:[%s3504_s0 + $0x18] sm:$0xff]  ;;  %s4291_s0 = sld [smem:[#allocation42_spill]] }
 0x1c6   : > { %v1086_v1 = vadd.f32 %v1085_v53, %v1084_v61  ;;  %v1104_v3 = vadd.s32 1, %v1103_v7  ;;  %v1139_v9 = vmul.f32 %v2136_v42, %v3642_v47  ;;  %v1141_v32 = vmul.f32 %v2137_v43, %v3644_v48 }
 0x1c7   : > { %v1153_v5 = vadd.s32 3, %v3553_v2  ;;  %v1058_v16 = vadd.f32 %v3663_v25, %v1056_v50  ;;  %v1068_v33 = vadd.f32 %v1067_v34, %v1066_v60  ;;  %v1078_v41 = vadd.f32 %v1077_v49, %v1076_v0 }
 0x1c8   : > { %v1088_v46 = vadd.f32 %v1087_v54, %v1086_v1  ;;  %v1105_v53 = vcvt.s32.f32 %v1104_v3  ;;  %v1143_v61 = vmul.f32 %v2138_v51, %v3651_v55  ;;  %v3735_v7 = vmul.f32 %v1146_v38, %v3569_v8 }
 0x1c9   : > { %vm1154_vm6 = vcmp.lt.s32.totalorder %v1153_v5, 11  ;;  %v2146_v42 = vadd.s32 4294967212, %v1153_v5  ;;  %1059 = vst [vmem:[%s3665_s6 + $0x8] sm:$0xff] %v1058_v16  ;;  %2133 = vst [vmem:[%s3665_s6 + $0x68] sm:$0xff] %v1068_v33  ;;  %v3738_v13 = vmul.f32 %v2143_v52, %v3577_v11  ;;  %v3741_v25 = vmul.f32 %v2144_v4, %v3579_v12 }
 0x1ca   : > { %2134 = vst [vmem:[%s3665_s6 + $0xc8] sm:$0xff] %v1078_v41  ;;  %2135 = vst [vmem:[%s3665_s6 + $0x128] sm:$0xff] %v1088_v46  ;;  %v1155_v43 = vsel %vm1154_vm6, %v1153_v5, 11  ;;  %v1106_v34 = vmul.f32 %v1105_v53, %v3585_v14  ;;  %v1116_v49 = vmul.f32 %v1105_v53, %v3606_v26  ;;  %v1126_v51 = vmul.f32 %v1105_v53, %v3626_v37  ;;  %v4277_v46 = vld [vmem:[#allocation49_spill] sm:$0xff] }
 0x1cb   : > { %v1136_v54 = vmul.f32 %v1105_v53, %v3639_v45  ;;  %vm1157_vm7 = vcmp.gt.s32.totalorder %v2146_v42, 0  ;;  %v3748_v15 = vmul.f32 %v2145_v62, %v3590_v18  ;;  %v1173_v17 = vmul.f32 %v1146_v38, %v3592_v19  ;;  %p4293_p4 = scmp.ne.s32.totalorder %s4291_s0, 0 }
 0x1cc   : > { %v1175_v22 = vmul.f32 %v2143_v52, %v3594_v20  ;;  %v1108_v23 = vadd.f32 %v3689_v58, %v1106_v34  ;;  %v1118_v56 = vadd.f32 %v1117_v63, %v1116_v49  ;;  %v1128_v57 = vadd.f32 %v1127_v27, %v1126_v51 }
 0x1cd   : > { %v1138_v50 = vadd.f32 %v1137_v35, %v1136_v54  ;;  %v1158_v60 = vsel %vm1157_vm7, %v2146_v42, 0  ;;  %v3754_v0 = vmul.f32 %v2144_v4, %v3601_v24  ;;  %v3757_v1 = vmul.f32 %v2145_v62, %v3610_v28  ;;  %v4278_v42 = vld [vmem:[#allocation51_spill] sm:$0xff] }
 0x1ce   : > { %v1183_v3 = vmul.f32 %v1146_v38, %v3615_v30  ;;  %v1110_v5 = vadd.f32 %v3692_v59, %v1108_v23  ;;  %v1120_v16 = vadd.f32 %v3706_v6, %v1118_v56  ;;  %v1130_v33 = vadd.f32 %v1129_v44, %v1128_v57  ;;  %v4279_v23 = vld [vmem:[#allocation50_spill] sm:$0xff] }
 0x1cf   : > { %v1140_v58 = vadd.f32 %v1139_v9, %v1138_v50  ;;  %v1159_v63 = vsub.s32 %v1155_v43, %v1158_v60  ;;  %v1185_v27 = vmul.f32 %v2143_v52, %v3618_v31  ;;  %v1187_v35 = vmul.f32 %v2144_v4, %v3624_v36  ;;  %v1202_v9 = vld [vmem:[%s3511_s11] sm:$0xff]  ;;  %v2150_v43 = vld [vmem:[%s3511_s11 + $0x8] sm:$0xff] }
 0x1d0   : > { %v3765_v41 = vmul.f32 %v2145_v62, %v3630_v39  ;;  %v1112_v53 = vadd.f32 %v4277_v46, %v1110_v5  ;;  %v1122_v34 = vadd.f32 %v4278_v42, %v1120_v16  ;;  %v1132_v59 = vadd.f32 %v1131_v10, %v1130_v33  ;;  %v2152_v5 = vld [vmem:[%s3511_s11 + $0x18] sm:$0xff] }
 0x1d1   : > { %v1142_v49 = vadd.f32 %v1141_v32, %v1140_v58  ;;  %v1160_v51 = vadd.s32 1, %v1159_v63  ;;  %v1193_v6 = vmul.f32 %v1146_v38, %v3632_v40  ;;  %v1195_v44 = vmul.f32 %v2143_v52, %v3642_v47  ;;  %v2151_v38 = vld [vmem:[%s3511_s11 + $0x10] sm:$0xff] }
 0x1d2   : > { %v1209_v54 = vadd.s32 4, %v3553_v2  ;;  %v1114_v56 = vadd.f32 %v4279_v23, %v1112_v53  ;;  %v1124_v57 = vadd.f32 %v3712_v21, %v1122_v34  ;;  %v1134_v10 = vadd.f32 %v3718_v29, %v1132_v59 }
 0x1d3   : > { %v1144_v32 = vadd.f32 %v1143_v61, %v1142_v49  ;;  %v1161_v50 = vcvt.s32.f32 %v1160_v51  ;;  %v1197_v60 = vmul.f32 %v2144_v4, %v3644_v48  ;;  %v1199_v16 = vmul.f32 %v2145_v62, %v3651_v55 }
 0x1d4   : > { %vm1210_vm8 = vcmp.lt.s32.totalorder %v1209_v54, 11  ;;  %v2153_v52 = vadd.s32 4294967212, %v1209_v54  ;;  %1115 = vst [vmem:[%s3665_s6 + $0x10] sm:$0xff] %v1114_v56  ;;  %2140 = vst [vmem:[%s3665_s6 + $0x70] sm:$0xff] %v1124_v57  ;;  %v1219_v58 = vmul.f32 %v1202_v9, %v3569_v8  ;;  %v3787_v21 = vmul.f32 %v2150_v43, %v3577_v11 }
 0x1d5   : > { %2141 = vst [vmem:[%s3665_s6 + $0xd0] sm:$0xff] %v1134_v10  ;;  %2142 = vst [vmem:[%s3665_s6 + $0x130] sm:$0xff] %v1144_v32  ;;  %v1211_v33 = vsel %vm1210_vm8, %v1209_v54, 11  ;;  %v1162_v29 = vmul.f32 %v1161_v50, %v3585_v14  ;;  %v1172_v4 = vmul.f32 %v1161_v50, %v3606_v26  ;;  %v1182_v61 = vmul.f32 %v1161_v50, %v3626_v37 }
 0x1d6   : > { %v1192_v63 = vmul.f32 %v1161_v50, %v3639_v45  ;;  %vm1213_vm9 = vcmp.gt.s32.totalorder %v2153_v52, 0  ;;  %v3794_v46 = vmul.f32 %v2151_v38, %v3579_v12  ;;  %v3797_v62 = vmul.f32 %v2152_v5, %v3590_v18 }
 0x1d7   : > { %v1229_v53 = vmul.f32 %v1202_v9, %v3592_v19  ;;  %v1164_v42 = vadd.f32 %v3735_v7, %v1162_v29  ;;  %v1174_v34 = vadd.f32 %v1173_v17, %v1172_v4  ;;  %v1184_v59 = vadd.f32 %v1183_v3, %v1182_v61 }
 0x1d8   : > { %4280 = vst [vmem:[#allocation49_spill] sm:$0xff] %v3797_v62  ;;  %v1194_v49 = vadd.f32 %v1193_v6, %v1192_v63  ;;  %v1214_v51 = vsel %vm1213_vm9, %v2153_v52, 0  ;;  %v1231_v54 = vmul.f32 %v2150_v43, %v3594_v20  ;;  %v3803_v23 = vmul.f32 %v2151_v38, %v3601_v24 }
 0x1d9   : > { %v3806_v56 = vmul.f32 %v2152_v5, %v3610_v28  ;;  %v1166_v57 = vadd.f32 %v3738_v13, %v1164_v42  ;;  %v1176_v10 = vadd.f32 %v1175_v22, %v1174_v34  ;;  %v1186_v32 = vadd.f32 %v1185_v27, %v1184_v59  ;;  %v2158_v42 = vld [vmem:[%s3514_s15 + $0x10] sm:$0xff]  ;;  %v2159_v34 = vld [vmem:[%s3514_s15 + $0x18] sm:$0xff] }
 0x1da   : > { %v1196_v50 = vadd.f32 %v1195_v44, %v1194_v49  ;;  %v1215_v62 = vsub.s32 %v1211_v33, %v1214_v51  ;;  %v1239_v7 = vmul.f32 %v1202_v9, %v3615_v30  ;;  %v1241_v17 = vmul.f32 %v2150_v43, %v3618_v31  ;;  %v1258_v44 = vld [vmem:[%s3514_s15] sm:$0xff] }
 0x1db   : > { %v1243_v3 = vmul.f32 %v2151_v38, %v3624_v36  ;;  %v1168_v6 = vadd.f32 %v3741_v25, %v1166_v57  ;;  %v1178_v52 = vadd.f32 %v3754_v0, %v1176_v10  ;;  %v1188_v29 = vadd.f32 %v1187_v35, %v1186_v32 }
 0x1dc   : > { %v1198_v4 = vadd.f32 %v1197_v60, %v1196_v50  ;;  %v1216_v13 = vadd.s32 1, %v1215_v62  ;;  %v1245_v22 = vmul.f32 %v2152_v5, %v3630_v39  ;;  %v1249_v27 = vmul.f32 %v1202_v9, %v3632_v40  ;;  %v2157_v62 = vld [vmem:[%s3514_s15 + $0x8] sm:$0xff] }
 0x1dd   : > { %v1265_v33 = vadd.s32 5, %v3553_v2  ;;  %v1170_v25 = vadd.f32 %v3748_v15, %v1168_v6  ;;  %v1180_v61 = vadd.f32 %v3757_v1, %v1178_v52  ;;  %v1190_v0 = vadd.f32 %v3765_v41, %v1188_v29 }
 0x1de   : > { %v1200_v35 = vadd.f32 %v1199_v16, %v1198_v4  ;;  %v1217_v60 = vcvt.s32.f32 %v1216_v13  ;;  %v1251_v63 = vmul.f32 %v2150_v43, %v3642_v47  ;;  %v1253_v59 = vmul.f32 %v2151_v38, %v3644_v48 }
 0x1df   : > { %vm1266_vm10 = vcmp.lt.s32.totalorder %v1265_v33, 11  ;;  %v2160_v9 = vadd.s32 4294967212, %v1265_v33  ;;  %1171 = vst [vmem:[%s3665_s6 + $0x18] sm:$0xff] %v1170_v25  ;;  %2147 = vst [vmem:[%s3665_s6 + $0x78] sm:$0xff] %v1180_v61  ;;  %v1255_v15 = vmul.f32 %v2152_v5, %v3651_v55  ;;  %v1275_v41 = vmul.f32 %v1258_v44, %v3569_v8 }
 0x1e0   : > { %2148 = vst [vmem:[%s3665_s6 + $0xd8] sm:$0xff] %v1190_v0  ;;  %2149 = vst [vmem:[%s3665_s6 + $0x138] sm:$0xff] %v1200_v35  ;;  %v1267_v1 = vsel %vm1266_vm10, %v1265_v33, 11  ;;  %v1218_v16 = vmul.f32 %v1217_v60, %v3585_v14  ;;  %v1228_v43 = vmul.f32 %v1217_v60, %v3606_v26  ;;  %v1238_v49 = vmul.f32 %v1217_v60, %v3626_v37 }
 0x1e1   : > { %v1248_v51 = vmul.f32 %v1217_v60, %v3639_v45  ;;  %vm1269_vm11 = vcmp.gt.s32.totalorder %v2160_v9, 0  ;;  %v3837_v57 = vmul.f32 %v2157_v62, %v3577_v11  ;;  %v3840_v10 = vmul.f32 %v2158_v42, %v3579_v12 }
 0x1e2   : > { %v3843_v38 = vmul.f32 %v2159_v34, %v3590_v18  ;;  %v1220_v5 = vadd.f32 %v1219_v58, %v1218_v16  ;;  %v1230_v32 = vadd.f32 %v1229_v53, %v1228_v43  ;;  %v1240_v50 = vadd.f32 %v1239_v7, %v1238_v49  ;;  %v1314_v16 = vld [vmem:[%s3521_s16] sm:$0xff]  ;;  %v2164_v43 = vld [vmem:[%s3521_s16 + $0x8] sm:$0xff]  ;;  %v2165_v49 = vld [vmem:[%s3521_s16 + $0x10] sm:$0xff] }
 0x1e3   : > { %v1250_v6 = vadd.f32 %v1249_v27, %v1248_v51  ;;  %v1270_v52 = vsel %vm1269_vm11, %v2160_v9, 0  ;;  %v1285_v29 = vmul.f32 %v1258_v44, %v3592_v19  ;;  %v1287_v4 = vmul.f32 %v2157_v62, %v3594_v20 }
 0x1e4   : > { %v1289_v13 = vmul.f32 %v2158_v42, %v3601_v24  ;;  %v1222_v33 = vadd.f32 %v3787_v21, %v1220_v5  ;;  %v1232_v25 = vadd.f32 %v1231_v54, %v1230_v32  ;;  %v1242_v61 = vadd.f32 %v1241_v17, %v1240_v50 }
 0x1e5   : > { %v1252_v0 = vadd.f32 %v1251_v63, %v1250_v6  ;;  %v1271_v35 = vsub.s32 %v1267_v1, %v1270_v52  ;;  %v3850_v58 = vmul.f32 %v2159_v34, %v3610_v28  ;;  %v1295_v53 = vmul.f32 %v1258_v44, %v3615_v30  ;;  %v2166_v6 = vld [vmem:[%s3521_s16 + $0x18] sm:$0xff]  ;;  %s4292_s16 = sld [smem:[#allocation61_spill]] }
 0x1e6   : > { %v1297_v7 = vmul.f32 %v2157_v62, %v3618_v31  ;;  %v1224_v27 = vadd.f32 %v3794_v46, %v1222_v33  ;;  %v1234_v60 = vadd.f32 %v3803_v23, %v1232_v25  ;;  %v1244_v9 = vadd.f32 %v1243_v3, %v1242_v61  ;;  %v4281_v46 = vld [vmem:[#allocation49_spill] sm:$0xff] }
 0x1e7   : > { %v1254_v21 = vadd.f32 %v1253_v59, %v1252_v0  ;;  %v1272_v54 = vadd.s32 1, %v1271_v35  ;;  %v1299_v17 = vmul.f32 %v2158_v42, %v3624_v36  ;;  %v1301_v63 = vmul.f32 %v2159_v34, %v3630_v39 }
 0x1e8   : > { %v1305_v1 = vmul.f32 %v1258_v44, %v3632_v40  ;;  %v1226_v51 = vadd.f32 %v4281_v46, %v1224_v27  ;;  %v1236_v23 = vadd.f32 %v3806_v56, %v1234_v60  ;;  %v1246_v3 = vadd.f32 %v1245_v22, %v1244_v9 }
 0x1e9   : > { %v1256_v59 = vadd.f32 %v1255_v15, %v1254_v21  ;;  %v1273_v5 = vcvt.s32.f32 %v1272_v54  ;;  %v1307_v32 = vmul.f32 %v2157_v62, %v3642_v47  ;;  %v1309_v50 = vmul.f32 %v2158_v42, %v3644_v48 }
 0x1ea   : > { %v1321_v52 = vadd.s32 6, %v3553_v2  ;;  %1227 = vst [vmem:[%s3665_s6 + $0x20] sm:$0xff] %v1226_v51  ;;  %2154 = vst [vmem:[%s3665_s6 + $0x80] sm:$0xff] %v1236_v23  ;;  %v1311_v44 = vmul.f32 %v2159_v34, %v3651_v55  ;;  %v3874_v33 = vmul.f32 %v1314_v16, %v3569_v8  ;;  %v3877_v56 = vmul.f32 %v2164_v43, %v3577_v11 }
 0x1eb   : > { %2155 = vst [vmem:[%s3665_s6 + $0xe0] sm:$0xff] %v1246_v3  ;;  %2156 = vst [vmem:[%s3665_s6 + $0x140] sm:$0xff] %v1256_v59  ;;  %v3880_v22 = vmul.f32 %v2165_v49, %v3579_v12  ;;  %v1274_v62 = vmul.f32 %v1273_v5, %v3585_v14  ;;  %v1284_v42 = vmul.f32 %v1273_v5, %v3606_v26 }
 0x1ec   : > { %v1294_v15 = vmul.f32 %v1273_v5, %v3626_v37  ;;  %v1304_v25 = vmul.f32 %v1273_v5, %v3639_v45  ;;  %vm1322_vm12 = vcmp.lt.s32.totalorder %v1321_v52, 11  ;;  %v2167_v61 = vadd.s32 4294967212, %v1321_v52 }
 0x1ed   : > { %v3887_v34 = vmul.f32 %v2166_v6, %v3590_v18  ;;  %v1341_v0 = vmul.f32 %v1314_v16, %v3592_v19  ;;  %v1276_v35 = vadd.f32 %v1275_v41, %v1274_v62  ;;  %v1286_v27 = vadd.f32 %v1285_v29, %v1284_v42 }
 0x1ee   : > { %v1296_v60 = vadd.f32 %v1295_v53, %v1294_v15  ;;  %v1306_v9 = vadd.f32 %v1305_v1, %v1304_v25  ;;  %v1323_v21 = vsel %vm1322_vm12, %v1321_v52, 11  ;;  %vm1325_vm13 = vcmp.gt.s32.totalorder %v2167_v61, 0  ;;  %v1370_v15 = vld [vmem:[%s3524_s23] sm:$0xff]  ;;  %v2171_v25 = vld [vmem:[%s3524_s23 + $0x8] sm:$0xff] }
 0x1ef   : > { %v3891_v54 = vmul.f32 %v2164_v43, %v3594_v20  ;;  %v3894_v46 = vmul.f32 %v2165_v49, %v3601_v24  ;;  %v1278_v51 = vadd.f32 %v3837_v57, %v1276_v35  ;;  %v1288_v23 = vadd.f32 %v1287_v4, %v1286_v27  ;;  %v2173_v35 = vld [vmem:[%s3524_s23 + $0x18] sm:$0xff] }
 0x1f0   : > { %v1298_v3 = vadd.f32 %v1297_v7, %v1296_v60  ;;  %v1308_v59 = vadd.f32 %v1307_v32, %v1306_v9  ;;  %v1326_v41 = vsel %vm1325_vm13, %v2167_v61, 0  ;;  %v3898_v29 = vmul.f32 %v2166_v6, %v3610_v28  ;;  %v2172_v61 = vld [vmem:[%s3524_s23 + $0x10] sm:$0xff]  ;;  %s4125_s23 = scalar_lea.hbm %s4292_s16, %s2222_s18 }
 0x1f1   : > { %v1351_v53 = vmul.f32 %v1314_v16, %v3615_v30  ;;  %v1353_v1 = vmul.f32 %v2164_v43, %v3618_v31  ;;  %v1280_v5 = vadd.f32 %v3840_v10, %v1278_v51  ;;  %v1290_v52 = vadd.f32 %v1289_v13, %v1288_v23 }
 0x1f2   : > { %v1300_v62 = vadd.f32 %v1299_v17, %v1298_v3  ;;  %v1310_v57 = vadd.f32 %v1309_v50, %v1308_v59  ;;  %v1327_v42 = vsub.s32 %v1323_v21, %v1326_v41  ;;  %v1355_v4 = vmul.f32 %v2165_v49, %v3624_v36 }
 0x1f3   : > { %v3905_v7 = vmul.f32 %v2166_v6, %v3630_v39  ;;  %v1361_v32 = vmul.f32 %v1314_v16, %v3632_v40  ;;  %v1282_v10 = vadd.f32 %v3843_v38, %v1280_v5  ;;  %v1292_v13 = vadd.f32 %v3850_v58, %v1290_v52 }
 0x1f4   : > { %v1302_v17 = vadd.f32 %v1301_v63, %v1300_v62  ;;  %v1312_v50 = vadd.f32 %v1311_v44, %v1310_v57  ;;  %v1328_v27 = vadd.s32 1, %v1327_v42  ;;  %v1363_v60 = vmul.f32 %v2164_v43, %v3642_v47 }
 0x1f5   : > { %v1365_v9 = vmul.f32 %v2165_v49, %v3644_v48  ;;  %v1377_v21 = vadd.s32 7, %v3553_v2  ;;  %1283 = vst [vmem:[%s3665_s6 + $0x28] sm:$0xff] %v1282_v10  ;;  %2161 = vst [vmem:[%s3665_s6 + $0x88] sm:$0xff] %v1292_v13  ;;  %v1367_v16 = vmul.f32 %v2166_v6, %v3651_v55  ;;  %v3923_v38 = vmul.f32 %v1370_v15, %v3569_v8 }
 0x1f6   : > { %2162 = vst [vmem:[%s3665_s6 + $0xe8] sm:$0xff] %v1302_v17  ;;  %2163 = vst [vmem:[%s3665_s6 + $0x148] sm:$0xff] %v1312_v50  ;;  %v3926_v58 = vmul.f32 %v2171_v25, %v3577_v11  ;;  %v3929_v63 = vmul.f32 %v2172_v61, %v3579_v12  ;;  %v1329_v43 = vcvt.s32.f32 %v1328_v27  ;;  %v3932_v44 = vmul.f32 %v2173_v35, %v3590_v18 }
 0x1f7   : > { %vm1378_vm14 = vcmp.lt.s32.totalorder %v1377_v21, 11  ;;  %v2174_v49 = vadd.s32 4294967212, %v1377_v21  ;;  %v3935_v23 = vmul.f32 %v1370_v15, %v3592_v19  ;;  %v3938_v6 = vmul.f32 %v2171_v25, %v3594_v20 }
 0x1f8   : > { %4282 = vst [vmem:[#allocation51_spill] sm:$0xff] %v3932_v44  ;;  %v1379_v51 = vsel %vm1378_vm14, %v1377_v21, 11  ;;  %v3941_v3 = vmul.f32 %v2172_v61, %v3601_v24  ;;  %v1330_v59 = vmul.f32 %v1329_v43, %v3585_v14  ;;  %v1340_v41 = vmul.f32 %v1329_v43, %v3606_v26 }
 0x1f9   : > { %v1350_v5 = vmul.f32 %v1329_v43, %v3626_v37  ;;  %v1360_v52 = vmul.f32 %v1329_v43, %v3639_v45  ;;  %vm1381_vm15 = vcmp.gt.s32.totalorder %v2174_v49, 0  ;;  %v3948_v62 = vmul.f32 %v2173_v35, %v3610_v28 }
 0x1fa   : > { %v1407_v57 = vmul.f32 %v1370_v15, %v3615_v30  ;;  %v3952_v42 = vmul.f32 %v2171_v25, %v3618_v31  ;;  %v1332_v10 = vadd.f32 %v3874_v33, %v1330_v59  ;;  %v1342_v13 = vadd.f32 %v1341_v0, %v1340_v41 }
 0x1fb   : > { %4283 = vst [vmem:[#allocation50_spill] sm:$0xff] %v3948_v62  ;;  %v1352_v17 = vadd.f32 %v1351_v53, %v1350_v5  ;;  %v1362_v50 = vadd.f32 %v1361_v32, %v1360_v52  ;;  %v1382_v27 = vsel %vm1381_vm15, %v2174_v49, 0  ;;  %v3956_v21 = vmul.f32 %v2172_v61, %v3624_v36 }
 0x1fc   : > { %v3959_v43 = vmul.f32 %v2173_v35, %v3630_v39  ;;  %v1417_v28 = vmul.f32 %v1370_v15, %v3632_v40  ;;  %v1334_v62 = vadd.f32 %v3877_v56, %v1332_v10  ;;  %v1344_v44 = vadd.f32 %v3891_v54, %v1342_v13  ;;  %v1426_v56 = vld [vmem:[%s3531_s21] sm:$0xff] }
 0x1fd   : > { %v1354_v33 = vadd.f32 %v1353_v1, %v1352_v17  ;;  %v1364_v0 = vadd.f32 %v1363_v60, %v1362_v50  ;;  %v1383_v53 = vsub.s32 %v1379_v51, %v1382_v27  ;;  %v1419_v32 = vmul.f32 %v2171_v25, %v3642_v47  ;;  %v2178_v1 = vld [vmem:[%s3531_s21 + $0x8] sm:$0xff]  ;;  %v2179_v25 = vld [vmem:[%s3531_s21 + $0x10] sm:$0xff]  ;;  %v3974_v60 = vld [vmem:[%s3531_s21 + $0x18] sm:$0xff]  ;;  %s1651_s21 = scalar_lea.sflag [#allocation7], %s3479_s14 }
 0x1fe   : > { %v1421_v49 = vmul.f32 %v2172_v61, %v3644_v48  ;;  %v1433_v59 = vadd.s32 8, %v3553_v2  ;;  %v1336_v41 = vadd.f32 %v3880_v22, %v1334_v62  ;;  %v1346_v15 = vadd.f32 %v3894_v46, %v1344_v44 }
 0x1ff   : > { %v1356_v5 = vadd.f32 %v1355_v4, %v1354_v33  ;;  %v1366_v52 = vadd.f32 %v1365_v9, %v1364_v0  ;;  %v1384_v10 = vadd.s32 1, %v1383_v53  ;;  %v1423_v54 = vmul.f32 %v2173_v35, %v3651_v55 }
 0x200   : > { %vm1434_vm0 = vcmp.lt.s32.totalorder %v1433_v59, 11  ;;  %v2181_v61 = vadd.s32 4294967212, %v1433_v59  ;;  %v1338_v22 = vadd.f32 %v3887_v34, %v1336_v41  ;;  %v1348_v46 = vadd.f32 %v3898_v29, %v1346_v15 }
 0x201   : > { %v1358_v4 = vadd.f32 %v3905_v7, %v1356_v5  ;;  %v1368_v9 = vadd.f32 %v1367_v16, %v1366_v52  ;;  %v1385_v44 = vcvt.s32.f32 %v1384_v10  ;;  %v1435_v51 = vsel %vm1434_vm0, %v1433_v59, 11 }
 0x202   : > { %vm1437_vm1 = vcmp.gt.s32.totalorder %v2181_v61, 0  ;;  %v1443_v35 = vmul.f32 %v1426_v56, %v3569_v8  ;;  %1339 = vst [vmem:[%s3665_s6 + $0x30] sm:$0xff] %v1338_v22  ;;  %2168 = vst [vmem:[%s3665_s6 + $0x90] sm:$0xff] %v1348_v46  ;;  %v1445_v13 = vmul.f32 %v2178_v1, %v3577_v11  ;;  %v1447_v17 = vmul.f32 %v2179_v25, %v3579_v12 }
 0x203   : > { %2169 = vst [vmem:[%s3665_s6 + $0xf0] sm:$0xff] %v1358_v4  ;;  %2170 = vst [vmem:[%s3665_s6 + $0x150] sm:$0xff] %v1368_v9  ;;  %v1438_v62 = vsel %vm1437_vm1, %v2181_v61, 0  ;;  %v3988_v34 = vmul.f32 %v3974_v60, %v3590_v18  ;;  %v1386_v29 = vmul.f32 %v1385_v44, %v3585_v14  ;;  %v1396_v7 = vmul.f32 %v1385_v44, %v3606_v26 }
 0x204   : > { %v1406_v16 = vmul.f32 %v1385_v44, %v3626_v37  ;;  %v1416_v50 = vmul.f32 %v1385_v44, %v3639_v45  ;;  %v1439_v27 = vsub.s32 %v1435_v51, %v1438_v62  ;;  %v1453_v33 = vmul.f32 %v1426_v56, %v3592_v19 }
 0x205   : > { %v1455_v0 = vmul.f32 %v2178_v1, %v3594_v20  ;;  %v1457_v53 = vmul.f32 %v2179_v25, %v3601_v24  ;;  %v1388_v59 = vadd.f32 %v3923_v38, %v1386_v29  ;;  %v1398_v41 = vadd.f32 %v3935_v23, %v1396_v7 }
 0x206   : > { %v1408_v15 = vadd.f32 %v1407_v57, %v1406_v16  ;;  %v1418_v5 = vadd.f32 %v1417_v28, %v1416_v50  ;;  %v1440_v52 = vadd.s32 1, %v1439_v27  ;;  %v1463_v10 = vmul.f32 %v1426_v56, %v3615_v30 }
 0x207   : > { %v1465_v61 = vmul.f32 %v2178_v1, %v3618_v31  ;;  %v1467_v22 = vmul.f32 %v2179_v25, %v3624_v36  ;;  %v1390_v46 = vadd.f32 %v3926_v58, %v1388_v59  ;;  %v1400_v4 = vadd.f32 %v3938_v6, %v1398_v41  ;;  %v4286_v59 = vld [vmem:[#allocation48_spill] sm:$0xff] }
 0x208   : > { %v1410_v9 = vadd.f32 %v3952_v42, %v1408_v15  ;;  %v1420_v44 = vadd.f32 %v1419_v32, %v1418_v5  ;;  %v1441_v51 = vcvt.s32.f32 %v1440_v52  ;;  %v1473_v38 = vmul.f32 %v1426_v56, %v3632_v40 }
 0x209   : > { %v1475_v23 = vmul.f32 %v2178_v1, %v3642_v47  ;;  %v1477_v28 = vmul.f32 %v2179_v25, %v3644_v48  ;;  %v1392_v57 = vadd.f32 %v3929_v63, %v1390_v46  ;;  %v1402_v62 = vadd.f32 %v3941_v3, %v1400_v4  ;;  %v4284_v25 = vld [vmem:[#allocation51_spill] sm:$0xff]  ;;  %v4285_v63 = vld [vmem:[#allocation50_spill] sm:$0xff] }
 0x20a   : > { %v1412_v58 = vadd.f32 %v3956_v21, %v1410_v9  ;;  %v1422_v6 = vadd.f32 %v1421_v49, %v1420_v44  ;;  %v1442_v42 = vmul.f32 %v1441_v51, %v3585_v14  ;;  %v1452_v32 = vmul.f32 %v1441_v51, %v3606_v26 }
 0x20b   : > { %v1462_v56 = vmul.f32 %v1441_v51, %v3626_v37  ;;  %v1472_v1 = vmul.f32 %v1441_v51, %v3639_v45  ;;  %v1394_v29 = vadd.f32 %v4284_v25, %v1392_v57  ;;  %v1404_v7 = vadd.f32 %v4285_v63, %v1402_v62  ;;  %v1482_v51 = vld [vmem:[%s3534_s27] sm:$0xff]  ;;  %v2186_v57 = vld [vmem:[%s3534_s27 + $0x10] sm:$0xff] }
 0x20c   : > { %v1414_v3 = vadd.f32 %v3959_v43, %v1412_v58  ;;  %v1424_v16 = vadd.f32 %v1423_v54, %v1422_v6  ;;  %v1444_v50 = vadd.f32 %v1443_v35, %v1442_v42  ;;  %v1454_v21 = vadd.f32 %v1453_v33, %v1452_v32 }
 0x20d   : > { %v1464_v27 = vadd.f32 %v1463_v10, %v1462_v56  ;;  %v1474_v49 = vadd.f32 %v1473_v38, %v1472_v1  ;;  %1395 = vst [vmem:[%s3665_s6 + $0x38] sm:$0xff] %v1394_v29  ;;  %2175 = vst [vmem:[%s3665_s6 + $0x98] sm:$0xff] %v1404_v7  ;;  %v1459_v41 = vmul.f32 %v3974_v60, %v4286_v59  ;;  %v1489_v54 = vadd.s32 9, %v3553_v2  ;;  %v2185_v38 = vld [vmem:[%s3534_s27 + $0x8] sm:$0xff] }
 0x20e   : > { %2176 = vst [vmem:[%s3665_s6 + $0xf8] sm:$0xff] %v1414_v3  ;;  %2177 = vst [vmem:[%s3665_s6 + $0x158] sm:$0xff] %v1424_v16  ;;  %v1469_v15 = vmul.f32 %v3974_v60, %v3630_v39  ;;  %v1479_v43 = vmul.f32 %v3974_v60, %v3651_v55  ;;  %v1446_v35 = vadd.f32 %v1445_v13, %v1444_v50  ;;  %v2187_v60 = vld [vmem:[%s3534_s27 + $0x18] sm:$0xff]  ;;  %v1545_v1 = vadd.s32 10, %v3553_v2  ;;  %v1538_v3 = vld [vmem:[%s3541_s24] sm:$0xff]  ;;  %s2728_s27 = scalar_lea.vmem %s4127_s29, 6144 }
 0x20f   : > { %v1456_v33 = vadd.f32 %v1455_v0, %v1454_v21  ;;  %v1466_v5 = vadd.f32 %v1465_v61, %v1464_v27  ;;  %v1476_v52 = vadd.f32 %v1475_v23, %v1474_v49  ;;  %vm1490_vm2 = vcmp.lt.s32.totalorder %v1489_v54, 11  ;;  %v2192_v16 = vld [vmem:[%s3541_s24 + $0x8] sm:$0xff]  ;;  %p2729_p8 = scmp.ne.s32.totalorder %s4127_s29, %s2728_s27 }
 0x210   : > { %v2188_v10 = vadd.s32 4294967212, %v1489_v54  ;;  %v1448_v46 = vadd.f32 %v1447_v17, %v1446_v35  ;;  %v1491_v62 = vsel %vm1490_vm2, %v1489_v54, 11  ;;  %v1499_v17 = vmul.f32 %v1482_v51, %v3569_v8  ;;  %v2193_v54 = vld [vmem:[%s3541_s24 + $0x10] sm:$0xff]  ;;  %v2194_v35 = vld [vmem:[%s3541_s24 + $0x18] sm:$0xff]  ;;  %s2854_s24 = smov [#allocation25]  }
 0x211   : > { %v1458_v4 = vadd.f32 %v1457_v53, %v1456_v33  ;;  %v1468_v9 = vadd.f32 %v1467_v22, %v1466_v5  ;;  %v1478_v44 = vadd.f32 %v1477_v28, %v1476_v52  ;;  %v1501_v53 = vmul.f32 %v2185_v38, %v3577_v11  ;;  %p2730_p2 = pnand %p2729_p8, %p4293_p4 }
 0x212   : > { %vm1493_vm3 = vcmp.gt.s32.totalorder %v2188_v10, 0  ;;  %v1450_v13 = vadd.f32 %v3988_v34, %v1448_v46  ;;  %v1503_v28 = vmul.f32 %v2186_v57, %v3579_v12  ;;  %v1505_v6 = vmul.f32 %v2187_v60, %v3590_v18 }
 0x213   : > { %v1460_v0 = vadd.f32 %v1459_v41, %v1458_v4  ;;  %v1470_v61 = vadd.f32 %v1469_v15, %v1468_v9  ;;  %v1480_v23 = vadd.f32 %v1479_v43, %v1478_v44  ;;  %v1494_v58 = vsel %vm1493_vm3, %v2188_v10, 0  ;;  %p2731_p3 = pneg %p2730_p2 }
 0x214   : > { %1451 = vst [vmem:[%s3665_s6 + $0x40] sm:$0xff] %v1450_v13  ;;  %v1495_v22 = vsub.s32 %v1491_v62, %v1494_v58  ;;  %v1509_v34 = vmul.f32 %v1482_v51, %v3592_v19  ;;  %v1511_v42 = vmul.f32 %v2185_v38, %v3594_v20  ;;  %v1513_v32 = vmul.f32 %v2186_v57, %v3601_v24 }
 0x215   : > { %2182 = vst [vmem:[%s3665_s6 + $0xa0] sm:$0xff] %v1460_v0  ;;  %2183 = vst [vmem:[%s3665_s6 + $0x100] sm:$0xff] %v1470_v61  ;;  %v1515_v56 = vmul.f32 %v2187_v60, %v4286_v59  ;;  %v1519_v29 = vmul.f32 %v1482_v51, %v3615_v30  ;;  %v1521_v63 = vmul.f32 %v2185_v38, %v3618_v31  ;;  %vm1546_vm4 = vcmp.lt.s32.totalorder %v1545_v1, 11 }
 0x216   : > { %2184 = vst [vmem:[%s3665_s6 + $0x160] sm:$0xff] %v1480_v23  ;;  %v1496_v25 = vadd.s32 1, %v1495_v22  ;;  %v1523_v7 = vmul.f32 %v2186_v57, %v3624_v36  ;;  %v1525_v50 = vmul.f32 %v2187_v60, %v3630_v39  ;;  %v1529_v21 = vmul.f32 %v1482_v51, %v3632_v40 }
 0x217   : > { %v2195_v27 = vadd.s32 4294967212, %v1545_v1  ;;  %v1531_v41 = vmul.f32 %v2185_v38, %v3642_v47  ;;  %v1533_v15 = vmul.f32 %v2186_v57, %v3644_v48  ;;  %v1535_v43 = vmul.f32 %v2187_v60, %v3651_v55 }
 0x218   : > { %v1497_v49 = vcvt.s32.f32 %v1496_v25  ;;  %v1547_v33 = vsel %vm1546_vm4, %v1545_v1, 11  ;;  %v1555_v5 = vmul.f32 %v1538_v3, %v3569_v8  ;;  %v1557_v52 = vmul.f32 %v2192_v16, %v3577_v11 }
 0x219   : > { %vm1549_vm5 = vcmp.gt.s32.totalorder %v2195_v27, 0  ;;  %v1559_v51 = vmul.f32 %v2193_v54, %v3579_v12  ;;  %v4067_v38 = vmul.f32 %v2194_v35, %v3590_v18  ;;  %v1565_v57 = vmul.f32 %v1538_v3, %v3592_v19 }
 0x21a   : > { %v1498_v10 = vmul.f32 %v1497_v49, %v3585_v14  ;;  %v1508_v46 = vmul.f32 %v1497_v49, %v3606_v26  ;;  %v1518_v4 = vmul.f32 %v1497_v49, %v3626_v37  ;;  %v1528_v9 = vmul.f32 %v1497_v49, %v3639_v45 }
 0x21b   : > { %v1550_v44 = vsel %vm1549_vm5, %v2195_v27, 0  ;;  %v1567_v23 = vmul.f32 %v2192_v16, %v3594_v20  ;;  %v1569_v58 = vmul.f32 %v2193_v54, %v3601_v24  ;;  %v1575_v22 = vmul.f32 %v1538_v3, %v3615_v30 }
 0x21c   : > { %v1500_v60 = vadd.f32 %v1499_v17, %v1498_v10  ;;  %v1510_v62 = vadd.f32 %v1509_v34, %v1508_v46  ;;  %v1520_v13 = vadd.f32 %v1519_v29, %v1518_v4  ;;  %v1530_v0 = vadd.f32 %v1529_v21, %v1528_v9 }
 0x21d   : > { %v1551_v61 = vsub.s32 %v1547_v33, %v1550_v44  ;;  %v1577_v18 = vmul.f32 %v2192_v16, %v3618_v31  ;;  %v1585_v11 = vmul.f32 %v1538_v3, %v3632_v40  ;;  %v1601_v17 = vadd.s32 11, %v3553_v2 }
 0x21e   : > { %v1502_v1 = vadd.f32 %v1501_v53, %v1500_v60  ;;  %v1512_v25 = vadd.f32 %v1511_v42, %v1510_v62  ;;  %v1522_v27 = vadd.f32 %v1521_v63, %v1520_v13  ;;  %v1532_v49 = vadd.f32 %v1531_v41, %v1530_v0 }
 0x21f   : > { %v1552_v12 = vadd.s32 1, %v1551_v61  ;;  %v1587_v53 = vmul.f32 %v2192_v16, %v3642_v47  ;;  %vm1602_vm6 = vcmp.lt.s32.totalorder %v1601_v17, 11  ;;  %v2202_v42 = vadd.s32 4294967212, %v1601_v17  ;;  %v1594_v61 = vld [vmem:[%s3545_s3] sm:$0xff] }
 0x220   : > { %v1504_v34 = vadd.f32 %v1503_v28, %v1502_v1  ;;  %v1514_v29 = vadd.f32 %v1513_v32, %v1512_v25  ;;  %v1524_v21 = vadd.f32 %v1523_v7, %v1522_v27  ;;  %v1534_v33 = vadd.f32 %v1533_v15, %v1532_v49 }
 0x221   : > { %v1553_v10 = vcvt.s32.f32 %v1552_v12  ;;  %v1579_v12 = vmul.f32 %v2193_v54, %v3624_v36  ;;  %vm1605_vm7 = vcmp.gt.s32.totalorder %v2202_v42, 0  ;;  %v1581_v9 = vmul.f32 %v2194_v35, %v3630_v39 }
 0x222   : > { %v1506_v63 = vadd.f32 %v1505_v6, %v1504_v34  ;;  %v1516_v41 = vadd.f32 %v1515_v56, %v1514_v29  ;;  %v1526_v46 = vadd.f32 %v1525_v50, %v1524_v21  ;;  %v1536_v4 = vadd.f32 %v1535_v43, %v1534_v33  ;;  %v4287_v21 = vld [vmem:[#allocation45_spill] sm:$0xff] }
 0x223   : > { %v1554_v3 = vmul.f32 %v1553_v10, %v3585_v14  ;;  %v1564_v2 = vmul.f32 %v1553_v10, %v3606_v26  ;;  %v1574_v28 = vmul.f32 %v1553_v10, %v3626_v37  ;;  %v1584_v32 = vmul.f32 %v1553_v10, %v3639_v45 }
 0x224   : > { %1507 = vst [vmem:[%s3665_s6 + $0x48] sm:$0xff] %v1506_v63  ;;  %2189 = vst [vmem:[%s3665_s6 + $0xa8] sm:$0xff] %v1516_v41  ;;  %v1589_v6 = vmul.f32 %v2193_v54, %v3644_v48  ;;  %v1603_v56 = vsel %vm1602_vm6, %v1601_v17, 11  ;;  %v1571_v43 = vmul.f32 %v2194_v35, %v4286_v59  ;;  %v1591_v44 = vmul.f32 %v2194_v35, %v3651_v55  ;;  %v2200_v17 = vld [vmem:[%s3545_s3 + $0x10] sm:$0xff]  ;;  %v4289_v63 = vld [vmem:[#allocation46_spill] sm:$0xff] }
 0x225   : > { %2190 = vst [vmem:[%s3665_s6 + $0x108] sm:$0xff] %v1526_v46  ;;  %2191 = vst [vmem:[%s3665_s6 + $0x168] sm:$0xff] %v1536_v4  ;;  %v1556_v7 = vadd.f32 %v1555_v5, %v1554_v3  ;;  %v1566_v16 = vadd.f32 %v1565_v57, %v1564_v2  ;;  %v1576_v50 = vadd.f32 %v1575_v22, %v1574_v28  ;;  %v1606_v60 = vsel %vm1605_vm7, %v2202_v42, 0  ;;  %v2199_v22 = vld [vmem:[%s3545_s3 + $0x8] sm:$0xff]  ;;  %v4290_v2 = vld [vmem:[#allocation47_spill] sm:$0xff] }
 0x226   : > { %v1586_v15 = vadd.f32 %v1585_v11, %v1584_v32  ;;  %v1607_v1 = vsub.s32 %v1603_v56, %v1606_v60  ;;  %v1611_v35 = vmul.f32 %v1594_v61, %v3569_v8  ;;  %v1641_v29 = vmul.f32 %v1594_v61, %v3632_v40 }
 0x227   : > { %v1558_v62 = vadd.f32 %v1557_v52, %v1556_v7  ;;  %v1568_v13 = vadd.f32 %v1567_v23, %v1566_v16  ;;  %v1578_v0 = vadd.f32 %v1577_v18, %v1576_v50  ;;  %v1613_v8 = vmul.f32 %v2199_v22, %v4287_v21 }
 0x228   : > { %v1588_v54 = vadd.f32 %v1587_v53, %v1586_v15  ;;  %v1608_v27 = vadd.s32 1, %v1607_v1  ;;  %v1633_v33 = vmul.f32 %v2199_v22, %v3618_v31  ;;  %v1643_v10 = vmul.f32 %v2199_v22, %v3642_v47  ;;  %v2201_v53 = vld [vmem:[%s3545_s3 + $0x18] sm:$0xff]  ;;  %s2732_s3 = sshll.u32 %s2854_s24, 4  ;;  %s2733_s3 = int_to_ptr.vmem [resolvable:$false] %s2732_s3 }
 0x229   : > { %v1560_v25 = vadd.f32 %v1559_v51, %v1558_v62  ;;  %v1570_v5 = vadd.f32 %v1569_v58, %v1568_v13  ;;  %v1580_v57 = vadd.f32 %v1579_v12, %v1578_v0  ;;  %v1621_v51 = vmul.f32 %v1594_v61, %v3592_v19  ;;  %s2734_s5 = scalar_lea.vmem %s2733_s3, 12288  ;;  %p2735_p6 = scmp.lt.s32.totalorder %s4127_s29, %s2733_s3 }
 0x22a   : > { %v1590_v11 = vadd.f32 %v1589_v6, %v1588_v54  ;;  %v1609_v34 = vcvt.s32.f32 %v1608_v27  ;;  %v1631_v58 = vmul.f32 %v1594_v61, %v3615_v30  ;;  %v1615_v41 = vmul.f32 %v2200_v17, %v4289_v63  ;;  %p2736_p9 = scmp.lt.s32.totalorder %s2734_s5, %s2728_s27 }
 0x22b   : > { %v1562_v52 = vadd.f32 %v4067_v38, %v1560_v25  ;;  %v1572_v23 = vadd.f32 %v1571_v43, %v1570_v5  ;;  %v1582_v18 = vadd.f32 %v1581_v9, %v1580_v57  ;;  %v1623_v38 = vmul.f32 %v2199_v22, %v3594_v20 }
 0x22c   : > { %v1592_v49 = vadd.f32 %v1591_v44, %v1590_v11  ;;  %v1610_v42 = vmul.f32 %v1609_v34, %v3585_v14  ;;  %v1620_v19 = vmul.f32 %v1609_v34, %v3606_v26  ;;  %v1630_v30 = vmul.f32 %v1609_v34, %v3626_v37  ;;  %p2737_p0 = por %p2736_p9, %p2735_p6 }
 0x22d   : > { %1563 = vst [vmem:[%s3665_s6 + $0x50] sm:$0xff] %v1562_v52  ;;  %2196 = vst [vmem:[%s3665_s6 + $0xb0] sm:$0xff] %v1572_v23  ;;  %v1640_v40 = vmul.f32 %v1609_v34, %v3639_v45  ;;  %v1625_v46 = vmul.f32 %v2200_v17, %v3601_v24  ;;  %v1635_v20 = vmul.f32 %v2200_v17, %v3624_v36 }
 0x22e   : > { %2197 = vst [vmem:[%s3665_s6 + $0x110] sm:$0xff] %v1582_v18  ;;  %2198 = vst [vmem:[%s3665_s6 + $0x170] sm:$0xff] %v1592_v49  ;;  %v1645_v31 = vmul.f32 %v2200_v17, %v3644_v48  ;;  %v1612_v47 = vadd.f32 %v1611_v35, %v1610_v42  ;;  %v1622_v4 = vadd.f32 %v1621_v51, %v1620_v19  ;;  %p2738_p7 = pnand %p2737_p0, %p2731_p3 }
 0x22f   : > { %v1632_v3 = vadd.f32 %v1631_v58, %v1630_v30  ;;  %v1642_v14 = vadd.f32 %v1641_v29, %v1640_v40  ;;  %v1617_v28 = vmul.f32 %v2201_v53, %v4290_v2  ;;  %v1627_v26 = vmul.f32 %v2201_v53, %v4286_v59 }
 0x230   : > { %v1637_v37 = vmul.f32 %v2201_v53, %v3630_v39  ;;  %v1647_v45 = vmul.f32 %v2201_v53, %v3651_v55  ;;  %v1614_v24 = vadd.f32 %v1613_v8, %v1612_v47  ;;  %v1624_v32 = vadd.f32 %v1623_v38, %v1622_v4 }
 0x231   : > { %v1634_v36 = vadd.f32 %v1633_v33, %v1632_v3  ;;  %v1644_v48 = vadd.f32 %v1643_v10, %v1642_v14 }
 0x232   : > { %v1616_v12 = vadd.f32 %v1615_v41, %v1614_v24  ;;  %v1626_v6 = vadd.f32 %v1625_v46, %v1624_v32 }
 0x233   : > { %v1636_v56 = vadd.f32 %v1635_v20, %v1634_v36  ;;  %v1646_v59 = vadd.f32 %v1645_v31, %v1644_v48 }
 0x234   : > { %v1618_v39 = vadd.f32 %v1617_v28, %v1616_v12  ;;  %v1628_v55 = vadd.f32 %v1627_v26, %v1626_v6 }
 0x235   : > { %v1638_v7 = vadd.f32 %v1637_v37, %v1636_v56  ;;  %v1648_v16 = vadd.f32 %v1647_v45, %v1646_v59 }
 0x236   : > { %1619 = vst [vmem:[%s3665_s6 + $0x58] sm:$0xff] %v1618_v39  ;;  %2203 = vst [vmem:[%s3665_s6 + $0xb8] sm:$0xff] %v1628_v55 }
 0x237   : > { %2204 = vst [vmem:[%s3665_s6 + $0x118] sm:$0xff] %v1638_v7  ;;  %2205 = vst [vmem:[%s3665_s6 + $0x178] sm:$0xff] %v1648_v16 }
 0x238   : > { %2741 = shalt.err (!%p2738_p7)
}
 0x239   : > { %s2742_s19 = scalar_lea.hbm %s4125_s23, 6144  ;;  %s2746_s2 = scalar_lea.hbm %s4292_s16, 12288 }
 0x23a   : > { %p2743_p5 = scmp.ne.s32.totalorder %s4125_s23, %s2742_s19  ;;  %p2747_p1 = scmp.lt.u32.totalorder %s4125_s23, %s4292_s16 }
 0x23b   : > { %p2748_p12 = scmp.lt.u32.totalorder %s2746_s2, %s2742_s19  ;;  %p2750_p8 = scmp.lt.u32.totalorder %s2742_s19, %s4125_s23 }
 0x23c   : > { %p2744_p10 = pnand %p2743_p5, %p4293_p4 }
 0x23d   : > { %p2749_p11 = por %p2748_p12, %p2747_p1 }
 0x23e   : > { %p2745_p13 = pneg %p2744_p10 }
 0x23f   : > { %p2751_p2 = por %p2750_p8, %p2749_p11 }
 0x241   : > { %p2752_p3 = pnand %p2751_p2, %p2745_p13 }
 0x243   : > { %2755 = shalt.err (!%p2752_p3)
}
 0x244   : > { %s2855_s17 = smov 1536   ;;  %s2856_s26 = smov 96  }
 0x245   : > { %2247 = dma.vmem_to_hbm [thread:$0]  (%p4293_p4), %s4127_s29, 6144, %s4125_s23, %s1651_s21, %s2855_s17, %s2855_s17, %s2856_s26  }
 0x246 PF: > { %s4294_s30 = sld [smem:[#allocation35_spill]]  ;;  %s4295_s20 = sld [smem:[#allocation44_spill]] }
 0x247   : > { %s4296_s9 = sld [smem:[#allocation39_spill]] }
 0x24c   : > { %s1681_s4 = sand.u32 1, %s4294_s30   ;;  %p4297_p6 = scmp.ne.s32.totalorder %s4295_s20, 0 }
 0x24d   : > { %p4298_p9 = scmp.ge.s32.totalorder %s4296_s9, 2  ;;  %s1682_s6 = scalar_lea.sflag [#allocation7], %s1681_s4 }
 0x24f   : > { %p2287_p0 = pnand %p4298_p9, %p4297_p6 }
 0x251   : > { %2811 = dma.done.wait (!%p2287_p0), %s1682_s6, 6144  }
 0x252   : > { %2813 = vsyncadd (!%p2287_p0), %s1682_s6, 4294961152  ;;  %s56_s15 = sadd.s32 1, %s4296_s9   ;;  %s4299_s8 = sld [smem:[#allocation36_spill]] }
 0x253   : > { %p53_p7 = scmp.ge.s32.totalorder %s56_s15, 4   ;;  %s4300_s28 = sld [smem:[#allocation43_spill]] }
 0x254   : > { %s4301_s29 = sld [smem:[#allocation38_spill]]  ;;  %s4302_s30 = sld [smem:[#allocation41_spill]] }
 0x255   : > { %s4303_s0 = smov %s2820_s1  ;;  %55 = sbr.rel (!%p53_p7) target bundleno = 45 (0x2d), region = 286 }
 0x258   : > { %s4304_s1 = smov %s4299_s8 }
 0x25c   :  { %1687 = vsyncpa [#allocation6], 1 }
 0x25d   :  { %1689 = vsyncpa [#allocation6 + $0x1], 1 }
 0x25e   :  { %1690 = vsyncpa [#allocation9], 1 }
 0x25f   :  { %1692 = vsyncpa [#allocation9 + $0x1], 1 }
 0x260   :  { %1693 = vsyncpa [#allocation12], 1 }
 0x261   :  { %1695 = vsyncpa [#allocation12 + $0x1], 1 }
 0x262   :  { %1696 = vsyncpa [#allocation15], 1 }
 0x263   :  { %1698 = vsyncpa [#allocation15 + $0x1], 1 }
 0x264   :  { %1699 = vsyncpa [#allocation18], 1 }
 0x265   :  { %1701 = vsyncpa [#allocation18 + $0x1], 1 }
 0x266   :  { %1702 = vsyncpa [#allocation21], 1 }
 0x267   :  { %1704 = vsyncpa [#allocation21 + $0x1], 1 }
 0x268   :  { %1705 = vsyncpa [#allocation24], 1 }
 0x269   :  { %1707 = vsyncpa [#allocation24 + $0x1], 1 }
 0x26a   :  { %1708 = vsyncpa [#allocation7], 1 }
 0x26b   :  { %1710 = vsyncpa [#allocation7 + $0x1], 1 }

</bundles_post_ra>
